<compile_context>
chip_gen: v6e
topology: v6e:2x2x1
jax: 0.10.0
libtpu: 0.0.40
codegen_flags: <defaults>
</compile_context>

<pallas_src>
import functools

import jax
import jax.numpy as jnp
from jax.experimental import pallas as pl
from jax.experimental.pallas import tpu as pltpu

_TAPS = tuple((kh, kw) for kh in range(3) for kw in range(3))
_EPS = 1e-5


# ---------------------------------------------------------------------------
# In-kernel helpers.
# ---------------------------------------------------------------------------
def _build_tap_slab(src_ref, slab_ref, H, W, C, dtype):
    """im2col: scatter the 9 shifted 3x3 taps of src_ref (1,H,W,C) into
    slab_ref (1,H,W,9C) lanes [t*C:(t+1)*C].  Out-of-image taps are zero-filled
    via thin border strips, folding the conv's "same" padding into the slab
    (no padded activation copy exists anywhere).  Reads are ref views and each
    tap is cast once to the MXU dtype at write time."""
    for t, (kh, kw) in enumerate(_TAPS):
        dh, dw = kh - 1, kw - 1
        h_lo, h_hi = max(0, -dh), H - max(0, dh)
        w_lo, w_hi = max(0, -dw), W - max(0, dw)
        c0 = t * C
        if h_lo > 0:
            slab_ref[0, :h_lo, :, c0:c0 + C] = jnp.zeros((h_lo, W, C), dtype)
        if h_hi < H:
            slab_ref[0, h_hi:, :, c0:c0 + C] = jnp.zeros((H - h_hi, W, C), dtype)
        if w_lo > 0:
            slab_ref[0, :, :w_lo, c0:c0 + C] = jnp.zeros((H, w_lo, C), dtype)
        if w_hi < W:
            slab_ref[0, :, w_hi:, c0:c0 + C] = jnp.zeros((H, W - w_hi, C), dtype)
        slab_ref[0, h_lo:h_hi, w_lo:w_hi, c0:c0 + C] = (
            src_ref[0, h_lo + dh:h_hi + dh, w_lo + dw:w_hi + dw, :].astype(dtype))


def _partial_stats(y):
    """Per-tile channel (sum, sum-of-squares) for the two-phase BatchNorm."""
    s1 = jnp.sum(y, axis=0, keepdims=True)
    s2 = jnp.sum(y * y, axis=0, keepdims=True)
    return jnp.concatenate([s1, s2], axis=0).reshape(1, 2, -1)


def _mm(lhs, rhs, mxu_dtype):
    prec = jax.lax.Precision.HIGHEST if mxu_dtype == jnp.float32 else None
    return jnp.dot(lhs, rhs, preferred_element_type=jnp.float32, precision=prec)


# ---------------------------------------------------------------------------
# Stage 1: conv1 (+ optional 1x1 projection) per batch tile + BN partial stats.
# ---------------------------------------------------------------------------
def _stage1_kernel(x_ref, w1_ref, *rest, H, W, Cin, Cout, has_shortcut, mxu_dtype):
    if has_shortcut:
        ws_ref, y1_ref, s1_ref, ysc_ref, ssc_ref, slab_ref = rest
    else:
        y1_ref, s1_ref, slab_ref = rest
    HW = H * W

    _build_tap_slab(x_ref, slab_ref, H, W, Cin, mxu_dtype)
    y1 = _mm(slab_ref[...].reshape(HW, 9 * Cin), w1_ref[...], mxu_dtype)
    y1_ref[...] = y1.reshape(1, H, W, Cout)
    s1_ref[...] = _partial_stats(y1)

    if has_shortcut:
        xf = x_ref[...].reshape(HW, Cin).astype(mxu_dtype)
        ysc = _mm(xf, ws_ref[...], mxu_dtype)
        ysc_ref[...] = ysc.reshape(1, H, W, Cout)
        ssc_ref[...] = _partial_stats(ysc)


# ---------------------------------------------------------------------------
# Stage 2: BN1 normalize + ReLU fused into one FMA pass -> conv2 + BN2 stats.
# ---------------------------------------------------------------------------
def _stage2_kernel(y1_ref, sc1_ref, sh1_ref, w2_ref, y2_ref, s2_ref,
                   h1_ref, slab_ref, *, H, W, Cout, mxu_dtype):
    HW = H * W
    # Single FMA + max pass, written straight into the bf16 h1 scratch that
    # feeds conv2's tap slab (no f32 h1 traced value kept alive).
    h1_ref[...] = jnp.maximum(y1_ref[...] * sc1_ref[...] + sh1_ref[...],
                              0.0).astype(mxu_dtype)
    _build_tap_slab(h1_ref, slab_ref, H, W, Cout, mxu_dtype)
    y2 = _mm(slab_ref[...].reshape(HW, 9 * Cout), w2_ref[...], mxu_dtype)
    y2_ref[...] = y2.reshape(1, H, W, Cout)
    s2_ref[...] = _partial_stats(y2)


# ---------------------------------------------------------------------------
# Stage 3: BN2 + residual + ReLU epilogue with a lane-dense (H, W*Cout) store.
# ---------------------------------------------------------------------------
def _stage3_proj_kernel(y2_ref, sc2_ref, sh2_ref, ysc_ref, scs_ref, shs_ref,
                        o_ref, *, H, W, Cout):
    out = jnp.maximum(y2_ref[...] * sc2_ref[...] + sh2_ref[...]
                      + ysc_ref[...] * scs_ref[...] + shs_ref[...], 0.0)
    o_ref[...] = out.reshape(1, H, W * Cout)


def _stage3_id_kernel(y2_ref, sc2_ref, sh2_ref, x_ref, o_ref, *, H, W, Cout):
    out = jnp.maximum(y2_ref[...] * sc2_ref[...] + sh2_ref[...] + x_ref[...], 0.0)
    o_ref[...] = out.reshape(1, H, W * Cout)


# ---------------------------------------------------------------------------
# Host-side helpers.
# ---------------------------------------------------------------------------
def _vmem_limit_bytes():
    cap = 64 * 1024 * 1024
    try:
        cap = int(getattr(pltpu.get_tpu_info(), "vmem_capacity_bytes", cap))
    except Exception:
        pass
    # ~100 MiB usable on v5e/v6e (128 MiB physical), ~48 MiB on v7x (64 MiB);
    # always leave compiler headroom.
    return int(max(32 * 1024 * 1024,
                   min(cap - 16 * 1024 * 1024, int(cap * 0.8), 100 * 1024 * 1024)))


def _bn_scale_shift(stats, gamma, beta, count, eps=_EPS):
    """Fold training-mode BN (biased batch variance) into one scale/shift."""
    s1 = jnp.sum(stats[:, 0, :], axis=0)
    s2 = jnp.sum(stats[:, 1, :], axis=0)
    mu = s1 / count
    # One-pass variance; clamp guards tiny negative values from cancellation.
    # TODO(synk): centered / Welford accumulation if stats span many tiles at
    #             large activation magnitudes.
    var = jnp.maximum(s2 / count - mu * mu, 0.0)
    scale = gamma.astype(jnp.float32) * jax.lax.rsqrt(var + eps)
    shift = beta.astype(jnp.float32) - mu * scale
    return scale.reshape(1, -1), shift.reshape(1, -1)


def resblock_pallas(x_nchw, params, stride=1, use_bf16=True):
    N, Cin, H, W = x_nchw.shape
    Cout = params["w1"].shape[0]
    # TODO(synk): stride != 1 (strided 3x3 conv) is not implemented.
    assert stride == 1, "only stride=1 is implemented in the fused Pallas kernels"
    has_shortcut = (stride != 1) or (Cin != Cout)

    f32 = jnp.float32
    mxu_dtype = jnp.bfloat16 if use_bf16 else f32
    M = N * H * W
    vmem_limit = _vmem_limit_bytes()

    def cparams(flops, bytes_accessed, transcendentals=0):
        return dict(
            compiler_params=pltpu.CompilerParams(
                dimension_semantics=("parallel",),
                vmem_limit_bytes=vmem_limit),
            cost_estimate=pl.CostEstimate(
                flops=int(flops), transcendentals=int(transcendentals),
                bytes_accessed=int(bytes_accessed)))

    # NCHW -> NHWC at the boundary (channels -> lanes); conv padding is folded
    # into the in-kernel slab build, so no padded x copy round-trips HBM.
    x = jnp.transpose(x_nchw, (0, 2, 3, 1)).astype(f32)

    # PyTorch conv weights (Cout,Cin,3,3) -> (9*Cin,Cout), tap-major/chan-minor,
    # cast ONCE to the MXU dtype (bf16 by default; f32 is the exact debug path).
    w1 = jnp.transpose(params["w1"], (2, 3, 1, 0)).reshape(9 * Cin, Cout).astype(mxu_dtype)
    w2 = jnp.transpose(params["w2"], (2, 3, 1, 0)).reshape(9 * Cout, Cout).astype(mxu_dtype)

    tile4 = lambda C: pl.BlockSpec((1, H, W, C), lambda n: (n, 0, 0, 0))
    const2 = lambda R, C: pl.BlockSpec((R, C), lambda n: (0, 0))   # resident block
    stats_spec = pl.BlockSpec((1, 2, Cout), lambda n: (n, 0, 0))
    stats_shape = jax.ShapeDtypeStruct((N, 2, Cout), f32)
    ytile_shape = jax.ShapeDtypeStruct((N, H, W, Cout), f32)

    # ---- stage 1: conv1 (+ 1x1 projection) + BN partial stats ---------------
    if has_shortcut:
        ws = jnp.transpose(params["ws"][:, :, 0, 0], (1, 0)).astype(mxu_dtype)
        k1 = functools.partial(_stage1_kernel, H=H, W=W, Cin=Cin, Cout=Cout,
                               has_shortcut=True, mxu_dtype=mxu_dtype)
        y1, st1, ysc, stsc = pl.pallas_call(
            k1, grid=(N,),
            in_specs=[tile4(Cin), const2(9 * Cin, Cout), const2(Cin, Cout)],
            out_specs=(tile4(Cout), stats_spec, tile4(Cout), stats_spec),
            out_shape=(ytile_shape, stats_shape, ytile_shape, stats_shape),
            scratch_shapes=[pltpu.VMEM((1, H, W, 9 * Cin), mxu_dtype)],
            **cparams(2 * M * (9 * Cin + Cin) * Cout,
                      4 * (x.size + 2 * M * Cout) + (w1.size + ws.size) * 2),
        )(x, w1, ws)
    else:
        k1 = functools.partial(_stage1_kernel, H=H, W=W, Cin=Cin, Cout=Cout,
                               has_shortcut=False, mxu_dtype=mxu_dtype)
        y1, st1 = pl.pallas_call(
            k1, grid=(N,),
            in_specs=[tile4(Cin), const2(9 * Cin, Cout)],
            out_specs=(tile4(Cout), stats_spec),
            out_shape=(ytile_shape, stats_shape),
            scratch_shapes=[pltpu.VMEM((1, H, W, 9 * Cin), mxu_dtype)],
            **cparams(2 * M * 9 * Cin * Cout,
                      4 * (x.size + M * Cout) + w1.size * 2),
        )(x, w1)

    sc1, sh1 = _bn_scale_shift(st1, params["g1"], params["b1"], M)

    # ---- stage 2: BN1 + ReLU (fused FMA) -> conv2 + BN2 partial stats -------
    k2 = functools.partial(_stage2_kernel, H=H, W=W, Cout=Cout, mxu_dtype=mxu_dtype)
    y2, st2 = pl.pallas_call(
        k2, grid=(N,),
        in_specs=[tile4(Cout), const2(1, Cout), const2(1, Cout),
                  const2(9 * Cout, Cout)],
        out_specs=(tile4(Cout), stats_spec),
        out_shape=(ytile_shape, stats_shape),
        scratch_shapes=[pltpu.VMEM((1, H, W, Cout), mxu_dtype),
                        pltpu.VMEM((1, H, W, 9 * Cout), mxu_dtype)],
        **cparams(2 * M * 9 * Cout * Cout, 4 * 2 * M * Cout + w2.size * 2),
    )(y1, sc1, sh1, w2)

    sc2, sh2 = _bn_scale_shift(st2, params["g2"], params["b2"], M)

    # ---- stage 3: BN2 + residual + ReLU, lane-dense (N,H,W*Cout) writeback --
    out_shape = jax.ShapeDtypeStruct((N, H, W * Cout), f32)
    out_spec = pl.BlockSpec((1, H, W * Cout), lambda n: (n, 0, 0))
    if has_shortcut:
        scs, shs = _bn_scale_shift(stsc, params["gs"], params["bs"], M)
        k3 = functools.partial(_stage3_proj_kernel, H=H, W=W, Cout=Cout)
        out = pl.pallas_call(
            k3, grid=(N,),
            in_specs=[tile4(Cout), const2(1, Cout), const2(1, Cout),
                      tile4(Cout), const2(1, Cout), const2(1, Cout)],
            out_specs=out_spec, out_shape=out_shape,
            **cparams(8 * M * Cout, 4 * 3 * M * Cout),
        )(y2, sc2, sh2, ysc, scs, shs)
    else:
        k3 = functools.partial(_stage3_id_kernel, H=H, W=W, Cout=Cout)
        out = pl.pallas_call(
            k3, grid=(N,),
            in_specs=[tile4(Cout), const2(1, Cout), const2(1, Cout), tile4(Cin)],
            out_specs=out_spec, out_shape=out_shape,
            **cparams(5 * M * Cout, 4 * 3 * M * Cout),
        )(y2, sc2, sh2, x)

    return jnp.transpose(out.reshape(N, H, W, Cout), (0, 3, 1, 2))   # NCHW


# ---------------------------------------------------------------------------
# Pure-JAX reference (NCHW, lax.conv) for correctness checking.
# ---------------------------------------------------------------------------
def _conv_nchw(x, w, stride, padding):
    return jax.lax.conv_general_dilated(
        x, w, window_strides=(stride, stride),
        padding=((padding, padding), (padding, padding)),
        dimension_numbers=("NCHW", "OIHW", "NCHW"),
        precision=jax.lax.Precision.HIGHEST)


def _bn_train_nchw(y, g, b, eps=_EPS):
    mu = jnp.mean(y, axis=(0, 2, 3), keepdims=True)
    var = jnp.mean((y - mu) ** 2, axis=(0, 2, 3), keepdims=True)
    return (y - mu) / jnp.sqrt(var + eps) * g[None, :, None, None] + b[None, :, None, None]


def resblock_ref(x, params, stride=1):
    Cin = x.shape[1]
    Cout = params["w1"].shape[0]
    out = _conv_nchw(x, params["w1"], stride, 1)
    out = jnp.maximum(_bn_train_nchw(out, params["g1"], params["b1"]), 0.0)
    out = _conv_nchw(out, params["w2"], 1, 1)
    out = _bn_train_nchw(out, params["g2"], params["b2"])
    if stride != 1 or Cin != Cout:
        sc = _conv_nchw(x, params["ws"], stride, 0)
        sc = _bn_train_nchw(sc, params["gs"], params["bs"])
    else:
        sc = x
    return jnp.maximum(out + sc, 0.0)


def _make_params(key, Cin, Cout):
    ks = jax.random.split(key, 9)
    p = {
        "w1": 0.1 * jax.random.normal(ks[0], (Cout, Cin, 3, 3), jnp.float32),
        "g1": 1.0 + 0.1 * jax.random.normal(ks[1], (Cout,), jnp.float32),
        "b1": 0.1 * jax.random.normal(ks[2], (Cout,), jnp.float32),
        "w2": 0.1 * jax.random.normal(ks[3], (Cout, Cout, 3, 3), jnp.float32),
        "g2": 1.0 + 0.1 * jax.random.normal(ks[4], (Cout,), jnp.float32),
        "b2": 0.1 * jax.random.normal(ks[5], (Cout,), jnp.float32),
    }
    if Cin != Cout:
        p.update({
            "ws": 0.1 * jax.random.normal(ks[6], (Cout, Cin, 1, 1), jnp.float32),
            "gs": 1.0 + 0.1 * jax.random.normal(ks[7], (Cout,), jnp.float32),
            "bs": 0.1 * jax.random.normal(ks[8], (Cout,), jnp.float32),
        })
    return p


# ---------------------------------------------------------------------------
# Main: deterministic small-shape tests (projection / identity, bf16 / f32).
# ---------------------------------------------------------------------------
if __name__ == "__main__":
    key = jax.random.PRNGKey(0)
    kp, kx = jax.random.split(key)

    N, Cin, H, W, Cout = 2, 4, 16, 16, 8
    params = _make_params(kp, Cin, Cout)
    x = jax.random.normal(kx, (N, Cin, H, W), jnp.float32)
    ref = jax.block_until_ready(resblock_ref(x, params))

    # 1) Default fast path (bf16 MXU operands, f32 accumulation), projection.
    out_bf = jax.block_until_ready(resblock_pallas(x, params))
    assert out_bf.shape == (N, Cout, H, W), out_bf.shape
    err_bf = float(jnp.max(jnp.abs(out_bf - ref)))
    assert jnp.allclose(out_bf, ref, atol=2e-1, rtol=2e-1), f"bf16 projection err={err_bf}"

    # 2) Exact-f32 debug path, projection shortcut.
    out_f32 = jax.block_until_ready(resblock_pallas(x, params, use_bf16=False))
    err_f32 = float(jnp.max(jnp.abs(out_f32 - ref)))
    assert jnp.allclose(out_f32, ref, atol=2e-3, rtol=2e-3), f"f32 projection err={err_f32}"

    # 3) Identity-shortcut path (Cin == Cout), exact-f32.
    params_id = _make_params(jax.random.PRNGKey(2), Cout, Cout)
    x_id = jax.random.normal(jax.random.PRNGKey(3), (N, Cout, H, W), jnp.float32)
    ref_id = jax.block_until_ready(resblock_ref(x_id, params_id))
    out_id = jax.block_until_ready(resblock_pallas(x_id, params_id, use_bf16=False))
    err_id = float(jnp.max(jnp.abs(out_id - ref_id)))
    assert jnp.allclose(out_id, ref_id, atol=2e-3, rtol=2e-3), f"f32 identity err={err_id}"

    # 4) Identity path on the default bf16 fast path.
    out_id_bf = jax.block_until_ready(resblock_pallas(x_id, params_id))
    err_id_bf = float(jnp.max(jnp.abs(out_id_bf - ref_id)))
    assert jnp.allclose(out_id_bf, ref_id, atol=2e-1, rtol=2e-1), f"bf16 identity err={err_id_bf}"

    print("KERNEL_OK")
</pallas_src>

<mosaic_0001>
module attributes {stable_mosaic.version = 11 : i64} {
  func.func @_stage1_kernel(%arg0: i32, %arg1: memref<1x16x16x4xf32, #tpu.memory_space<vmem>>, %arg2: memref<36x8xbf16, #tpu.memory_space<vmem>>, %arg3: memref<4x8xbf16, #tpu.memory_space<vmem>>, %arg4: memref<1x16x16x8xf32, #tpu.memory_space<vmem>>, %arg5: memref<1x2x8xf32, #tpu.memory_space<vmem>>, %arg6: memref<1x16x16x8xf32, #tpu.memory_space<vmem>>, %arg7: memref<1x2x8xf32, #tpu.memory_space<vmem>>, %arg8: memref<1x16x16x36xbf16, #tpu.memory_space<vmem>>) attributes {dimension_semantics = [#tpu.dimension_semantics<parallel>], iteration_bounds = array<i64: 2>, scalar_prefetch = 0 : i64, scratch_operands = 1 : i64, tpu.core_type = #tpu.core_type<tc>, window_params = [{transform_indices = @transform_0, window_bounds = array<i64: 1, 16, 16, 4>}, {pipeline_mode = #tpu.pipeline_mode<synchronous>, transform_indices = @transform_1, window_bounds = array<i64: 36, 8>}, {pipeline_mode = #tpu.pipeline_mode<synchronous>, transform_indices = @transform_2, window_bounds = array<i64: 4, 8>}, {transform_indices = @transform_3, window_bounds = array<i64: 1, 16, 16, 8>}, {transform_indices = @transform_4, window_bounds = array<i64: 1, 2, 8>}, {transform_indices = @transform_5, window_bounds = array<i64: 1, 16, 16, 8>}, {transform_indices = @transform_6, window_bounds = array<i64: 1, 2, 8>}]} {
    %cst = arith.constant 0.000000e+00 : bf16
    %0 = vector.broadcast %cst : bf16 to vector<1x16x4xbf16>
    %c0 = arith.constant 0 : index
    %c0_0 = arith.constant 0 : index
    %c0_1 = arith.constant 0 : index
    %c0_2 = arith.constant 0 : index
    %1 = vector.load %arg8[%c0, %c0_0, %c0_1, %c0_2] : memref<1x16x16x36xbf16, #tpu.memory_space<vmem>>, vector<1x1x16x4xbf16>
    %2 = vector.shape_cast %1 : vector<1x1x16x4xbf16> to vector<1x16x4xbf16>
    %3 = vector.shape_cast %0 : vector<1x16x4xbf16> to vector<1x1x16x4xbf16>
    tpu.vector_store %arg8[%c0, %c0_0, %c0_1, %c0_2], %3 {strides = array<i32>} : memref<1x16x16x36xbf16, #tpu.memory_space<vmem>>, vector<1x1x16x4xbf16>,
    %cst_3 = arith.constant 0.000000e+00 : bf16
    %4 = vector.broadcast %cst_3 : bf16 to vector<16x1x4xbf16>
    %c0_4 = arith.constant 0 : index
    %c0_5 = arith.constant 0 : index
    %c0_6 = arith.constant 0 : index
    %c0_7 = arith.constant 0 : index
    %5 = vector.load %arg8[%c0_4, %c0_5, %c0_6, %c0_7] : memref<1x16x16x36xbf16, #tpu.memory_space<vmem>>, vector<1x16x1x4xbf16>
    %6 = vector.shape_cast %5 : vector<1x16x1x4xbf16> to vector<16x1x4xbf16>
    %7 = vector.shape_cast %4 : vector<16x1x4xbf16> to vector<1x16x1x4xbf16>
    tpu.vector_store %arg8[%c0_4, %c0_5, %c0_6, %c0_7], %7 {strides = array<i32>} : memref<1x16x16x36xbf16, #tpu.memory_space<vmem>>, vector<1x16x1x4xbf16>,
    %c0_8 = arith.constant 0 : index
    %c0_9 = arith.constant 0 : index
    %c0_10 = arith.constant 0 : index
    %c0_11 = arith.constant 0 : index
    %8 = vector.load %arg1[%c0_8, %c0_9, %c0_10, %c0_11] : memref<1x16x16x4xf32, #tpu.memory_space<vmem>>, vector<1x15x15x4xf32>
    %9 = vector.shape_cast %8 : vector<1x15x15x4xf32> to vector<15x15x4xf32>
    %10 = arith.truncf %9 : vector<15x15x4xf32> to vector<15x15x4xbf16>
    %c0_12 = arith.constant 0 : index
    %c1 = arith.constant 1 : index
    %c1_13 = arith.constant 1 : index
    %c0_14 = arith.constant 0 : index
    %11 = vector.load %arg8[%c0_12, %c1, %c1_13, %c0_14] : memref<1x16x16x36xbf16, #tpu.memory_space<vmem>>, vector<1x15x15x4xbf16>
    %12 = vector.shape_cast %11 : vector<1x15x15x4xbf16> to vector<15x15x4xbf16>
    %13 = vector.shape_cast %10 : vector<15x15x4xbf16> to vector<1x15x15x4xbf16>
    tpu.vector_store %arg8[%c0_12, %c1, %c1_13, %c0_14], %13 {strides = array<i32>} : memref<1x16x16x36xbf16, #tpu.memory_space<vmem>>, vector<1x15x15x4xbf16>,
    %cst_15 = arith.constant 0.000000e+00 : bf16
    %14 = vector.broadcast %cst_15 : bf16 to vector<1x16x4xbf16>
    %c0_16 = arith.constant 0 : index
    %c0_17 = arith.constant 0 : index
    %c0_18 = arith.constant 0 : index
    %c4 = arith.constant 4 : index
    %15 = vector.load %arg8[%c0_16, %c0_17, %c0_18, %c4] : memref<1x16x16x36xbf16, #tpu.memory_space<vmem>>, vector<1x1x16x4xbf16>
    %16 = vector.shape_cast %15 : vector<1x1x16x4xbf16> to vector<1x16x4xbf16>
    %17 = vector.shape_cast %14 : vector<1x16x4xbf16> to vector<1x1x16x4xbf16>
    tpu.vector_store %arg8[%c0_16, %c0_17, %c0_18, %c4], %17 {strides = array<i32>} : memref<1x16x16x36xbf16, #tpu.memory_space<vmem>>, vector<1x1x16x4xbf16>,
    %c0_19 = arith.constant 0 : index
    %c0_20 = arith.constant 0 : index
    %c0_21 = arith.constant 0 : index
    %c0_22 = arith.constant 0 : index
    %18 = vector.load %arg1[%c0_19, %c0_20, %c0_21, %c0_22] : memref<1x16x16x4xf32, #tpu.memory_space<vmem>>, vector<1x15x16x4xf32>
    %19 = vector.shape_cast %18 : vector<1x15x16x4xf32> to vector<15x16x4xf32>
    %20 = arith.truncf %19 : vector<15x16x4xf32> to vector<15x16x4xbf16>
    %c0_23 = arith.constant 0 : index
    %c1_24 = arith.constant 1 : index
    %c0_25 = arith.constant 0 : index
    %c4_26 = arith.constant 4 : index
    %21 = vector.load %arg8[%c0_23, %c1_24, %c0_25, %c4_26] : memref<1x16x16x36xbf16, #tpu.memory_space<vmem>>, vector<1x15x16x4xbf16>
    %22 = vector.shape_cast %21 : vector<1x15x16x4xbf16> to vector<15x16x4xbf16>
    %23 = vector.shape_cast %20 : vector<15x16x4xbf16> to vector<1x15x16x4xbf16>
    tpu.vector_store %arg8[%c0_23, %c1_24, %c0_25, %c4_26], %23 {strides = array<i32>} : memref<1x16x16x36xbf16, #tpu.memory_space<vmem>>, vector<1x15x16x4xbf16>,
    %cst_27 = arith.constant 0.000000e+00 : bf16
    %24 = vector.broadcast %cst_27 : bf16 to vector<1x16x4xbf16>
    %c0_28 = arith.constant 0 : index
    %c0_29 = arith.constant 0 : index
    %c0_30 = arith.constant 0 : index
    %c8 = arith.constant 8 : index
    %25 = vector.load %arg8[%c0_28, %c0_29, %c0_30, %c8] : memref<1x16x16x36xbf16, #tpu.memory_space<vmem>>, vector<1x1x16x4xbf16>
    %26 = vector.shape_cast %25 : vector<1x1x16x4xbf16> to vector<1x16x4xbf16>
    %27 = vector.shape_cast %24 : vector<1x16x4xbf16> to vector<1x1x16x4xbf16>
    tpu.vector_store %arg8[%c0_28, %c0_29, %c0_30, %c8], %27 {strides = array<i32>} : memref<1x16x16x36xbf16, #tpu.memory_space<vmem>>, vector<1x1x16x4xbf16>,
    %cst_31 = arith.constant 0.000000e+00 : bf16
    %28 = vector.broadcast %cst_31 : bf16 to vector<16x1x4xbf16>
    %c0_32 = arith.constant 0 : index
    %c0_33 = arith.constant 0 : index
    %c15 = arith.constant 15 : index
    %c8_34 = arith.constant 8 : index
    %29 = vector.load %arg8[%c0_32, %c0_33, %c15, %c8_34] : memref<1x16x16x36xbf16, #tpu.memory_space<vmem>>, vector<1x16x1x4xbf16>
    %30 = vector.shape_cast %29 : vector<1x16x1x4xbf16> to vector<16x1x4xbf16>
    %31 = vector.shape_cast %28 : vector<16x1x4xbf16> to vector<1x16x1x4xbf16>
    tpu.vector_store %arg8[%c0_32, %c0_33, %c15, %c8_34], %31 {strides = array<i32>} : memref<1x16x16x36xbf16, #tpu.memory_space<vmem>>, vector<1x16x1x4xbf16>,
    %c0_35 = arith.constant 0 : index
    %c0_36 = arith.constant 0 : index
    %c1_37 = arith.constant 1 : index
    %c0_38 = arith.constant 0 : index
    %32 = vector.load %arg1[%c0_35, %c0_36, %c1_37, %c0_38] : memref<1x16x16x4xf32, #tpu.memory_space<vmem>>, vector<1x15x15x4xf32>
    %33 = vector.shape_cast %32 : vector<1x15x15x4xf32> to vector<15x15x4xf32>
    %34 = arith.truncf %33 : vector<15x15x4xf32> to vector<15x15x4xbf16>
    %c0_39 = arith.constant 0 : index
    %c1_40 = arith.constant 1 : index
    %c0_41 = arith.constant 0 : index
    %c8_42 = arith.constant 8 : index
    %35 = vector.load %arg8[%c0_39, %c1_40, %c0_41, %c8_42] : memref<1x16x16x36xbf16, #tpu.memory_space<vmem>>, vector<1x15x15x4xbf16>
    %36 = vector.shape_cast %35 : vector<1x15x15x4xbf16> to vector<15x15x4xbf16>
    %37 = vector.shape_cast %34 : vector<15x15x4xbf16> to vector<1x15x15x4xbf16>
    tpu.vector_store %arg8[%c0_39, %c1_40, %c0_41, %c8_42], %37 {strides = array<i32>} : memref<1x16x16x36xbf16, #tpu.memory_space<vmem>>, vector<1x15x15x4xbf16>,
    %cst_43 = arith.constant 0.000000e+00 : bf16
    %38 = vector.broadcast %cst_43 : bf16 to vector<16x1x4xbf16>
    %c0_44 = arith.constant 0 : index
    %c0_45 = arith.constant 0 : index
    %c0_46 = arith.constant 0 : index
    %c12 = arith.constant 12 : index
    %39 = vector.load %arg8[%c0_44, %c0_45, %c0_46, %c12] : memref<1x16x16x36xbf16, #tpu.memory_space<vmem>>, vector<1x16x1x4xbf16>
    %40 = vector.shape_cast %39 : vector<1x16x1x4xbf16> to vector<16x1x4xbf16>
    %41 = vector.shape_cast %38 : vector<16x1x4xbf16> to vector<1x16x1x4xbf16>
    tpu.vector_store %arg8[%c0_44, %c0_45, %c0_46, %c12], %41 {strides = array<i32>} : memref<1x16x16x36xbf16, #tpu.memory_space<vmem>>, vector<1x16x1x4xbf16>,
    %c0_47 = arith.constant 0 : index
    %c0_48 = arith.constant 0 : index
    %c0_49 = arith.constant 0 : index
    %c0_50 = arith.constant 0 : index
    %42 = vector.load %arg1[%c0_47, %c0_48, %c0_49, %c0_50] : memref<1x16x16x4xf32, #tpu.memory_space<vmem>>, vector<1x16x15x4xf32>
    %43 = vector.shape_cast %42 : vector<1x16x15x4xf32> to vector<16x15x4xf32>
    %44 = arith.truncf %43 : vector<16x15x4xf32> to vector<16x15x4xbf16>
    %c0_51 = arith.constant 0 : index
    %c0_52 = arith.constant 0 : index
    %c1_53 = arith.constant 1 : index
    %c12_54 = arith.constant 12 : index
    %45 = vector.load %arg8[%c0_51, %c0_52, %c1_53, %c12_54] : memref<1x16x16x36xbf16, #tpu.memory_space<vmem>>, vector<1x16x15x4xbf16>
    %46 = vector.shape_cast %45 : vector<1x16x15x4xbf16> to vector<16x15x4xbf16>
    %47 = vector.shape_cast %44 : vector<16x15x4xbf16> to vector<1x16x15x4xbf16>
    tpu.vector_store %arg8[%c0_51, %c0_52, %c1_53, %c12_54], %47 {strides = array<i32>} : memref<1x16x16x36xbf16, #tpu.memory_space<vmem>>, vector<1x16x15x4xbf16>,
    %c0_55 = arith.constant 0 : index
    %c0_56 = arith.constant 0 : index
    %c0_57 = arith.constant 0 : index
    %c0_58 = arith.constant 0 : index
    %48 = vector.load %arg1[%c0_55, %c0_56, %c0_57, %c0_58] : memref<1x16x16x4xf32, #tpu.memory_space<vmem>>, vector<1x16x16x4xf32>
    %49 = vector.shape_cast %48 : vector<1x16x16x4xf32> to vector<16x16x4xf32>
    %50 = arith.truncf %49 : vector<16x16x4xf32> to vector<16x16x4xbf16>
    %c0_59 = arith.constant 0 : index
    %c0_60 = arith.constant 0 : index
    %c0_61 = arith.constant 0 : index
    %c16 = arith.constant 16 : index
    %51 = vector.load %arg8[%c0_59, %c0_60, %c0_61, %c16] : memref<1x16x16x36xbf16, #tpu.memory_space<vmem>>, vector<1x16x16x4xbf16>
    %52 = vector.shape_cast %51 : vector<1x16x16x4xbf16> to vector<16x16x4xbf16>
    %53 = vector.shape_cast %50 : vector<16x16x4xbf16> to vector<1x16x16x4xbf16>
    tpu.vector_store %arg8[%c0_59, %c0_60, %c0_61, %c16], %53 {strides = array<i32>} : memref<1x16x16x36xbf16, #tpu.memory_space<vmem>>, vector<1x16x16x4xbf16>,
    %cst_62 = arith.constant 0.000000e+00 : bf16
    %54 = vector.broadcast %cst_62 : bf16 to vector<16x1x4xbf16>
    %c0_63 = arith.constant 0 : index
    %c0_64 = arith.constant 0 : index
    %c15_65 = arith.constant 15 : index
    %c20 = arith.constant 20 : index
    %55 = vector.load %arg8[%c0_63, %c0_64, %c15_65, %c20] : memref<1x16x16x36xbf16, #tpu.memory_space<vmem>>, vector<1x16x1x4xbf16>
    %56 = vector.shape_cast %55 : vector<1x16x1x4xbf16> to vector<16x1x4xbf16>
    %57 = vector.shape_cast %54 : vector<16x1x4xbf16> to vector<1x16x1x4xbf16>
    tpu.vector_store %arg8[%c0_63, %c0_64, %c15_65, %c20], %57 {strides = array<i32>} : memref<1x16x16x36xbf16, #tpu.memory_space<vmem>>, vector<1x16x1x4xbf16>,
    %c0_66 = arith.constant 0 : index
    %c0_67 = arith.constant 0 : index
    %c1_68 = arith.constant 1 : index
    %c0_69 = arith.constant 0 : index
    %58 = vector.load %arg1[%c0_66, %c0_67, %c1_68, %c0_69] : memref<1x16x16x4xf32, #tpu.memory_space<vmem>>, vector<1x16x15x4xf32>
    %59 = vector.shape_cast %58 : vector<1x16x15x4xf32> to vector<16x15x4xf32>
    %60 = arith.truncf %59 : vector<16x15x4xf32> to vector<16x15x4xbf16>
    %c0_70 = arith.constant 0 : index
    %c0_71 = arith.constant 0 : index
    %c0_72 = arith.constant 0 : index
    %c20_73 = arith.constant 20 : index
    %61 = vector.load %arg8[%c0_70, %c0_71, %c0_72, %c20_73] : memref<1x16x16x36xbf16, #tpu.memory_space<vmem>>, vector<1x16x15x4xbf16>
    %62 = vector.shape_cast %61 : vector<1x16x15x4xbf16> to vector<16x15x4xbf16>
    %63 = vector.shape_cast %60 : vector<16x15x4xbf16> to vector<1x16x15x4xbf16>
    tpu.vector_store %arg8[%c0_70, %c0_71, %c0_72, %c20_73], %63 {strides = array<i32>} : memref<1x16x16x36xbf16, #tpu.memory_space<vmem>>, vector<1x16x15x4xbf16>,
    %cst_74 = arith.constant 0.000000e+00 : bf16
    %64 = vector.broadcast %cst_74 : bf16 to vector<1x16x4xbf16>
    %c0_75 = arith.constant 0 : index
    %c15_76 = arith.constant 15 : index
    %c0_77 = arith.constant 0 : index
    %c24 = arith.constant 24 : index
    %65 = vector.load %arg8[%c0_75, %c15_76, %c0_77, %c24] : memref<1x16x16x36xbf16, #tpu.memory_space<vmem>>, vector<1x1x16x4xbf16>
    %66 = vector.shape_cast %65 : vector<1x1x16x4xbf16> to vector<1x16x4xbf16>
    %67 = vector.shape_cast %64 : vector<1x16x4xbf16> to vector<1x1x16x4xbf16>
    tpu.vector_store %arg8[%c0_75, %c15_76, %c0_77, %c24], %67 {strides = array<i32>} : memref<1x16x16x36xbf16, #tpu.memory_space<vmem>>, vector<1x1x16x4xbf16>,
    %cst_78 = arith.constant 0.000000e+00 : bf16
    %68 = vector.broadcast %cst_78 : bf16 to vector<16x1x4xbf16>
    %c0_79 = arith.constant 0 : index
    %c0_80 = arith.constant 0 : index
    %c0_81 = arith.constant 0 : index
    %c24_82 = arith.constant 24 : index
    %69 = vector.load %arg8[%c0_79, %c0_80, %c0_81, %c24_82] : memref<1x16x16x36xbf16, #tpu.memory_space<vmem>>, vector<1x16x1x4xbf16>
    %70 = vector.shape_cast %69 : vector<1x16x1x4xbf16> to vector<16x1x4xbf16>
    %71 = vector.shape_cast %68 : vector<16x1x4xbf16> to vector<1x16x1x4xbf16>
    tpu.vector_store %arg8[%c0_79, %c0_80, %c0_81, %c24_82], %71 {strides = array<i32>} : memref<1x16x16x36xbf16, #tpu.memory_space<vmem>>, vector<1x16x1x4xbf16>,
    %c0_83 = arith.constant 0 : index
    %c1_84 = arith.constant 1 : index
    %c0_85 = arith.constant 0 : index
    %c0_86 = arith.constant 0 : index
    %72 = vector.load %arg1[%c0_83, %c1_84, %c0_85, %c0_86] : memref<1x16x16x4xf32, #tpu.memory_space<vmem>>, vector<1x15x15x4xf32>
    %73 = vector.shape_cast %72 : vector<1x15x15x4xf32> to vector<15x15x4xf32>
    %74 = arith.truncf %73 : vector<15x15x4xf32> to vector<15x15x4xbf16>
    %c0_87 = arith.constant 0 : index
    %c0_88 = arith.constant 0 : index
    %c1_89 = arith.constant 1 : index
    %c24_90 = arith.constant 24 : index
    %75 = vector.load %arg8[%c0_87, %c0_88, %c1_89, %c24_90] : memref<1x16x16x36xbf16, #tpu.memory_space<vmem>>, vector<1x15x15x4xbf16>
    %76 = vector.shape_cast %75 : vector<1x15x15x4xbf16> to vector<15x15x4xbf16>
    %77 = vector.shape_cast %74 : vector<15x15x4xbf16> to vector<1x15x15x4xbf16>
    tpu.vector_store %arg8[%c0_87, %c0_88, %c1_89, %c24_90], %77 {strides = array<i32>} : memref<1x16x16x36xbf16, #tpu.memory_space<vmem>>, vector<1x15x15x4xbf16>,
    %cst_91 = arith.constant 0.000000e+00 : bf16
    %78 = vector.broadcast %cst_91 : bf16 to vector<1x16x4xbf16>
    %c0_92 = arith.constant 0 : index
    %c15_93 = arith.constant 15 : index
    %c0_94 = arith.constant 0 : index
    %c28 = arith.constant 28 : index
    %79 = vector.load %arg8[%c0_92, %c15_93, %c0_94, %c28] : memref<1x16x16x36xbf16, #tpu.memory_space<vmem>>, vector<1x1x16x4xbf16>
    %80 = vector.shape_cast %79 : vector<1x1x16x4xbf16> to vector<1x16x4xbf16>
    %81 = vector.shape_cast %78 : vector<1x16x4xbf16> to vector<1x1x16x4xbf16>
    tpu.vector_store %arg8[%c0_92, %c15_93, %c0_94, %c28], %81 {strides = array<i32>} : memref<1x16x16x36xbf16, #tpu.memory_space<vmem>>, vector<1x1x16x4xbf16>,
    %c0_95 = arith.constant 0 : index
    %c1_96 = arith.constant 1 : index
    %c0_97 = arith.constant 0 : index
    %c0_98 = arith.constant 0 : index
    %82 = vector.load %arg1[%c0_95, %c1_96, %c0_97, %c0_98] : memref<1x16x16x4xf32, #tpu.memory_space<vmem>>, vector<1x15x16x4xf32>
    %83 = vector.shape_cast %82 : vector<1x15x16x4xf32> to vector<15x16x4xf32>
    %84 = arith.truncf %83 : vector<15x16x4xf32> to vector<15x16x4xbf16>
    %c0_99 = arith.constant 0 : index
    %c0_100 = arith.constant 0 : index
    %c0_101 = arith.constant 0 : index
    %c28_102 = arith.constant 28 : index
    %85 = vector.load %arg8[%c0_99, %c0_100, %c0_101, %c28_102] : memref<1x16x16x36xbf16, #tpu.memory_space<vmem>>, vector<1x15x16x4xbf16>
    %86 = vector.shape_cast %85 : vector<1x15x16x4xbf16> to vector<15x16x4xbf16>
    %87 = vector.shape_cast %84 : vector<15x16x4xbf16> to vector<1x15x16x4xbf16>
    tpu.vector_store %arg8[%c0_99, %c0_100, %c0_101, %c28_102], %87 {strides = array<i32>} : memref<1x16x16x36xbf16, #tpu.memory_space<vmem>>, vector<1x15x16x4xbf16>,
    %cst_103 = arith.constant 0.000000e+00 : bf16
    %88 = vector.broadcast %cst_103 : bf16 to vector<1x16x4xbf16>
    %c0_104 = arith.constant 0 : index
    %c15_105 = arith.constant 15 : index
    %c0_106 = arith.constant 0 : index
    %c32 = arith.constant 32 : index
    %89 = vector.load %arg8[%c0_104, %c15_105, %c0_106, %c32] : memref<1x16x16x36xbf16, #tpu.memory_space<vmem>>, vector<1x1x16x4xbf16>
    %90 = vector.shape_cast %89 : vector<1x1x16x4xbf16> to vector<1x16x4xbf16>
    %91 = vector.shape_cast %88 : vector<1x16x4xbf16> to vector<1x1x16x4xbf16>
    tpu.vector_store %arg8[%c0_104, %c15_105, %c0_106, %c32], %91 {strides = array<i32>} : memref<1x16x16x36xbf16, #tpu.memory_space<vmem>>, vector<1x1x16x4xbf16>,
    %cst_107 = arith.constant 0.000000e+00 : bf16
    %92 = vector.broadcast %cst_107 : bf16 to vector<16x1x4xbf16>
    %c0_108 = arith.constant 0 : index
    %c0_109 = arith.constant 0 : index
    %c15_110 = arith.constant 15 : index
    %c32_111 = arith.constant 32 : index
    %93 = vector.load %arg8[%c0_108, %c0_109, %c15_110, %c32_111] : memref<1x16x16x36xbf16, #tpu.memory_space<vmem>>, vector<1x16x1x4xbf16>
    %94 = vector.shape_cast %93 : vector<1x16x1x4xbf16> to vector<16x1x4xbf16>
    %95 = vector.shape_cast %92 : vector<16x1x4xbf16> to vector<1x16x1x4xbf16>
    tpu.vector_store %arg8[%c0_108, %c0_109, %c15_110, %c32_111], %95 {strides = array<i32>} : memref<1x16x16x36xbf16, #tpu.memory_space<vmem>>, vector<1x16x1x4xbf16>,
    %c0_112 = arith.constant 0 : index
    %c1_113 = arith.constant 1 : index
    %c1_114 = arith.constant 1 : index
    %c0_115 = arith.constant 0 : index
    %96 = vector.load %arg1[%c0_112, %c1_113, %c1_114, %c0_115] : memref<1x16x16x4xf32, #tpu.memory_space<vmem>>, vector<1x15x15x4xf32>
    %97 = vector.shape_cast %96 : vector<1x15x15x4xf32> to vector<15x15x4xf32>
    %98 = arith.truncf %97 : vector<15x15x4xf32> to vector<15x15x4xbf16>
    %c0_116 = arith.constant 0 : index
    %c0_117 = arith.constant 0 : index
    %c0_118 = arith.constant 0 : index
    %c32_119 = arith.constant 32 : index
    %99 = vector.load %arg8[%c0_116, %c0_117, %c0_118, %c32_119] : memref<1x16x16x36xbf16, #tpu.memory_space<vmem>>, vector<1x15x15x4xbf16>
    %100 = vector.shape_cast %99 : vector<1x15x15x4xbf16> to vector<15x15x4xbf16>
    %101 = vector.shape_cast %98 : vector<15x15x4xbf16> to vector<1x15x15x4xbf16>
    tpu.vector_store %arg8[%c0_116, %c0_117, %c0_118, %c32_119], %101 {strides = array<i32>} : memref<1x16x16x36xbf16, #tpu.memory_space<vmem>>, vector<1x15x15x4xbf16>,
    %c0_120 = arith.constant 0 : index
    %c0_121 = arith.constant 0 : index
    %c0_122 = arith.constant 0 : index
    %c0_123 = arith.constant 0 : index
    %102 = vector.load %arg8[%c0_120, %c0_121, %c0_122, %c0_123] : memref<1x16x16x36xbf16, #tpu.memory_space<vmem>>, vector<1x16x16x36xbf16>
    %103 = vector.shape_cast %102 : vector<1x16x16x36xbf16> to vector<256x36xbf16>
    %c0_124 = arith.constant 0 : index
    %c0_125 = arith.constant 0 : index
    %104 = vector.load %arg2[%c0_124, %c0_125] : memref<36x8xbf16, #tpu.memory_space<vmem>>, vector<36x8xbf16>
    %cst_126 = arith.constant dense<0.000000e+00> : vector<256x8xf32>
    %105 = tpu.matmul %103, %104, %cst_126 {dimension_numbers = #tpu.dot_dimension_numbers<[1], [0], [0], [1], [0, 0, 1, 1], [], []>} : vector<256x36xbf16>, vector<36x8xbf16>, vector<256x8xf32> -> vector<256x8xf32>
    %106 = vector.shape_cast %105 : vector<256x8xf32> to vector<1x16x16x8xf32>
    %c0_127 = arith.constant 0 : index
    %c0_128 = arith.constant 0 : index
    %c0_129 = arith.constant 0 : index
    %c0_130 = arith.constant 0 : index
    %107 = vector.load %arg4[%c0_127, %c0_128, %c0_129, %c0_130] : memref<1x16x16x8xf32, #tpu.memory_space<vmem>>, vector<1x16x16x8xf32>
    tpu.vector_store %arg4[%c0_127, %c0_128, %c0_129, %c0_130], %106 {strides = array<i32>} : memref<1x16x16x8xf32, #tpu.memory_space<vmem>>, vector<1x16x16x8xf32>,
    %cst_131 = arith.constant dense<0.000000e+00> : vector<8xf32>
    %108 = vector.multi_reduction <add>, %105, %cst_131 [0] : vector<256x8xf32> to vector<8xf32>
    %109 = vector.shape_cast %108 : vector<8xf32> to vector<1x8xf32>
    %110 = arith.mulf %105, %105 : vector<256x8xf32>
    %cst_132 = arith.constant dense<0.000000e+00> : vector<8xf32>
    %111 = vector.multi_reduction <add>, %110, %cst_132 [0] : vector<256x8xf32> to vector<8xf32>
    %112 = vector.shape_cast %111 : vector<8xf32> to vector<1x8xf32>
    %113 = tpu.concatenate %109, %112 in 0 : vector<1x8xf32>, vector<1x8xf32> -> vector<2x8xf32>
    %114 = vector.shape_cast %113 : vector<2x8xf32> to vector<1x2x8xf32>
    %c0_133 = arith.constant 0 : index
    %c0_134 = arith.constant 0 : index
    %c0_135 = arith.constant 0 : index
    %115 = vector.load %arg5[%c0_133, %c0_134, %c0_135] : memref<1x2x8xf32, #tpu.memory_space<vmem>>, vector<1x2x8xf32>
    tpu.vector_store %arg5[%c0_133, %c0_134, %c0_135], %114 {strides = array<i32>} : memref<1x2x8xf32, #tpu.memory_space<vmem>>, vector<1x2x8xf32>,
    %c0_136 = arith.constant 0 : index
    %c0_137 = arith.constant 0 : index
    %c0_138 = arith.constant 0 : index
    %c0_139 = arith.constant 0 : index
    %116 = vector.load %arg1[%c0_136, %c0_137, %c0_138, %c0_139] : memref<1x16x16x4xf32, #tpu.memory_space<vmem>>, vector<1x16x16x4xf32>
    %117 = vector.shape_cast %116 : vector<1x16x16x4xf32> to vector<256x4xf32>
    %118 = arith.truncf %117 : vector<256x4xf32> to vector<256x4xbf16>
    %c0_140 = arith.constant 0 : index
    %c0_141 = arith.constant 0 : index
    %119 = vector.load %arg3[%c0_140, %c0_141] : memref<4x8xbf16, #tpu.memory_space<vmem>>, vector<4x8xbf16>
    %cst_142 = arith.constant dense<0.000000e+00> : vector<256x8xf32>
    %120 = tpu.matmul %118, %119, %cst_142 {dimension_numbers = #tpu.dot_dimension_numbers<[1], [0], [0], [1], [0, 0, 1, 1], [], []>} : vector<256x4xbf16>, vector<4x8xbf16>, vector<256x8xf32> -> vector<256x8xf32>
    %121 = vector.shape_cast %120 : vector<256x8xf32> to vector<1x16x16x8xf32>
    %c0_143 = arith.constant 0 : index
    %c0_144 = arith.constant 0 : index
    %c0_145 = arith.constant 0 : index
    %c0_146 = arith.constant 0 : index
    %122 = vector.load %arg6[%c0_143, %c0_144, %c0_145, %c0_146] : memref<1x16x16x8xf32, #tpu.memory_space<vmem>>, vector<1x16x16x8xf32>
    tpu.vector_store %arg6[%c0_143, %c0_144, %c0_145, %c0_146], %121 {strides = array<i32>} : memref<1x16x16x8xf32, #tpu.memory_space<vmem>>, vector<1x16x16x8xf32>,
    %cst_147 = arith.constant dense<0.000000e+00> : vector<8xf32>
    %123 = vector.multi_reduction <add>, %120, %cst_147 [0] : vector<256x8xf32> to vector<8xf32>
    %124 = vector.shape_cast %123 : vector<8xf32> to vector<1x8xf32>
    %125 = arith.mulf %120, %120 : vector<256x8xf32>
    %cst_148 = arith.constant dense<0.000000e+00> : vector<8xf32>
    %126 = vector.multi_reduction <add>, %125, %cst_148 [0] : vector<256x8xf32> to vector<8xf32>
    %127 = vector.shape_cast %126 : vector<8xf32> to vector<1x8xf32>
    %128 = tpu.concatenate %124, %127 in 0 : vector<1x8xf32>, vector<1x8xf32> -> vector<2x8xf32>
    %129 = vector.shape_cast %128 : vector<2x8xf32> to vector<1x2x8xf32>
    %c0_149 = arith.constant 0 : index
    %c0_150 = arith.constant 0 : index
    %c0_151 = arith.constant 0 : index
    %130 = vector.load %arg7[%c0_149, %c0_150, %c0_151] : memref<1x2x8xf32, #tpu.memory_space<vmem>>, vector<1x2x8xf32>
    tpu.vector_store %arg7[%c0_149, %c0_150, %c0_151], %129 {strides = array<i32>} : memref<1x2x8xf32, #tpu.memory_space<vmem>>, vector<1x2x8xf32>,
    return
  }
  func.func @transform_0(%arg0: i32) -> (i32, i32, i32, i32) {
    %c0_i32 = arith.constant 0 : i32
    %c0_i32_0 = arith.constant 0 : i32
    %c0_i32_1 = arith.constant 0 : i32
    %c0_i32_2 = arith.constant 0 : i32
    return %arg0, %c0_i32, %c0_i32_0, %c0_i32_1 : i32, i32, i32, i32
  }
  func.func @transform_1(%arg0: i32) -> (i32, i32) {
    %c0_i32 = arith.constant 0 : i32
    %c0_i32_0 = arith.constant 0 : i32
    %c0_i32_1 = arith.constant 0 : i32
    return %c0_i32, %c0_i32_0 : i32, i32
  }
  func.func @transform_2(%arg0: i32) -> (i32, i32) {
    %c0_i32 = arith.constant 0 : i32
    %c0_i32_0 = arith.constant 0 : i32
    %c0_i32_1 = arith.constant 0 : i32
    return %c0_i32, %c0_i32_0 : i32, i32
  }
  func.func @transform_3(%arg0: i32) -> (i32, i32, i32, i32) {
    %c0_i32 = arith.constant 0 : i32
    %c0_i32_0 = arith.constant 0 : i32
    %c0_i32_1 = arith.constant 0 : i32
    %c0_i32_2 = arith.constant 0 : i32
    return %arg0, %c0_i32, %c0_i32_0, %c0_i32_1 : i32, i32, i32, i32
  }
  func.func @transform_4(%arg0: i32) -> (i32, i32, i32) {
    %c0_i32 = arith.constant 0 : i32
    %c0_i32_0 = arith.constant 0 : i32
    %c0_i32_1 = arith.constant 0 : i32
    return %arg0, %c0_i32, %c0_i32_0 : i32, i32, i32
  }
  func.func @transform_5(%arg0: i32) -> (i32, i32, i32, i32) {
    %c0_i32 = arith.constant 0 : i32
    %c0_i32_0 = arith.constant 0 : i32
    %c0_i32_1 = arith.constant 0 : i32
    %c0_i32_2 = arith.constant 0 : i32
    return %arg0, %c0_i32, %c0_i32_0, %c0_i32_1 : i32, i32, i32, i32
  }
  func.func @transform_6(%arg0: i32) -> (i32, i32, i32) {
    %c0_i32 = arith.constant 0 : i32
    %c0_i32_0 = arith.constant 0 : i32
    %c0_i32_1 = arith.constant 0 : i32
    return %arg0, %c0_i32, %c0_i32_0 : i32, i32, i32
  }
}

</mosaic_0001>

<bundles_post_ra>
// kernel: tpu_custom_call.1
= control target key start
LH: loop header
LB: loop body
LE: loop exit
PB: predicated region body
PF: predicated region fallthrough
CT: control target
= control target key end

     0   :  { %12 = vsyncpa [#allocation4], 0  ;;  %s8094_s0 = inlined_call_operand.vmem [shape: f32[2,16,16,4], index: 0, kind: input, shape index: {}]   ;;  %s8095_s1 = inlined_call_operand.vmem [shape: bf16[36,8], index: 1, kind: input, shape index: {}]   ;;  %s8096_s2 = inlined_call_operand.vmem [shape: bf16[4,8], index: 2, kind: input, shape index: {}]   ;;  %s8097_s3 = inlined_call_operand.vmem [shape: f32[2,16,16,8], index: 3, kind: output, shape index: {0}]   ;;  %s8098_s4 = inlined_call_operand.hbm [shape: f32[2,2,8], index: 4, kind: output, shape index: {1}]   ;;  %s8099_s5 = inlined_call_operand.vmem [shape: f32[2,16,16,8], index: 5, kind: output, shape index: {2}]   ;;  %s8100_s6 = inlined_call_operand.hbm [shape: f32[2,2,8], index: 6, kind: output, shape index: {3}]  }
   0x1   :  { %14 = vsyncpa [#allocation4 + $0x1], 0 }
   0x2   :  { %15 = vsyncpa [#allocation6], 0 }
   0x3   :  { %17 = vsyncpa [#allocation6 + $0x1], 0  ;;  %s5938_s21 = smov 0   ;;  %s5940_s22 = smov 0  }
   0x4   :  { %s5942_s23 = smov 0   ;;  %s5944_s24 = smov 0  }
   0x5 LB: > { %s5959_s25 = sadd.s32 4294967295, %s5890_s24   ;;  %s4904_s26 = sadd.s32 4294967294, %s5890_s24   ;;  %s5890_s24 = sphi %s5944_s24, %s8190_s24   ;;  %s5886_s23 = sphi %s5942_s23, %s8189_s23   ;;  %s5882_s22 = sphi %s5940_s22, %s8188_s22   ;;  %s5878_s21 = sphi %s5938_s21, %s8187_s21  }
   0x6   : > { %s5963_s27 = sadd.s32 1, %s5890_s24   ;;  %s124_s28 = sadd.s32 1, %s5886_s23 }
   0x7   : > { %s121_s29 = ssub.s32 %s5890_s24, %s5963_s27  ;;  %p134_p0 = scmp.ne.s32.totalorder %s5886_s23, %s5882_s22 }
   0x8   : > { %p122_p1 = scmp.eq.s32.totalorder %s121_s29, 0  ;;  %p135_p2 = scmp.eq.s32.totalorder %s5959_s25, 1 }
   0x9   : > { %p140_p3 = scmp.ne.s32.totalorder %s5882_s22, %s5878_s21  ;;  %p141_p4 = scmp.eq.s32.totalorder %s4904_s26, 1 }
   0xa   : > { %s5974_s30 = scalar_select %p122_p1, %s5886_s23, %s124_s28  }
   0xb   : > { %p5976_p5 = por %p135_p2, %p134_p0  ;;  %p5980_p6 = por %p141_p4, %p140_p3 }
   0xc   : > { %p4907_p7 = scmp.ge.s32.totalorder %s5890_s24, 1  ;;  %p225_p8 = scmp.lt.s32.totalorder %s5890_s24, 3 }
   0xe   : > { %p226_p9 = pnand %p4907_p7, %p225_p8 }
   0xf   : > { %p270_p10 = scmp.lt.s32.totalorder (!%p226_p9), %s5959_s25, 1  ;;  %s5892_s14 = smov (!%p226_p9), 4  }
  0x10   : > { %229 = sbr.rel (%p226_p9) target bundleno = 875 (0x36b), region = 32  ;;  %s5893_s15 = smov (!%p226_p9), 8  }
  0x11   : > { %s5894_s16 = smov (!%p226_p9), 12   ;;  %s5896_s17 = smov (!%p226_p9), 16  }
  0x12   : > { %s5897_s18 = smov (!%p226_p9), 20   ;;  %s5898_s19 = smov (!%p226_p9), 24  }
  0x13   : > { %s5899_s20 = smov (!%p226_p9), 28   ;;  %s5900_s11 = smov (!%p226_p9), 32  }
  0x15   : > { %vm290_vm0 = vsmask.f32 256  ;;  %vm289_vm1 = vcmask 24576   ;;  %v298_v0 = vld [vmem:[#allocation2 + $0x10] sm:$0x1]  ;;  %s271_s9 = scalar_select %p270_p10, %s5959_s25, 1 }
  0x16   : > { %vm5989_vm2 = vmand %vm289_vm1, %vm290_vm0  ;;  %v295_v2 = vld [vmem:[#allocation2 + $0x8] sm:$0x1]  ;;  %v301_v5 = vld [vmem:[#allocation2 + $0x18] sm:$0x1]  ;;  %vm286_vm3 = vcmask 27648   ;;  %vm796_vm8 = vcmask 60448  }
  0x17   : > { %v299_v3 = vsel %vm5989_vm2, 0, %v298_v0  ;;  %v296_v4 = vsel %vm5989_vm2, 0, %v295_v2  ;;  %s5997_s10 = sshll.u32 %s271_s9, 8  ;;  %v304_v6 = vld [vmem:[#allocation2 + $0x20] sm:$0x1]  ;;  %v302_v7 = vsel %vm5989_vm2, 0, %v301_v5 }
  0x18   : > { %300 = vst [vmem:[#allocation2 + $0x10] sm:$0x1] %v299_v3  ;;  %297 = vst [vmem:[#allocation2 + $0x8] sm:$0x1] %v296_v4  ;;  %s6003_s13 = scalar_lea.vmem %s8094_s0, %s5997_s10  ;;  %v305_v8 = vsel %vm5989_vm2, 0, %v304_v6  ;;  %vm8107_vm9 = vcmask 93248  }
  0x19   : > { %v307_v9 = vld [vmem:[#allocation2 + $0x28] sm:$0x1]  ;;  %v310_v10 = vld [vmem:[#allocation2 + $0x30] sm:$0x1]  ;;  %v799_v12 = vld [vmem:[%s6003_s13] sm:$0xff]  ;;  %vm1042_vm10 = vcmask 93251  }
  0x1a   : > { %v801_v11 = vld [vmem:[%s6003_s13 + $0x10] sm:$0xff]  ;;  %v802_v13 = vld [vmem:[%s6003_s13 + $0x18] sm:$0xff]  ;;  %303 = vst [vmem:[#allocation2 + $0x18] sm:$0x1] %v302_v7  ;;  %306 = vst [vmem:[#allocation2 + $0x20] sm:$0x1] %v305_v8  ;;  %v6018_v17 = vpack.c.bf16 %v799_v12, %v799_v12 }
  0x1b   : > { %v308_v14 = vsel %vm5989_vm2, 0, %v307_v9  ;;  %v311_v15 = vsel %vm5989_vm2, 0, %v310_v10  ;;  %v6016_v16 = vpack.c.bf16 %v801_v11, %v801_v11  ;;  %v800_v18 = vld [vmem:[%s6003_s13 + $0x8] sm:$0xff]  ;;  %v6025_v19 = vpack.c.bf16 %v802_v13, %v802_v13  ;;  %v803_v22 = vld [vmem:[%s6003_s13 + $0x20] sm:$0xff]  ;;  %v806_v25 = vld [vmem:[%s6003_s13 + $0x38] sm:$0xff]  ;;  %s8113_s9 = sshll.u32 %s5959_s25, 5 }
  0x1c   : > { %309 = vst [vmem:[#allocation2 + $0x28] sm:$0x1] %v308_v14  ;;  %312 = vst [vmem:[#allocation2 + $0x30] sm:$0x1] %v311_v15  ;;  %919 = vrot.lane.b32.xlu0 %v6018_v17, %s5892_s14  ;;  %v6027_v20 = vpack.c.bf16 %v800_v18, %v800_v18  ;;  %v804_v21 = vld [vmem:[%s6003_s13 + $0x28] sm:$0xff]  ;;  %v6037_v24 = vpack.c.bf16 %v803_v22, %v803_v22  ;;  %v805_v26 = vld [vmem:[%s6003_s13 + $0x30] sm:$0xff]  ;;  %v6046_v28 = vpack.c.bf16 %v806_v25, %v806_v25 }
  0x1d   : > { %923 = vrot.lane.b32.xlu1 %v6016_v16, %s5892_s14  ;;  %v6035_v23 = vpack.c.bf16 %v804_v21, %v804_v21  ;;  %v479_v27 = vshrl.u32 %v6016_v16, 16  ;;  %vm734_vm4 = vsmask.f32 7938  ;;  %v6048_v29 = vpack.c.bf16 %v805_v26, %v805_v26  ;;  %v808_v31 = vld [vmem:[%s6003_s13 + $0x48] sm:$0xff]  ;;  %v807_v32 = vld [vmem:[%s6003_s13 + $0x40] sm:$0xff]  ;;  %v810_v42 = vld [vmem:[%s6003_s13 + $0x58] sm:$0xff] }
  0x1e   : > { %v482_v33 = vshll.u32 %v6016_v16, 16  ;;  %v463_v34 = vshrl.u32 %v6018_v17, 16  ;;  %vm6058_vm5 = vmand %vm286_vm3, %vm734_vm4  ;;  %v466_v37 = vshll.u32 %v6018_v17, 16  ;;  %v6070_v39 = vpack.c.bf16 %v808_v31, %v808_v31  ;;  %v809_v43 = vld [vmem:[%s6003_s13 + $0x50] sm:$0xff]  ;;  %v812_v49 = vld [vmem:[%s6003_s13 + $0x68] sm:$0xff] }
  0x1f   : > { %v6050_v30 = vrot.slane %v479_v27, 7  ;;  %v740_v36 = vld [vmem:[#allocation2 + $0x10] sm:$0xf]  ;;  %v6072_v40 = vpack.c.bf16 %v807_v32, %v807_v32  ;;  %v736_v45 = vld [vmem:[#allocation2 + $0x8] sm:$0xf]  ;;  %v6088_v47 = vpack.c.bf16 %v810_v42, %v810_v42  ;;  %v6090_v48 = vpack.c.bf16 %v809_v43, %v809_v43  ;;  %v811_v50 = vld [vmem:[%s6003_s13 + $0x60] sm:$0xff] }
  0x20   : > { %921 = vrot.lane.b32.xlu0 %v6027_v20, %s5892_s14  ;;  %v6074_v41 = vrot.slane %v463_v34, 7  ;;  %v343_v52 = vld [vmem:[%s6003_s13 + $0x18] sm:$0x7f]  ;;  %v341_v53 = vld [vmem:[%s6003_s13 + $0x8] sm:$0x7f]  ;;  %v5385_v56 = vpack.c.bf16 %v812_v49, %v812_v49  ;;  %v6103_v57 = vpack.c.bf16 %v811_v50, %v811_v50  ;;  %v813_v59 = vld [vmem:[%s6003_s13 + $0x70] sm:$0xff] }
  0x21   : > { %925 = vrot.lane.b32.xlu1 %v6025_v19, %s5892_s14  ;;  %v6064_v38 = vor.u32 %v482_v33, %v6050_v30  ;;  %v5345_v54 = vpack.c.bf16 %v343_v52, %v343_v52  ;;  %v5343_v55 = vpack.c.bf16 %v341_v53, %v341_v53  ;;  %v814_v58 = vld [vmem:[%s6003_s13 + $0x78] sm:$0xff]  ;;  %vm460_vm6 = vsmask.f32 4368  ;;  %v345_v62 = vld [vmem:[%s6003_s13 + $0x28] sm:$0x7f]  ;;  %v815_v7 = vld [vmem:[%s6003_s13 + $0x80] sm:$0xff] }
  0x22   : > { %v6082_v46 = vor.u32 %v466_v37, %v6074_v41  ;;  %v485_v63 = vrot.slane %v6050_v30, 4  ;;  %v5387_v4 = vpack.c.bf16 %v814_v58, %v814_v58  ;;  %v6112_v5 = vpack.c.bf16 %v813_v59, %v813_v59  ;;  %v816_v6 = vld [vmem:[%s6003_s13 + $0x88] sm:$0xff]  ;;  %vm6119_vm7 = vmor %vm290_vm0, %vm460_vm6  ;;  %v347_v14 = vld [vmem:[%s6003_s13 + $0x38] sm:$0x7f] }
  0x23   : > { %v741_v44 = vsel %vm6058_vm5, %v6064_v38, %v740_v36  ;;  %v487_v60 = vshrl.u32 %v5345_v54, 16  ;;  %v490_v61 = vshll.u32 %v5345_v54, 16  ;;  %v471_v2 = vshrl.u32 %v5343_v55, 16  ;;  %v818_v27 = vld [vmem:[%s6003_s13 + $0x98] sm:$0xff]  ;;  %v817_v33 = vld [vmem:[%s6003_s13 + $0x90] sm:$0xff]  ;;  %v4265_v12 = vld [vmem:[%s6003_s13 + $0x80] sm:$0xff] }
  0x24   : > { %927 = vrot.lane.b32.xlu0 %v6037_v24, %s5892_s14  ;;  %742 = vst [vmem:[#allocation2 + $0x10] sm:$0xf] %v741_v44  ;;  %v737_v51 = vsel %vm6058_vm5, %v6082_v46, %v736_v45  ;;  %v474_v3 = vshll.u32 %v5343_v55, 16  ;;  %v469_v9 = vrot.slane %v6074_v41, 4  ;;  %v5347_v11 = vpack.c.bf16 %v345_v62, %v345_v62  ;;  %v744_v36 = vld [vmem:[#allocation2 + $0x18] sm:$0xf] }
  0x25   : > { %929 = vrot.lane.b32.xlu1 %v6035_v23, %s5892_s14  ;;  %738 = vst [vmem:[#allocation2 + $0x8] sm:$0xf] %v737_v51  ;;  %v489_v0 = vrot.slane %v487_v60, 7  ;;  %v473_v10 = vrot.slane %v471_v2, 7  ;;  %v495_v13 = vshrl.u32 %v6037_v24, 16  ;;  %v498_v21 = vshll.u32 %v6037_v24, 16 }
  0x26   : > { %v503_v22 = vshrl.u32 %v5347_v11, 16  ;;  %v5389_v25 = vpack.c.bf16 %v816_v6, %v816_v6  ;;  %v6133_v26 = vpack.c.bf16 %v815_v7, %v815_v7  ;;  %v506_v32 = vshll.u32 %v5347_v11, 16  ;;  %v349_v54 = vld [vmem:[%s6003_s13 + $0x48] sm:$0x7f]  ;;  %v748_v62 = vld [vmem:[#allocation2 + $0x20] sm:$0xf] }
  0x27   : > { %v492_v8 = vor.u32 %v490_v61, %v489_v0  ;;  %v476_v18 = vor.u32 %v474_v3, %v473_v10  ;;  %v6137_v31 = vrot.slane %v495_v13, 7  ;;  %v5349_v37 = vpack.c.bf16 %v347_v14, %v347_v14  ;;  %v820_v55 = vld [vmem:[%s6003_s13 + $0xa8] sm:$0xff]  ;;  %v351_v11 = vld [vmem:[%s6003_s13 + $0x58] sm:$0x7f] }
  0x28   : > { %931 = vrot.lane.b32.xlu0 %v6048_v29, %s5892_s14  ;;  %v505_v34 = vrot.slane %v503_v22, 7  ;;  %v5391_v44 = vpack.c.bf16 %v818_v27, %v818_v27  ;;  %v511_v49 = vshrl.u32 %v6048_v29, 16  ;;  %v5390_v50 = vpack.c.bf16 %v817_v33, %v817_v33  ;;  %v752_v27 = vld [vmem:[#allocation2 + $0x28] sm:$0xf]  ;;  %v823_v33 = vld [vmem:[%s6003_s13 + $0xc0] sm:$0xff] }
  0x29   : > { %933 = vrot.lane.b32.xlu1 %v6046_v28, %s5892_s14  ;;  %v493_v15 = vsel %vm6119_vm7, %v485_v63, %v492_v8  ;;  %v477_v24 = vsel %vm6119_vm7, %v469_v9, %v476_v18  ;;  %v6146_v42 = vor.u32 %v498_v21, %v6137_v31  ;;  %v501_v43 = vrot.slane %v6137_v31, 4  ;;  %v821_v8 = vld [vmem:[%s6003_s13 + $0xb0] sm:$0xff]  ;;  %v824_v21 = vld [vmem:[%s6003_s13 + $0xc8] sm:$0xff] }
  0x2a   : > { %743 = vst.msk [vmem:[#allocation2 + $0x14] sm:$0xf] %vm286_vm3, %v493_v15  ;;  %739 = vst.msk [vmem:[#allocation2 + $0xc] sm:$0xf] %vm286_vm3, %v477_v24  ;;  %v508_v45 = vor.u32 %v506_v32, %v505_v34  ;;  %v514_v52 = vshll.u32 %v6048_v29, 16  ;;  %v519_v53 = vshrl.u32 %v5349_v37, 16  ;;  %v5351_v3 = vpack.c.bf16 %v349_v54, %v349_v54 }
  0x2b   : > { %v745_v51 = vsel %vm6058_vm5, %v6146_v42, %v744_v36  ;;  %v6164_v59 = vrot.slane %v511_v49, 7  ;;  %v522_v60 = vshll.u32 %v5349_v37, 16  ;;  %v822_v29 = vld [vmem:[%s6003_s13 + $0xb8] sm:$0xff]  ;;  %v5393_v6 = vpack.c.bf16 %v820_v55, %v820_v55  ;;  %v353_v36 = vld [vmem:[%s6003_s13 + $0x68] sm:$0x7f] }
  0x2c   : > { %935 = vrot.lane.b32.xlu0 %v6072_v40, %s5892_s14  ;;  %v509_v58 = vsel %vm6119_vm7, %v501_v43, %v508_v45  ;;  %746 = vst [vmem:[#allocation2 + $0x18] sm:$0xf] %v745_v51  ;;  %v521_v61 = vrot.slane %v519_v53, 7  ;;  %v530_v15 = vshll.u32 %v6072_v40, 16  ;;  %v5395_v18 = vpack.c.bf16 %v822_v29, %v822_v29 }
  0x2d   : > { %937 = vrot.lane.b32.xlu1 %v6070_v39, %s5892_s14  ;;  %747 = vst.msk [vmem:[#allocation2 + $0x1c] sm:$0xf] %vm286_vm3, %v509_v58  ;;  %v6169_v0 = vor.u32 %v514_v52, %v6164_v59  ;;  %v517_v2 = vrot.slane %v6164_v59, 4  ;;  %v5394_v32 = vpack.c.bf16 %v821_v8, %v821_v8  ;;  %v538_v34 = vshll.u32 %v5351_v3, 16  ;;  %v825_v58 = vld [vmem:[%s6003_s13 + $0xd0] sm:$0xff] }
  0x2e   : > { %v524_v10 = vor.u32 %v522_v60, %v521_v61  ;;  %v543_v45 = vshrl.u32 %v6090_v48, 16  ;;  %v546_v49 = vshll.u32 %v6090_v48, 16  ;;  %v5397_v51 = vpack.c.bf16 %v824_v21, %v824_v21 }
  0x2f   : > { %v749_v13 = vsel %vm6058_vm5, %v6169_v0, %v748_v62  ;;  %v5396_v55 = vpack.c.bf16 %v823_v33, %v823_v33  ;;  %v756_v62 = vld [vmem:[#allocation2 + $0x30] sm:$0xf]  ;;  %v5355_v29 = vpack.c.bf16 %v353_v36, %v353_v36  ;;  %vm1043_vm11 = vsmask.f32 7950 }
  0x30   : > { %939 = vrot.lane.b32.xlu0 %v6090_v48, %s5892_s14  ;;  %v525_v22 = vsel %vm6119_vm7, %v517_v2, %v524_v10  ;;  %750 = vst [vmem:[#allocation2 + $0x20] sm:$0xf] %v749_v13  ;;  %v6204_v61 = vrot.slane %v543_v45, 7  ;;  %v559_v48 = vshrl.u32 %v6103_v57, 16  ;;  %v316_v13 = vld [vmem:[#allocation2 + $0x40] sm:$0x1]  ;;  %vm6451_vm12 = vmand %vm1042_vm10, %vm1043_vm11 }
  0x31   : > { %941 = vrot.lane.b32.xlu1 %v6088_v47, %s5892_s14  ;;  %751 = vst.msk [vmem:[#allocation2 + $0x24] sm:$0xf] %vm286_vm3, %v525_v22  ;;  %v570_v22 = vshll.u32 %v5355_v29, 16  ;;  %vm1366_vm13 = vcmask 122976   ;;  %vm8108_vm15 = vsmask.f32 3328 }
  0x32   : > { %v6218_v10 = vor.u32 %v546_v49, %v6204_v61  ;;  %v561_v21 = vrot.slane %v559_v48, 7  ;;  %v828_v49 = vld [vmem:[%s6003_s13 + $0xe8] sm:$0xff]  ;;  %vm6480_vm14 = vmand %vm1366_vm13, %vm290_vm0  ;;  %vm2220_vm6 = vcmask 191651  }
  0x33   : > { %vm6644_vm1 = vmand %vm8107_vm9, %vm8108_vm15 }
  0x34   : > { %943 = vrot.lane.b32.xlu0 %v6103_v57, %s5892_s14  ;;  %v565_v45 = vrot.slane %v561_v21, 4 }
  0x35   : > { %945 = vrot.lane.b32.xlu1 %v5385_v56, %s5892_s14  ;;  %v819_v56 = vld [vmem:[%s6003_s13 + $0xa0] sm:$0xff] }
  0x36   : > { %v5392_v7 = vpack.c.bf16 %v819_v56, %v819_v56  ;;  %v826_v56 = vld [vmem:[%s6003_s13 + $0xd8] sm:$0xff] }
  0x38   : > { %947 = vrot.lane.b32.xlu0 %v6112_v5, %s5892_s14 }
  0x39   : > { %949 = vrot.lane.b32.xlu1 %v5387_v4, %s5892_s14  ;;  %v527_v4 = vshrl.u32 %v6072_v40, 16  ;;  %v5353_v40 = vpack.c.bf16 %v351_v11, %v351_v11  ;;  %v8104_v11 = vrot.slane %v6204_v61, 4 }
  0x3b   : > { %v6180_v14 = vrot.slane %v527_v4, 7  ;;  %v551_v53 = vshrl.u32 %v5353_v40, 16  ;;  %v554_v54 = vshll.u32 %v5353_v40, 16  ;;  %v562_v4 = vshll.u32 %v6103_v57, 16 }
  0x3c   : > { %951 = vrot.lane.b32.xlu0 %v6133_v26, %s5892_s14  ;;  %v567_v57 = vshrl.u32 %v5355_v29, 16  ;;  %v5398_v40 = vpack.c.bf16 %v825_v58, %v825_v58  ;;  %v317_v58 = vsel %vm5989_vm2, 0, %v316_v13 }
  0x3d   : > { %953 = vrot.lane.b32.xlu1 %v5389_v25, %s5892_s14  ;;  %v535_v25 = vshrl.u32 %v5351_v3, 16  ;;  %v6191_v24 = vor.u32 %v530_v15, %v6180_v14  ;;  %v8105_v37 = vrot.slane %v6180_v14, 4  ;;  %v553_v3 = vrot.slane %v551_v53, 7  ;;  %318 = vst [vmem:[#allocation2 + $0x40] sm:$0x1] %v317_v58 }
  0x3e   : > { %v5399_v15 = vpack.c.bf16 %v826_v56, %v826_v56  ;;  %v827_v56 = vld [vmem:[%s6003_s13 + $0xe0] sm:$0xff] }
  0x3f   : > { %v753_v52 = vsel %vm6058_vm5, %v6191_v24, %v752_v27  ;;  %v757_v27 = vsel %vm6058_vm5, %v6218_v10, %v756_v62 }
  0x40   : > { %955 = vrot.lane.b32.xlu0 %v5390_v50, %s5892_s14  ;;  %v313_v50 = vld [vmem:[#allocation2 + $0x38] sm:$0x1]  ;;  %754 = vst [vmem:[#allocation2 + $0x28] sm:$0xf] %v753_v52  ;;  %758 = vst [vmem:[#allocation2 + $0x30] sm:$0xf] %v757_v27 }
  0x41   : > { %957 = vrot.lane.b32.xlu1 %v5391_v44, %s5892_s14  ;;  %v537_v44 = vrot.slane %v535_v25, 7  ;;  %v357_v25 = vld [vmem:[%s6003_s13 + $0x88] sm:$0x7f] }
  0x43   : > { %v540_v60 = vor.u32 %v538_v34, %v537_v44  ;;  %v575_v34 = vshrl.u32 %v6112_v5, 16  ;;  %v564_v44 = vor.u32 %v562_v4, %v561_v21  ;;  %v591_v4 = vshrl.u32 %v6133_v26, 16 }
  0x44   : > { %959 = vrot.lane.b32.xlu0 %v5392_v7, %s5892_s14  ;;  %v355_v7 = vld [vmem:[%s6003_s13 + $0x78] sm:$0x7f] }
  0x45   : > { %961 = vrot.lane.b32.xlu1 %v5393_v6, %s5892_s14  ;;  %v314_v6 = vsel %vm5989_vm2, 0, %v313_v50  ;;  %v541_v8 = vsel %vm6119_vm7, %v8105_v37, %v540_v60  ;;  %v5357_v33 = vpack.c.bf16 %v355_v7, %v355_v7  ;;  %v577_v52 = vrot.slane %v575_v34, 7  ;;  %v358_v34 = vld [vmem:[%s6003_s13 + $0x90] sm:$0xff] }
  0x46   : > { %315 = vst [vmem:[#allocation2 + $0x38] sm:$0x1] %v314_v6  ;;  %755 = vst.msk [vmem:[#allocation2 + $0x2c] sm:$0xf] %vm286_vm3, %v541_v8  ;;  %v5359_v60 = vpack.c.bf16 %v357_v25, %v357_v25  ;;  %v319_v6 = vld [vmem:[#allocation2 + $0x48] sm:$0x1]  ;;  %v5400_v7 = vpack.c.bf16 %v827_v56, %v827_v56  ;;  %v5360_v58 = vpack.c.bf16 %v358_v34, %v358_v34 }
  0x47   : > { %v583_v53 = vshrl.u32 %v5357_v33, 16  ;;  %v1094_v8 = vld [vmem:[%s6003_s13 + $0x9] sm:$0x7f]  ;;  %v593_v21 = vrot.slane %v591_v4, 7  ;;  %v322_v25 = vld [vmem:[#allocation2 + $0x50] sm:$0x1] }
  0x48   : > { %963 = vrot.lane.b32.xlu0 %v5394_v32, %s5892_s14  ;;  %v569_v32 = vrot.slane %v567_v57, 7  ;;  %v599_v13 = vshrl.u32 %v5359_v60, 16  ;;  %v764_v56 = vld [vmem:[#allocation2 + $0x40] sm:$0xf]  ;;  %v610_v4 = vshll.u32 %v5360_v58, 16 }
  0x49   : > { %965 = vrot.lane.b32.xlu1 %v5395_v18, %s5892_s14  ;;  %v556_v18 = vor.u32 %v554_v54, %v553_v3  ;;  %v586_v54 = vshll.u32 %v5357_v33, 16  ;;  %v585_v29 = vrot.slane %v583_v53, 7  ;;  %v5401_v3 = vpack.c.bf16 %v828_v49, %v828_v49  ;;  %v1096_v53 = vld [vmem:[%s6003_s13 + $0x19] sm:$0x7f] }
  0x4a   : > { %v572_v50 = vor.u32 %v570_v22, %v569_v32  ;;  %v602_v22 = vshll.u32 %v5359_v60, 16  ;;  %v601_v32 = vrot.slane %v599_v13, 7  ;;  %v320_v33 = vsel %vm5989_vm2, 0, %v319_v6  ;;  %v1098_v60 = vld [vmem:[%s6003_s13 + $0x29] sm:$0x7f]  ;;  %v1097_v13 = vld [vmem:[%s6003_s13 + $0x21] sm:$0xff] }
  0x4b   : > { %v557_v36 = vsel %vm6119_vm7, %v8104_v11, %v556_v18  ;;  %v588_v57 = vor.u32 %v586_v54, %v585_v29  ;;  %v1093_v18 = vld [vmem:[%s6003_s13 + $0x1] sm:$0xff]  ;;  %321 = vst [vmem:[#allocation2 + $0x48] sm:$0x1] %v320_v33  ;;  %v1095_v54 = vld [vmem:[%s6003_s13 + $0x11] sm:$0xff] }
  0x4c   : > { %967 = vrot.lane.b32.xlu0 %v5396_v55, %s5892_s14  ;;  %759 = vst.msk [vmem:[#allocation2 + $0x34] sm:$0xf] %vm286_vm3, %v557_v36  ;;  %v573_v62 = vsel %vm6119_vm7, %v565_v45, %v572_v50  ;;  %v581_v55 = vrot.slane %v577_v52, 4  ;;  %v594_v36 = vshll.u32 %v6133_v26, 16  ;;  %v5403_v45 = vpack.c.bf16 %v1094_v8, %v1094_v8  ;;  %v361_v29 = vld [vmem:[%s6003_s13 + $0xa8] sm:$0x7f] }
  0x4d   : > { %969 = vrot.lane.b32.xlu1 %v5397_v51, %s5892_s14  ;;  %v578_v51 = vshll.u32 %v6112_v5, 16  ;;  %763 = vst.msk [vmem:[#allocation2 + $0x3c] sm:$0xf] %vm286_vm3, %v573_v62  ;;  %v760_v48 = vld [vmem:[#allocation2 + $0x38] sm:$0xf]  ;;  %v6259_v49 = vpack.c.bf16 %v1093_v18, %v1093_v18  ;;  %v604_v50 = vor.u32 %v602_v22, %v601_v32  ;;  %v5405_v8 = vpack.c.bf16 %v1096_v53, %v1096_v53 }
  0x4e   : > { %v761_v5 = vsel %vm6058_vm5, %v564_v44, %v760_v48  ;;  %v597_v44 = vrot.slane %v593_v21, 4  ;;  %v607_v48 = vshrl.u32 %v5360_v58, 16  ;;  %v5363_v32 = vpack.c.bf16 %v361_v29, %v361_v29 }
  0x4f   : > { %762 = vst [vmem:[#allocation2 + $0x38] sm:$0xf] %v761_v5  ;;  %v580_v27 = vor.u32 %v578_v51, %v577_v52  ;;  %v323_v52 = vsel %vm5989_vm2, 0, %v322_v25  ;;  %v6276_v5 = vpack.c.bf16 %v1095_v54, %v1095_v54  ;;  %v5407_v25 = vpack.c.bf16 %v1098_v60, %v1098_v60  ;;  %v1099_v60 = vld [vmem:[%s6003_s13 + $0x31] sm:$0xff] }
  0x50   : > { %971 = vrot.lane.b32.xlu0 %v5398_v40, %s5892_s14  ;;  %v359_v40 = vld [vmem:[%s6003_s13 + $0x98] sm:$0x7f]  ;;  %324 = vst [vmem:[#allocation2 + $0x50] sm:$0x1] %v323_v52  ;;  %v605_v51 = vsel %vm6119_vm7, %v597_v44, %v604_v50  ;;  %v6279_v18 = vrot.slane %v607_v48, 7  ;;  %v5406_v52 = vpack.c.bf16 %v1097_v13, %v1097_v13  ;;  %v631_v58 = vshrl.u32 %v5363_v32, 16 }
  0x51   : > { %973 = vrot.lane.b32.xlu1 %v5399_v15, %s5892_s14  ;;  %v589_v15 = vsel %vm6119_vm7, %v581_v55, %v588_v57  ;;  %v5361_v26 = vpack.c.bf16 %v359_v40, %v359_v40  ;;  %v765_v62 = vsel %vm6058_vm5, %v580_v27, %v764_v56  ;;  %v360_v55 = vld [vmem:[%s6003_s13 + $0xa0] sm:$0xff]  ;;  %771 = vst.msk [vmem:[#allocation2 + $0x4c] sm:$0xf] %vm286_vm3, %v605_v51  ;;  %v1100_v27 = vld [vmem:[%s6003_s13 + $0x39] sm:$0x7f] }
  0x52   : > { %767 = vst.msk [vmem:[#allocation2 + $0x44] sm:$0xf] %vm286_vm3, %v589_v15  ;;  %766 = vst [vmem:[#allocation2 + $0x40] sm:$0xf] %v765_v62  ;;  %v5362_v22 = vpack.c.bf16 %v360_v55, %v360_v55  ;;  %v768_v15 = vld [vmem:[#allocation2 + $0x48] sm:$0xf]  ;;  %v6287_v40 = vor.u32 %v610_v4, %v6279_v18  ;;  %v5409_v48 = vpack.c.bf16 %v1100_v27, %v1100_v27 }
  0x53   : > { %v615_v6 = vshrl.u32 %v5361_v26, 16  ;;  %v618_v57 = vshll.u32 %v5361_v26, 16  ;;  %v328_v50 = vld [vmem:[#allocation2 + $0x60] sm:$0x1]  ;;  %v362_v26 = vld [vmem:[%s6003_s13 + $0xb0] sm:$0xff]  ;;  %v634_v55 = vshll.u32 %v5363_v32, 16 }
  0x54   : > { %975 = vrot.lane.b32.xlu0 %v5400_v7, %s5892_s14  ;;  %v325_v7 = vld [vmem:[#allocation2 + $0x58] sm:$0x1]  ;;  %v623_v54 = vshrl.u32 %v5362_v22, 16  ;;  %v626_v56 = vshll.u32 %v5362_v22, 16  ;;  %v5364_v4 = vpack.c.bf16 %v362_v26, %v362_v26  ;;  %v1102_v22 = vld [vmem:[%s6003_s13 + $0x49] sm:$0x7f] }
  0x55   : > { %977 = vrot.lane.b32.xlu1 %v5401_v3, %s5892_s14  ;;  %v596_v3 = vor.u32 %v594_v36, %v593_v21  ;;  %v617_v21 = vrot.slane %v615_v6, 7  ;;  %v326_v33 = vsel %vm5989_vm2, 0, %v325_v7  ;;  %v8103_v36 = vrot.slane %v6279_v18, 4  ;;  %v1101_v27 = vld [vmem:[%s6003_s13 + $0x41] sm:$0xff]  ;;  %s7958_s14 = scalar_lea.hbm %s8100_s6, %s8113_s9 }
  0x56   : > { %327 = vst [vmem:[#allocation2 + $0x58] sm:$0x1] %v326_v33  ;;  %v6304_v29 = vrot.slane %v623_v54, 7  ;;  %v329_v7 = vsel %vm5989_vm2, 0, %v328_v50  ;;  %v642_v32 = vshll.u32 %v5364_v4, 16  ;;  %v5410_v54 = vpack.c.bf16 %v1101_v27, %v1101_v27  ;;  %v366_v27 = vld [vmem:[%s6003_s13 + $0xd0] sm:$0xff] }
  0x57   : > { %v769_v34 = vsel %vm6058_vm5, %v596_v3, %v768_v15  ;;  %v620_v44 = vor.u32 %v618_v57, %v617_v21  ;;  %v772_v53 = vld [vmem:[#allocation2 + $0x50] sm:$0xf]  ;;  %v633_v3 = vrot.slane %v631_v58, 7  ;;  %330 = vst [vmem:[#allocation2 + $0x60] sm:$0x1] %v329_v7  ;;  %v639_v15 = vshrl.u32 %v5364_v4, 16 }
  0x58   : > { %1213 = vrot.lane.b32.xlu0 %v6259_v49, %s5893_s15  ;;  %770 = vst [vmem:[#allocation2 + $0x48] sm:$0xf] %v769_v34  ;;  %v773_v51 = vsel %vm6058_vm5, %v6287_v40, %v772_v53  ;;  %v6311_v57 = vor.u32 %v626_v56, %v6304_v29  ;;  %v8102_v13 = vrot.slane %v6304_v29, 4  ;;  %v5411_v53 = vpack.c.bf16 %v1102_v22, %v1102_v22  ;;  %v1104_v56 = vld [vmem:[%s6003_s13 + $0x59] sm:$0x7f]  ;;  %v1105_v7 = vld [vmem:[%s6003_s13 + $0x61] sm:$0xff] }
  0x59   : > { %1215 = vrot.lane.b32.xlu1 %v5403_v45, %s5893_s15  ;;  %v363_v45 = vld [vmem:[%s6003_s13 + $0xb8] sm:$0x7f]  ;;  %v621_v62 = vsel %vm6119_vm7, %v8103_v36, %v620_v44  ;;  %774 = vst [vmem:[#allocation2 + $0x50] sm:$0xf] %v773_v51  ;;  %v636_v21 = vor.u32 %v634_v55, %v633_v3  ;;  %v365_v26 = vld [vmem:[%s6003_s13 + $0xc8] sm:$0x7f] }
  0x5a   : > { %775 = vst.msk [vmem:[#allocation2 + $0x54] sm:$0xf] %vm286_vm3, %v621_v62  ;;  %v5365_v6 = vpack.c.bf16 %v363_v45, %v363_v45  ;;  %v364_v45 = vld [vmem:[%s6003_s13 + $0xc0] sm:$0xff]  ;;  %v1106_v3 = vld [vmem:[%s6003_s13 + $0x69] sm:$0x7f] }
  0x5b   : > { %v5366_v55 = vpack.c.bf16 %v364_v45, %v364_v45  ;;  %v331_v4 = vld [vmem:[#allocation2 + $0x68] sm:$0x1] }
  0x5c   : > { %1217 = vrot.lane.b32.xlu0 %v6276_v5, %s5893_s15  ;;  %v647_v34 = vshrl.u32 %v5365_v6, 16  ;;  %v650_v44 = vshll.u32 %v5365_v6, 16  ;;  %v5413_v6 = vpack.c.bf16 %v1104_v56, %v1104_v56 }
  0x5d   : > { %1219 = vrot.lane.b32.xlu1 %v5405_v8, %s5893_s15  ;;  %v5408_v8 = vpack.c.bf16 %v1099_v60, %v1099_v60  ;;  %v776_v33 = vld [vmem:[#allocation2 + $0x58] sm:$0xf]  ;;  %v655_v22 = vshrl.u32 %v5366_v55, 16  ;;  %v658_v56 = vshll.u32 %v5366_v55, 16 }
  0x5e   : > { %v777_v50 = vsel %vm6058_vm5, %v6311_v57, %v776_v33  ;;  %v649_v58 = vrot.slane %v647_v34, 7  ;;  %v1103_v60 = vld [vmem:[%s6003_s13 + $0x51] sm:$0xff] }
  0x5f   : > { %778 = vst [vmem:[#allocation2 + $0x58] sm:$0xf] %v777_v50  ;;  %v367_v34 = vld [vmem:[%s6003_s13 + $0xd8] sm:$0x7f] }
  0x60   : > { %1221 = vrot.lane.b32.xlu0 %v5406_v52, %s5893_s15  ;;  %v6325_v52 = vrot.slane %v639_v15, 7  ;;  %v5412_v15 = vpack.c.bf16 %v1103_v60, %v1103_v60 }
  0x61   : > { %1223 = vrot.lane.b32.xlu1 %v5407_v25, %s5893_s15  ;;  %v637_v25 = vsel %vm6119_vm7, %v8102_v13, %v636_v21  ;;  %v5367_v21 = vpack.c.bf16 %v365_v26, %v365_v26  ;;  %v5415_v26 = vpack.c.bf16 %v1106_v3, %v1106_v3  ;;  %v369_v13 = vld [vmem:[%s6003_s13 + $0xe8] sm:$0x7f] }
  0x62   : > { %779 = vst.msk [vmem:[#allocation2 + $0x5c] sm:$0xf] %vm286_vm3, %v637_v25  ;;  %v6333_v62 = vor.u32 %v642_v32, %v6325_v52  ;;  %v8101_v51 = vrot.slane %v6325_v52, 4  ;;  %v6342_v32 = vld [vmem:[%s6003_s13 + $0x79] sm:$0x7f] }
  0x63   : > { %v663_v45 = vshrl.u32 %v5367_v21, 16  ;;  %v666_v50 = vshll.u32 %v5367_v21, 16  ;;  %v5414_v21 = vpack.c.bf16 %v1105_v7, %v1105_v7  ;;  %v1417_v3 = vld [vmem:[%s6003_s13 + $0x8] sm:$0x7f] }
  0x64   : > { %1225 = vrot.lane.b32.xlu0 %v5408_v8, %s5893_s15  ;;  %v780_v8 = vld [vmem:[#allocation2 + $0x60] sm:$0xf] }
  0x65   : > { %1227 = vrot.lane.b32.xlu1 %v5409_v48, %s5893_s15  ;;  %v652_v48 = vor.u32 %v650_v44, %v649_v58  ;;  %v781_v33 = vsel %vm6058_vm5, %v6333_v62, %v780_v8  ;;  %v657_v44 = vrot.slane %v655_v22, 7  ;;  %v5368_v58 = vpack.c.bf16 %v366_v27, %v366_v27  ;;  %v337_v27 = vld [vmem:[#allocation2 + $0x78] sm:$0x1] }
  0x66   : > { %782 = vst [vmem:[#allocation2 + $0x60] sm:$0xf] %v781_v33  ;;  %v5369_v8 = vpack.c.bf16 %v367_v34, %v367_v34  ;;  %v5417_v22 = vpack.c.bf16 %v6342_v32, %v6342_v32 }
  0x67   : > { %v653_v25 = vsel %vm6119_vm7, %v8101_v51, %v652_v48  ;;  %v661_v60 = vrot.slane %v657_v44, 4  ;;  %v665_v48 = vrot.slane %v663_v45, 7  ;;  %v368_v51 = vld [vmem:[%s6003_s13 + $0xe0] sm:$0xff]  ;;  %v674_v34 = vshll.u32 %v5368_v58, 16 }
  0x68   : > { %1229 = vrot.lane.b32.xlu0 %v5410_v54, %s5893_s15  ;;  %783 = vst.msk [vmem:[#allocation2 + $0x64] sm:$0xf] %vm286_vm3, %v653_v25  ;;  %v334_v54 = vld [vmem:[#allocation2 + $0x70] sm:$0x1]  ;;  %v671_v25 = vshrl.u32 %v5368_v58, 16  ;;  %v679_v45 = vshrl.u32 %v5369_v8, 16  ;;  %v5370_v7 = vpack.c.bf16 %v368_v51, %v368_v51  ;;  %v5433_v58 = vpack.c.bf16 %v1417_v3, %v1417_v3 }
  0x69   : > { %1231 = vrot.lane.b32.xlu1 %v5411_v53, %s5893_s15  ;;  %v332_v53 = vsel %vm5989_vm2, 0, %v331_v4  ;;  %v1107_v4 = vld [vmem:[%s6003_s13 + $0x71] sm:$0xff]  ;;  %v335_v55 = vsel %vm5989_vm2, 0, %v334_v54  ;;  %v668_v33 = vor.u32 %v666_v50, %v665_v48  ;;  %v338_v54 = vsel %vm5989_vm2, 0, %v337_v27  ;;  %v1110_v50 = vld [vmem:[%s6003_s13 + $0x89] sm:$0x7f] }
  0x6a   : > { %333 = vst [vmem:[#allocation2 + $0x68] sm:$0x1] %v332_v53  ;;  %v682_v53 = vshll.u32 %v5369_v8, 16  ;;  %336 = vst [vmem:[#allocation2 + $0x70] sm:$0x1] %v335_v55  ;;  %v673_v36 = vrot.slane %v671_v25, 7  ;;  %v5416_v11 = vpack.c.bf16 %v1107_v4, %v1107_v4 }
  0x6b   : > { %v669_v32 = vsel %vm6119_vm7, %v661_v60, %v668_v33  ;;  %v681_v37 = vrot.slane %v679_v45, 7  ;;  %v687_v51 = vshrl.u32 %v5370_v7, 16  ;;  %339 = vst [vmem:[#allocation2 + $0x78] sm:$0x1] %v338_v54  ;;  %v1419_v55 = vld [vmem:[%s6003_s13 + $0x18] sm:$0x7f] }
  0x6c   : > { %1233 = vrot.lane.b32.xlu0 %v5412_v15, %s5893_s15  ;;  %v5371_v15 = vpack.c.bf16 %v369_v13, %v369_v13  ;;  %787 = vst.msk [vmem:[#allocation2 + $0x6c] sm:$0xf] %vm286_vm3, %v669_v32  ;;  %v690_v13 = vshll.u32 %v5370_v7, 16  ;;  %v676_v48 = vor.u32 %v674_v34, %v673_v36  ;;  %v1112_v33 = vld [vmem:[%s6003_s13 + $0x99] sm:$0x7f]  ;;  %v1553_v7 = vshrl.u32 %v5433_v58, 16 }
  0x6d   : > { %1235 = vrot.lane.b32.xlu1 %v5413_v6, %s5893_s15  ;;  %v660_v6 = vor.u32 %v658_v56, %v657_v44  ;;  %v677_v44 = vrot.slane %v673_v36, 4  ;;  %v1109_v56 = vld [vmem:[%s6003_s13 + $0x81] sm:$0xff]  ;;  %v684_v8 = vor.u32 %v682_v53, %v681_v37  ;;  %v5419_v37 = vpack.c.bf16 %v1110_v50, %v1110_v50  ;;  %v5102_v32 = vld [vmem:[%s6003_s13 + $0x10] sm:$0xff] }
  0x6e   : > { %v695_v4 = vshrl.u32 %v5371_v15, 16  ;;  %v698_v25 = vshll.u32 %v5371_v15, 16  ;;  %v5418_v36 = vpack.c.bf16 %v1109_v56, %v1109_v56  ;;  %v5435_v15 = vpack.c.bf16 %v1419_v55, %v1419_v55  ;;  %v1114_v56 = vld [vmem:[%s6003_s13 + $0xa9] sm:$0x7f] }
  0x6f   : > { %v685_v27 = vsel %vm6119_vm7, %v677_v44, %v684_v8  ;;  %v1421_v44 = vld [vmem:[%s6003_s13 + $0x28] sm:$0x7f] }
  0x70   : > { %1237 = vrot.lane.b32.xlu0 %v5414_v21, %s5893_s15  ;;  %v689_v21 = vrot.slane %v687_v51, 7  ;;  %v697_v3 = vrot.slane %v695_v4, 7  ;;  %791 = vst.msk [vmem:[#allocation2 + $0x74] sm:$0xf] %vm286_vm3, %v685_v27  ;;  %v1113_v8 = vld [vmem:[%s6003_s13 + $0xa1] sm:$0xff]  ;;  %v1555_v4 = vrot.slane %v1553_v7, 7  ;;  %v5423_v27 = vpack.c.bf16 %v1114_v56, %v1114_v56 }
  0x71   : > { %1239 = vrot.lane.b32.xlu1 %v5415_v26, %s5893_s15  ;;  %v784_v60 = vld [vmem:[#allocation2 + $0x68] sm:$0xf]  ;;  %v788_v34 = vld [vmem:[#allocation2 + $0x70] sm:$0xf]  ;;  %v1569_v55 = vshrl.u32 %v5435_v15, 16 }
  0x72   : > { %v785_v26 = vsel %vm6058_vm5, %v660_v6, %v784_v60  ;;  %v692_v45 = vor.u32 %v690_v13, %v689_v21  ;;  %v693_v53 = vrot.slane %v689_v21, 4  ;;  %v1111_v6 = vld [vmem:[%s6003_s13 + $0x91] sm:$0xff]  ;;  %v789_v54 = vsel %vm6058_vm5, %v676_v48, %v788_v34 }
  0x73   : > { %786 = vst [vmem:[#allocation2 + $0x68] sm:$0xf] %v785_v26  ;;  %790 = vst [vmem:[#allocation2 + $0x70] sm:$0xf] %v789_v54  ;;  %v792_v51 = vld [vmem:[#allocation2 + $0x78] sm:$0xf]  ;;  %v5420_v13 = vpack.c.bf16 %v1111_v6, %v1111_v6  ;;  %v5528_v60 = vpack.c.bf16 %v5102_v32, %v5102_v32  ;;  %v5437_v26 = vpack.c.bf16 %v1421_v44, %v1421_v44 }
  0x74   : > { %1241 = vrot.lane.b32.xlu0 %v5416_v11, %s5893_s15  ;;  %v5421_v11 = vpack.c.bf16 %v1112_v33, %v1112_v33  ;;  %v793_v48 = vsel %vm6058_vm5, %v692_v45, %v792_v51  ;;  %v1423_v21 = vld [vmem:[%s6003_s13 + $0x38] sm:$0x7f]  ;;  %v1571_v35 = vrot.slane %v1569_v55, 7  ;;  %v1572_v45 = vshll.u32 %v5435_v15, 16  ;;  %v1425_v51 = vld [vmem:[%s6003_s13 + $0x48] sm:$0x7f] }
  0x75   : > { %1243 = vrot.lane.b32.xlu1 %v5417_v22, %s5893_s15  ;;  %v700_v22 = vor.u32 %v698_v25, %v697_v3  ;;  %v1556_v25 = vshll.u32 %v5433_v58, 16  ;;  %794 = vst [vmem:[#allocation2 + $0x78] sm:$0xf] %v793_v48  ;;  %v5422_v3 = vpack.c.bf16 %v1113_v8, %v1113_v8  ;;  %v2737_v33 = vshrl.u32 %v5528_v60, 16  ;;  %v1428_v58 = vld [vmem:[%s6003_s13 + $0x60] sm:$0xff] }
  0x76   : > { %v5444_v54 = vpack.c.bf16 %v1428_v58, %v1428_v58  ;;  %v1588_v15 = vshll.u32 %v5437_v26, 16  ;;  %v5441_v8 = vpack.c.bf16 %v1425_v51, %v1425_v51  ;;  %vm2187_vm5 = vcmask 158848  }
  0x77   : > { %v701_v50 = vsel %vm6119_vm7, %v693_v53, %v700_v22  ;;  %v1558_v34 = vor.u32 %v1556_v25, %v1555_v4  ;;  %v1585_v53 = vshrl.u32 %v5437_v26, 16  ;;  %v6404_v32 = vrot.slane %v2737_v33, 7  ;;  %v1427_v25 = vld [vmem:[%s6003_s13 + $0x58] sm:$0x7f] }
  0x78   : > { %1245 = vrot.lane.b32.xlu0 %v5418_v36, %s5893_s15  ;;  %795 = vst.msk [vmem:[#allocation2 + $0x7c] sm:$0xf] %vm286_vm3, %v701_v50  ;;  %v5439_v36 = vpack.c.bf16 %v1423_v21, %v1423_v21  ;;  %v2740_v22 = vshll.u32 %v5528_v60, 16  ;;  %v1641_v41 = vshrl.u32 %v5444_v54, 16  ;;  %v5895_v4 = vmov 0  }
  0x79   : > { %1247 = vrot.lane.b32.xlu1 %v5419_v37, %s5893_s15  ;;  %v1115_v37 = vld [vmem:[%s6003_s13 + $0xb1] sm:$0xff]  ;;  %v1559_v44 = vsel %vm6119_vm7, %v469_v9, %v1558_v34  ;;  %v1587_v50 = vrot.slane %v1585_v53, 7  ;;  %288 = vst.msk [vmem:[#allocation2 + $0x4] sm:$0xf] %vm286_vm3, %v5895_v4  ;;  %287 = vst.msk [vmem:[#allocation2] sm:$0xf] %vm286_vm3, %v5895_v4 }
  0x7a   : > { %v5424_v6 = vpack.c.bf16 %v1115_v37, %v1115_v37  ;;  %v1601_v7 = vshrl.u32 %v5439_v36, 16  ;;  %v1604_v60 = vshll.u32 %v5439_v36, 16  ;;  %798 = vst.msk [vmem:[#allocation2 + $0x4] sm:$0xf] %vm796_vm8, %v5895_v4  ;;  %v1644_v55 = vshll.u32 %v5444_v54, 16 }
  0x7b   : > { %v1590_v48 = vor.u32 %v1588_v15, %v1587_v50  ;;  %1041 = vst.msk [vmem:[#allocation2 + $0x4] sm:$0xf] %vm8107_vm9, %v5895_v4  ;;  %v1617_v21 = vshrl.u32 %v5441_v8, 16  ;;  %v1620_v31 = vshll.u32 %v5441_v8, 16  ;;  %v8127_v50 = vrot.slane %v6204_v61, 4 }
  0x7c   : > { %1249 = vrot.lane.b32.xlu0 %v5420_v13, %s5893_s15  ;;  %v6412_v13 = vor.u32 %v2740_v22, %v6404_v32  ;;  %v1603_v56 = vrot.slane %v1601_v7, 7  ;;  %vm8106_vm3 = vcmask 1041408  }
  0x7d   : > { %1251 = vrot.lane.b32.xlu1 %v5421_v11, %s5893_s15  ;;  %v1574_v11 = vor.u32 %v1572_v45, %v1571_v35  ;;  %v1591_v26 = vsel %vm6119_vm7, %v501_v43, %v1590_v48  ;;  %v1619_v43 = vrot.slane %v1617_v21, 7 }
  0x7e   : > { %v1606_v30 = vor.u32 %v1604_v60, %v1603_v56  ;;  %v5104_v56 = vld [vmem:[%s6003_s13 + $0x20] sm:$0xff]  ;;  %v5105_v60 = vld [vmem:[%s6003_s13 + $0x28] sm:$0x7f] }
  0x7f   : > { %v1575_v9 = vsel %vm6119_vm7, %v485_v63, %v1574_v11  ;;  %v6432_v63 = vrot.slane %v1641_v41, 7  ;;  %v1622_v1 = vor.u32 %v1620_v31, %v1619_v43  ;;  %v5103_v11 = vld [vmem:[%s6003_s13 + $0x18] sm:$0x7f]  ;;  %v6504_v61 = vpack.c.bf16 %v5104_v56, %v5104_v56 }
  0x80   : > { %1253 = vrot.lane.b32.xlu0 %v5422_v3, %s5893_s15  ;;  %v292_v37 = vld [vmem:[#allocation2] sm:$0x1]  ;;  %v5529_v51 = vpack.c.bf16 %v5103_v11, %v5103_v11  ;;  %v1430_v11 = vld [vmem:[%s6003_s13 + $0x70] sm:$0xff] }
  0x81   : > { %1255 = vrot.lane.b32.xlu1 %v5423_v27, %s5893_s15  ;;  %v5443_v27 = vpack.c.bf16 %v1427_v25, %v1427_v25  ;;  %v6439_v3 = vor.u32 %v1644_v55, %v6432_v63  ;;  %v293_v33 = vsel %vm5989_vm2, 0, %v292_v37  ;;  %v2271_v55 = vld [vmem:[%s6003_s13 + $0x9] sm:$0x7f]  ;;  %v2753_v37 = vshrl.u32 %v6504_v61, 16 }
  0x82   : > { %294 = vst [vmem:[#allocation2] sm:$0x1] %v293_v33  ;;  %v6541_v56 = vpack.c.bf16 %v1430_v11, %v1430_v11  ;;  %vm8111_vm2 = vcmask 126048  }
  0x83   : > { %v1633_v36 = vshrl.u32 %v5443_v27, 16  ;;  %797 = vst.msk [vmem:[#allocation2] sm:$0xf] %vm796_vm8, %v5895_v4  ;;  %v1636_v53 = vshll.u32 %v5443_v27, 16  ;;  %vm6838_vm10 = vmand %vm8111_vm2, %vm734_vm4 }
  0x84   : > { %1257 = vrot.lane.b32.xlu0 %v5424_v6, %s5893_s15  ;;  %1040 = vst.msk [vmem:[#allocation2] sm:$0xf] %vm8107_vm9, %v5895_v4 }
  0x85   : > { %1802 = vrot.lane.b32.xlu1 %v1559_v44, %s5894_s16 }
  0x88   : > { %1806 = vrot.lane.b32.xlu0 %v1575_v9, %s5894_s16 }
  0x89   : > { %2093 = vrot.lane.b32.xlu1 %v6027_v20, %s5896_s17  ;;  %v1607_v20 = vsel %vm6119_vm7, %v517_v2, %v1606_v30  ;;  %v1635_v2 = vrot.slane %v1633_v36, 7  ;;  %v5531_v30 = vpack.c.bf16 %v5105_v60, %v5105_v60  ;;  %v2273_v36 = vld [vmem:[%s6003_s13 + $0x19] sm:$0x7f] }
  0x8b   : > { %v1638_v54 = vor.u32 %v1636_v53, %v1635_v2  ;;  %v2761_v43 = vshrl.u32 %v5531_v30, 16 }
  0x8c   : > { %2097 = vrot.lane.b32.xlu0 %v6025_v19, %s5896_s17  ;;  %v1045_v19 = vld [vmem:[#allocation2 + $0x4] sm:$0x8] }
  0x8d   : > { %1810 = vrot.lane.b32.xlu1 %v1591_v26, %s5894_s16  ;;  %v1046_v59 = vsel %vm6451_vm12, 0, %v1045_v19  ;;  %v1639_v15 = vsel %vm6119_vm7, %v8127_v50, %v1638_v54  ;;  %v2745_v26 = vshrl.u32 %v5529_v51, 16  ;;  %v2763_v53 = vrot.slane %v2761_v43, 7 }
  0x8e   : > { %v920_v35 = vpop.permute.xlu0 %919  ;;  %1047 = vst [vmem:[#allocation2 + $0x4] sm:$0x8] %v1046_v59 }
  0x8f   : > { %v924_v34 = vpop.permute.xlu1 %923  ;;  %1009 = vst.msk [vmem:[#allocation2 + $0x8] sm:$0xf] %vm796_vm8, %v920_v35  ;;  %v2747_v33 = vrot.slane %v2745_v26, 7  ;;  %v1657_v26 = vshrl.u32 %v6541_v56, 16 }
  0x90   : > { %1011 = vst.msk [vmem:[#allocation2 + $0x10] sm:$0xf] %vm796_vm8, %v924_v34  ;;  %1814 = vrot.lane.b32.xlu0 %v1607_v20, %s5894_s16  ;;  %v2748_v34 = vshll.u32 %v5529_v51, 16 }
  0x91   : > { %2101 = vrot.lane.b32.xlu1 %v6035_v23, %s5896_s17  ;;  %v8124_v23 = vrot.slane %v6180_v14, 4 }
  0x92   : > { %v922_v6 = vpop.permute.xlu0 %921 }
  0x93   : > { %v926_v58 = vpop.permute.xlu1 %925  ;;  %1010 = vst.msk [vmem:[#allocation2 + $0xc] sm:$0xf] %vm796_vm8, %v922_v6  ;;  %v1623_v7 = vsel %vm6119_vm7, %v8124_v23, %v1622_v1  ;;  %v1429_v1 = vld [vmem:[%s6003_s13 + $0x68] sm:$0x7f]  ;;  %v2743_v6 = vrot.slane %v6404_v32, 4  ;;  %v2750_v23 = vor.u32 %v2748_v34, %v2747_v33 }
  0x94   : > { %1012 = vst.msk [vmem:[#allocation2 + $0x14] sm:$0xf] %vm796_vm8, %v926_v58  ;;  %2105 = vrot.lane.b32.xlu0 %v6046_v28, %s5896_s17  ;;  %v1368_v28 = vld [vmem:[#allocation2] sm:$0x1]  ;;  %v2764_v58 = vshll.u32 %v5531_v30, 16 }
  0x95   : > { %1800 = vrot.lane.b32.xlu1 %v6082_v46, %s5894_s16  ;;  %v1369_v14 = vsel %vm6480_vm14, 0, %v1368_v28  ;;  %v1431_v28 = vld [vmem:[%s6003_s13 + $0x78] sm:$0x7f]  ;;  %v2751_v50 = vsel %vm6119_vm7, %v2743_v6, %v2750_v23  ;;  %v1969_v6 = vld [vmem:[%s6003_s13 + $0x30] sm:$0xff] }
  0x96   : > { %v928_v44 = vpop.permute.xlu0 %927  ;;  %1370 = vst [vmem:[#allocation2] sm:$0x1] %v1369_v14  ;;  %v2766_v14 = vor.u32 %v2764_v58, %v2763_v53  ;;  %v5447_v60 = vpack.c.bf16 %v1431_v28, %v1431_v28  ;;  %v5107_v23 = vld [vmem:[%s6003_s13 + $0x38] sm:$0x7f]  ;;  %v6587_v11 = vpack.c.bf16 %v1969_v6, %v1969_v6 }
  0x97   : > { %v930_v22 = vpop.permute.xlu1 %929  ;;  %1013 = vst.msk [vmem:[#allocation2 + $0x18] sm:$0xf] %vm796_vm8, %v928_v44  ;;  %v5533_v28 = vpack.c.bf16 %v5107_v23, %v5107_v23 }
  0x98   : > { %1014 = vst.msk [vmem:[#allocation2 + $0x1c] sm:$0xf] %vm796_vm8, %v930_v22  ;;  %1818 = vrot.lane.b32.xlu0 %v1623_v7, %s5894_s16  ;;  %v5445_v7 = vpack.c.bf16 %v1429_v1, %v1429_v1  ;;  %v1668_v34 = vshll.u32 %v5447_v60, 16 }
  0x99   : > { %1804 = vrot.lane.b32.xlu1 %v6064_v38, %s5894_s16 }
  0x9a   : > { %v1048_v9 = vld [vmem:[#allocation2 + $0xc] sm:$0x8]  ;;  %v932_v8 = vpop.permute.xlu0 %931  ;;  %v1649_v51 = vshrl.u32 %v5445_v7, 16 }
  0x9b   : > { %v1051_v41 = vld [vmem:[#allocation2 + $0x14] sm:$0x8]  ;;  %v934_v48 = vpop.permute.xlu1 %933  ;;  %v1049_v25 = vsel %vm6451_vm12, 0, %v1048_v9  ;;  %1015 = vst.msk [vmem:[#allocation2 + $0x20] sm:$0xf] %vm796_vm8, %v932_v8 }
  0x9c   : > { %v1052_v38 = vsel %vm6451_vm12, 0, %v1051_v41  ;;  %1016 = vst.msk [vmem:[#allocation2 + $0x24] sm:$0xf] %vm796_vm8, %v934_v48  ;;  %1050 = vst [vmem:[#allocation2 + $0xc] sm:$0x8] %v1049_v25  ;;  %1822 = vrot.lane.b32.xlu0 %v1639_v15, %s5894_s16  ;;  %v5163_v15 = vld [vmem:[%s6003_s13 + $0x18] sm:$0xff] }
  0x9d   : > { %1053 = vst [vmem:[#allocation2 + $0x14] sm:$0x8] %v1052_v38  ;;  %2109 = vrot.lane.b32.xlu1 %v6070_v39, %s5896_s17  ;;  %v5497_v39 = vpack.c.bf16 %v2271_v55, %v2271_v55  ;;  %v5165_v25 = vld [vmem:[%s6003_s13 + $0x28] sm:$0xff]  ;;  %v1651_v30 = vrot.slane %v1649_v51, 7  ;;  %v1652_v55 = vshll.u32 %v5445_v7, 16  ;;  %v5108_v51 = vld [vmem:[%s6003_s13 + $0x40] sm:$0xff] }
  0x9e   : > { %v936_v20 = vpop.permute.xlu0 %935 }
  0x9f   : > { %v1054_v21 = vld [vmem:[#allocation2 + $0x1c] sm:$0x8]  ;;  %v938_v27 = vpop.permute.xlu1 %937  ;;  %1017 = vst.msk [vmem:[#allocation2 + $0x28] sm:$0xf] %vm796_vm8, %v936_v20  ;;  %v1654_v43 = vor.u32 %v1652_v55, %v1651_v30 }
  0xa0   : > { %v1055_v31 = vsel %vm6451_vm12, 0, %v1054_v21  ;;  %1018 = vst.msk [vmem:[#allocation2 + $0x2c] sm:$0xf] %vm796_vm8, %v938_v27  ;;  %2091 = vrot.lane.b32.xlu0 %v6018_v17, %s5896_s17  ;;  %v5499_v17 = vpack.c.bf16 %v2273_v36, %v2273_v36  ;;  %v1665_v21 = vshrl.u32 %v5447_v60, 16  ;;  %v6561_v36 = vrot.slane %v1657_v26, 7 }
  0xa1   : > { %1056 = vst [vmem:[#allocation2 + $0x1c] sm:$0x8] %v1055_v31  ;;  %2113 = vrot.lane.b32.xlu1 %v6088_v47, %s5896_s17  ;;  %v6525_v47 = vrot.slane %v2753_v37, 7  ;;  %v1647_v37 = vrot.slane %v6432_v63, 4  ;;  %v5109_v60 = vld [vmem:[%s6003_s13 + $0x48] sm:$0x7f] }
  0xa2   : > { %v940_v59 = vpop.permute.xlu0 %939  ;;  %v1667_v33 = vrot.slane %v1665_v21, 7  ;;  %v1663_v53 = vrot.slane %v6561_v36, 4 }
  0xa3   : > { %v1057_v35 = vld [vmem:[#allocation2 + $0x24] sm:$0x8]  ;;  %v942_v19 = vpop.permute.xlu1 %941  ;;  %1019 = vst.msk [vmem:[#allocation2 + $0x30] sm:$0xf] %vm796_vm8, %v940_v59  ;;  %v2759_v32 = vrot.slane %v6525_v47, 4 }
  0xa4   : > { %v1058_v2 = vsel %vm6451_vm12, 0, %v1057_v35  ;;  %1020 = vst.msk [vmem:[#allocation2 + $0x34] sm:$0xf] %vm796_vm8, %v942_v19  ;;  %2400 = vrot.lane.b32.xlu0 %v5497_v39, %s5897_s18  ;;  %v1670_v58 = vor.u32 %v1668_v34, %v1667_v33 }
  0xa5   : > { %1059 = vst [vmem:[#allocation2 + $0x24] sm:$0x8] %v1058_v2  ;;  %2095 = vrot.lane.b32.xlu1 %v6016_v16, %s5896_s17  ;;  %v2767_v38 = vsel %vm6119_vm7, %v2759_v32, %v2766_v14  ;;  %v1655_v2 = vsel %vm6119_vm7, %v1647_v37, %v1654_v43  ;;  %v1978_v32 = vld [vmem:[%s6003_s13 + $0x78] sm:$0xff] }
  0xa6   : > { %v944_v44 = vpop.permute.xlu0 %943 }
  0xa7   : > { %v1060_v54 = vld [vmem:[#allocation2 + $0x2c] sm:$0x8]  ;;  %v946_v22 = vpop.permute.xlu1 %945  ;;  %1021 = vst.msk [vmem:[#allocation2 + $0x38] sm:$0xf] %vm796_vm8, %v944_v44 }
  0xa8   : > { %v1061_v16 = vsel %vm6451_vm12, 0, %v1060_v54  ;;  %1022 = vst.msk [vmem:[#allocation2 + $0x3c] sm:$0xf] %vm796_vm8, %v946_v22  ;;  %2398 = vrot.lane.b32.xlu0 %v6259_v49, %s5897_s18  ;;  %v5559_v49 = vpack.c.bf16 %v5163_v15, %v5163_v15 }
  0xa9   : > { %1062 = vst [vmem:[#allocation2 + $0x2c] sm:$0x8] %v1061_v16  ;;  %2404 = vrot.lane.b32.xlu1 %v5499_v17, %s5897_s18  ;;  %v1976_v17 = vld [vmem:[%s6003_s13 + $0x68] sm:$0xff]  ;;  %v1671_v16 = vsel %vm6119_vm7, %v1663_v53, %v1670_v58 }
  0xaa   : > { %v948_v48 = vpop.permute.xlu0 %947  ;;  %v6585_v44 = vpack.c.bf16 %v1976_v17, %v1976_v17 }
  0xab   : > { %v1063_v41 = vld [vmem:[#allocation2 + $0x34] sm:$0x8]  ;;  %v950_v9 = vpop.permute.xlu1 %949  ;;  %1023 = vst.msk [vmem:[#allocation2 + $0x40] sm:$0xf] %vm796_vm8, %v948_v48  ;;  %v2777_v48 = vshrl.u32 %v5533_v28, 16 }
  0xac   : > { %v1064_v8 = vsel %vm6451_vm12, 0, %v1063_v41  ;;  %1024 = vst.msk [vmem:[#allocation2 + $0x44] sm:$0xf] %vm796_vm8, %v950_v9  ;;  %2402 = vrot.lane.b32.xlu0 %v6276_v5, %s5897_s18  ;;  %v5561_v5 = vpack.c.bf16 %v5165_v25, %v5165_v25  ;;  %v5479_v41 = vpack.c.bf16 %v1978_v32, %v1978_v32  ;;  %v2769_v9 = vshrl.u32 %v6587_v11, 16 }
  0xad   : > { %1065 = vst [vmem:[#allocation2 + $0x34] sm:$0x8] %v1064_v8  ;;  %2978 = vrot.lane.b32.xlu1 %v2751_v50, %s5898_s19  ;;  %v2275_v8 = vld [vmem:[%s6003_s13 + $0x29] sm:$0x7f] }
  0xae   : > { %v952_v31 = vpop.permute.xlu0 %951  ;;  %v5501_v21 = vpack.c.bf16 %v2275_v8, %v2275_v8 }
  0xaf   : > { %v1066_v27 = vld [vmem:[#allocation2 + $0x3c] sm:$0x8]  ;;  %v954_v20 = vpop.permute.xlu1 %953  ;;  %1025 = vst.msk [vmem:[#allocation2 + $0x48] sm:$0xf] %vm796_vm8, %v952_v31  ;;  %v6614_v31 = vrot.slane %v2769_v9, 7 }
  0xb0   : > { %v1067_v39 = vsel %vm6451_vm12, 0, %v1066_v27  ;;  %1026 = vst.msk [vmem:[#allocation2 + $0x4c] sm:$0xf] %vm796_vm8, %v954_v20  ;;  %2982 = vrot.lane.b32.xlu0 %v2767_v38, %s5898_s19  ;;  %v5535_v38 = vpack.c.bf16 %v5109_v60, %v5109_v60  ;;  %v2277_v27 = vld [vmem:[%s6003_s13 + $0x39] sm:$0x7f]  ;;  %v2274_v20 = vld [vmem:[%s6003_s13 + $0x21] sm:$0xff] }
  0xb1   : > { %1068 = vst [vmem:[#allocation2 + $0x3c] sm:$0x8] %v1067_v39  ;;  %3253 = vrot.lane.b32.xlu1 %v5559_v49, %s5899_s20  ;;  %v6603_v49 = vpack.c.bf16 %v5108_v51, %v5108_v51  ;;  %v2779_v39 = vrot.slane %v2777_v48, 7  ;;  %v5503_v17 = vpack.c.bf16 %v2277_v27, %v2277_v27  ;;  %v6623_v53 = vpack.c.bf16 %v2274_v20, %v2274_v20  ;;  %v5167_v9 = vld [vmem:[%s6003_s13 + $0x38] sm:$0xff] }
  0xb2   : > { %v956_v59 = vpop.permute.xlu0 %955  ;;  %v2793_v33 = vshrl.u32 %v5535_v38, 16  ;;  %v2775_v58 = vrot.slane %v6614_v31, 4  ;;  %v2796_v23 = vshll.u32 %v5535_v38, 16 }
  0xb3   : > { %v1069_v35 = vld [vmem:[#allocation2 + $0x44] sm:$0x8]  ;;  %v958_v19 = vpop.permute.xlu1 %957  ;;  %1027 = vst.msk [vmem:[#allocation2 + $0x50] sm:$0xf] %vm796_vm8, %v956_v59  ;;  %v2785_v43 = vshrl.u32 %v6603_v49, 16 }
  0xb4   : > { %v1070_v1 = vsel %vm6451_vm12, 0, %v1069_v35  ;;  %1028 = vst.msk [vmem:[#allocation2 + $0x54] sm:$0xf] %vm796_vm8, %v958_v19  ;;  %3257 = vrot.lane.b32.xlu0 %v5561_v5, %s5899_s20  ;;  %v2780_v5 = vshll.u32 %v5533_v28, 16  ;;  %v1432_v59 = vld [vmem:[%s6003_s13 + $0x80] sm:$0xff] }
  0xb5   : > { %1071 = vst [vmem:[#allocation2 + $0x44] sm:$0x8] %v1070_v1  ;;  %1808 = vrot.lane.b32.xlu1 %v6146_v42, %s5894_s16  ;;  %v1433_v1 = vld [vmem:[%s6003_s13 + $0x88] sm:$0x7f] }
  0xb6   : > { %v960_v22 = vpop.permute.xlu0 %959  ;;  %v2782_v6 = vor.u32 %v2780_v5, %v2779_v39  ;;  %v5449_v28 = vpack.c.bf16 %v1433_v1, %v1433_v1  ;;  %v5563_v39 = vpack.c.bf16 %v5167_v9, %v5167_v9  ;;  %v1980_v9 = vld [vmem:[%s6003_s13 + $0x88] sm:$0xff] }
  0xb7   : > { %v1072_v7 = vld [vmem:[#allocation2 + $0x4c] sm:$0x8]  ;;  %v962_v54 = vpop.permute.xlu1 %961  ;;  %1029 = vst.msk [vmem:[#allocation2 + $0x58] sm:$0xf] %vm796_vm8, %v960_v22  ;;  %v2795_v22 = vrot.slane %v2793_v33, 7 }
  0xb8   : > { %v1073_v42 = vsel %vm6451_vm12, 0, %v1072_v7  ;;  %1030 = vst.msk [vmem:[#allocation2 + $0x5c] sm:$0xf] %vm796_vm8, %v962_v54  ;;  %1826 = vrot.lane.b32.xlu0 %v1655_v2, %s5894_s16  ;;  %v2276_v7 = vld [vmem:[%s6003_s13 + $0x31] sm:$0xff]  ;;  %v6630_v54 = vrot.slane %v2785_v43, 7  ;;  %v2783_v60 = vsel %vm6119_vm7, %v2775_v58, %v2782_v6  ;;  %v1684_v5 = vshll.u32 %v5449_v28, 16 }
  0xb9   : > { %1074 = vst [vmem:[#allocation2 + $0x4c] sm:$0x8] %v1073_v42  ;;  %1812 = vrot.lane.b32.xlu1 %v6169_v0, %s5894_s16  ;;  %v6632_v42 = vpack.c.bf16 %v1432_v59, %v1432_v59  ;;  %v2798_v8 = vor.u32 %v2796_v23, %v2795_v22  ;;  %v5169_v33 = vld [vmem:[%s6003_s13 + $0x48] sm:$0xff] }
  0xba   : > { %v964_v15 = vpop.permute.xlu0 %963  ;;  %v2791_v48 = vrot.slane %v6630_v54, 4  ;;  %v5565_v23 = vpack.c.bf16 %v5169_v33, %v5169_v33 }
  0xbb   : > { %v1075_v14 = vld [vmem:[#allocation2 + $0x54] sm:$0x8]  ;;  %v966_v50 = vpop.permute.xlu1 %965  ;;  %1031 = vst.msk [vmem:[#allocation2 + $0x60] sm:$0xf] %vm796_vm8, %v964_v15  ;;  %v1673_v38 = vshrl.u32 %v6632_v42, 16 }
  0xbc   : > { %v1076_v0 = vsel %vm6451_vm12, 0, %v1075_v14  ;;  %1032 = vst.msk [vmem:[#allocation2 + $0x64] sm:$0xf] %vm796_vm8, %v966_v50  ;;  %1830 = vrot.lane.b32.xlu0 %v1671_v16, %s5894_s16  ;;  %v1435_v16 = vld [vmem:[%s6003_s13 + $0x98] sm:$0x7f]  ;;  %v2799_v43 = vsel %vm6119_vm7, %v2791_v48, %v2798_v8 }
  0xbd   : > { %1077 = vst [vmem:[#allocation2 + $0x54] sm:$0x8] %v1076_v0  ;;  %2117 = vrot.lane.b32.xlu1 %v6585_v44, %s5896_s17  ;;  %v6650_v0 = vpack.c.bf16 %v2276_v7, %v2276_v7 }
  0xbe   : > { %v968_v55 = vpop.permute.xlu0 %967 }
  0xbf   : > { %v1078_v25 = vld [vmem:[#allocation2 + $0x5c] sm:$0x8]  ;;  %v970_v30 = vpop.permute.xlu1 %969  ;;  %1033 = vst.msk [vmem:[#allocation2 + $0x68] sm:$0xf] %vm796_vm8, %v968_v55 }
  0xc0   : > { %v1079_v26 = vsel %vm6451_vm12, 0, %v1078_v25  ;;  %1034 = vst.msk [vmem:[#allocation2 + $0x6c] sm:$0xf] %vm796_vm8, %v970_v30  ;;  %2099 = vrot.lane.b32.xlu0 %v6504_v61, %s5896_s17  ;;  %v1681_v25 = vshrl.u32 %v5449_v28, 16 }
  0xc1   : > { %1080 = vst [vmem:[#allocation2 + $0x5c] sm:$0x8] %v1079_v26  ;;  %2121 = vrot.lane.b32.xlu1 %v5479_v41, %s5896_s17  ;;  %v5451_v41 = vpack.c.bf16 %v1435_v16, %v1435_v16  ;;  %v1307_v26 = vld [vmem:[#allocation2 + $0xc] sm:$0xf] }
  0xc2   : > { %v972_v19 = vpop.permute.xlu0 %971 }
  0xc3   : > { %v1081_v34 = vld [vmem:[#allocation2 + $0x64] sm:$0x8]  ;;  %v974_v35 = vpop.permute.xlu1 %973  ;;  %1035 = vst.msk [vmem:[#allocation2 + $0x70] sm:$0xf] %vm796_vm8, %v972_v19  ;;  %v1697_v19 = vshrl.u32 %v5451_v41, 16  ;;  %v1700_v16 = vshll.u32 %v5451_v41, 16 }
  0xc4   : > { %v1082_v2 = vsel %vm6451_vm12, 0, %v1081_v34  ;;  %1036 = vst.msk [vmem:[#allocation2 + $0x74] sm:$0xf] %vm796_vm8, %v974_v35  ;;  %2408 = vrot.lane.b32.xlu0 %v5501_v21, %s5897_s18  ;;  %v6666_v34 = vrot.slane %v1673_v38, 7  ;;  %v1683_v35 = vrot.slane %v1681_v25, 7 }
  0xc5   : > { %1083 = vst [vmem:[#allocation2 + $0x64] sm:$0x8] %v1082_v2  ;;  %2103 = vrot.lane.b32.xlu1 %v6587_v11, %s5896_s17  ;;  %v1311_v2 = vld [vmem:[#allocation2 + $0x14] sm:$0xf]  ;;  %v1699_v28 = vrot.slane %v1697_v19, 7 }
  0xc6   : > { %v976_v50 = vpop.permute.xlu0 %975  ;;  %v1679_v7 = vrot.slane %v6666_v34, 4  ;;  %v1686_v22 = vor.u32 %v1684_v5, %v1683_v35  ;;  %v1319_v25 = vld [vmem:[#allocation2 + $0x24] sm:$0xf]  ;;  %v5111_v35 = vld [vmem:[%s6003_s13 + $0x58] sm:$0x7f] }
  0xc7   : > { %v1084_v32 = vld [vmem:[#allocation2 + $0x6c] sm:$0x8]  ;;  %v978_v14 = vpop.permute.xlu1 %977  ;;  %1037 = vst.msk [vmem:[#allocation2 + $0x78] sm:$0xf] %vm796_vm8, %v976_v50  ;;  %v1702_v48 = vor.u32 %v1700_v16, %v1699_v28 }
  0xc8   : > { %v1085_v15 = vsel %vm6451_vm12, 0, %v1084_v32  ;;  %1038 = vst.msk [vmem:[#allocation2 + $0x7c] sm:$0xf] %vm796_vm8, %v978_v14  ;;  %2406 = vrot.lane.b32.xlu0 %v6623_v53, %s5897_s18  ;;  %v1315_v14 = vld [vmem:[#allocation2 + $0x1c] sm:$0xf]  ;;  %v1687_v41 = vsel %vm6119_vm7, %v1679_v7, %v1686_v22  ;;  %vm6818_vm8 = vmand %vm2220_vm6, %vm1043_vm11  ;;  %vm8109_vm6 = vcmask 224448  }
  0xc9   : > { %1086 = vst [vmem:[#allocation2 + $0x6c] sm:$0x8] %v1085_v15  ;;  %2412 = vrot.lane.b32.xlu1 %v5503_v17, %s5897_s18  ;;  %v5113_v22 = vld [vmem:[%s6003_s13 + $0x68] sm:$0x7f] }
  0xca   : > { %v1214_v21 = vpop.permute.xlu0 %1213 }
  0xcb   : > { %v1087_v30 = vld [vmem:[#allocation2 + $0x74] sm:$0x8]  ;;  %v1216_v55 = vpop.permute.xlu1 %1215  ;;  %1303 = vst.msk [vmem:[#allocation2 + $0x8] sm:$0xf] %vm8107_vm9, %v1214_v21  ;;  %v8130_v21 = vrot.slane %v6279_v18, 4 }
  0xcc   : > { %v1088_v27 = vsel %vm6451_vm12, 0, %v1087_v30  ;;  %v1308_v20 = vsel %vm6644_vm1, %v1216_v55, %v1307_v26  ;;  %2410 = vrot.lane.b32.xlu0 %v6650_v0, %s5897_s18  ;;  %v6697_v26 = vpack.c.bf16 %v1980_v9, %v1980_v9 }
  0xcd   : > { %1089 = vst [vmem:[#allocation2 + $0x74] sm:$0x8] %v1088_v27  ;;  %1309 = vst [vmem:[#allocation2 + $0xc] sm:$0xf] %v1308_v20  ;;  %2986 = vrot.lane.b32.xlu1 %v2783_v60, %s5898_s19  ;;  %v1703_v27 = vsel %vm6119_vm7, %v8130_v21, %v1702_v48  ;;  %v1982_v20 = vld [vmem:[%s6003_s13 + $0x98] sm:$0xff] }
  0xce   : > { %v1218_v17 = vpop.permute.xlu0 %1217  ;;  %v5483_v18 = vpack.c.bf16 %v1982_v20, %v1982_v20  ;;  %v2280_v21 = vld [vmem:[%s6003_s13 + $0x51] sm:$0xff] }
  0xcf   : > { %v1090_v59 = vld [vmem:[#allocation2 + $0x7c] sm:$0x8]  ;;  %v1220_v1 = vpop.permute.xlu1 %1219  ;;  %1310 = vst.msk [vmem:[#allocation2 + $0x10] sm:$0xf] %vm8107_vm9, %v1218_v17 }
  0xd0   : > { %v1091_v58 = vsel %vm6451_vm12, 0, %v1090_v59  ;;  %v1312_v6 = vsel %vm6644_vm1, %v1220_v1, %v1311_v2  ;;  %2990 = vrot.lane.b32.xlu0 %v2799_v43, %s5898_s19  ;;  %v1323_v43 = vld [vmem:[#allocation2 + $0x2c] sm:$0xf]  ;;  %v1973_v59 = vld [vmem:[%s6003_s13 + $0x50] sm:$0xff]  ;;  %v5537_v2 = vpack.c.bf16 %v5111_v35, %v5111_v35  ;;  %v1335_v35 = vld [vmem:[#allocation2 + $0x44] sm:$0xf] }
  0xd1   : > { %1092 = vst [vmem:[#allocation2 + $0x7c] sm:$0x8] %v1091_v58  ;;  %1313 = vst [vmem:[#allocation2 + $0x14] sm:$0xf] %v1312_v6  ;;  %3261 = vrot.lane.b32.xlu1 %v5563_v39, %s5899_s20  ;;  %v2279_v1 = vld [vmem:[%s6003_s13 + $0x49] sm:$0x7f] }
  0xd2   : > { %v1371_v45 = vld [vmem:[#allocation2 + $0x8] sm:$0x1]  ;;  %v1222_v50 = vpop.permute.xlu0 %1221  ;;  %v1327_v6 = vld [vmem:[#allocation2 + $0x34] sm:$0xf]  ;;  %vm8110_vm12 = vcmask 191648  }
  0xd3   : > { %v1224_v32 = vpop.permute.xlu1 %1223  ;;  %v1372_v15 = vsel %vm6480_vm14, 0, %v1371_v45  ;;  %1314 = vst.msk [vmem:[#allocation2 + $0x18] sm:$0xf] %vm8107_vm9, %v1222_v50  ;;  %v6721_v45 = vpack.c.bf16 %v1973_v59, %v1973_v59  ;;  %v2278_v50 = vld [vmem:[%s6003_s13 + $0x41] sm:$0xff]  ;;  %v5506_v59 = vpack.c.bf16 %v2280_v21, %v2280_v21  ;;  %v5162_v21 = vld [vmem:[%s6003_s13 + $0x10] sm:$0xff]  ;;  %vm6893_vm13 = vmand %vm8110_vm12, %vm8108_vm15  ;;  %vm3128_vm15 = vcmask 257248  }
  0xd4   : > { %v1316_v60 = vsel %vm6644_vm1, %v1224_v32, %v1315_v14  ;;  %1373 = vst [vmem:[#allocation2 + $0x8] sm:$0x1] %v1372_v15  ;;  %3265 = vrot.lane.b32.xlu0 %v5565_v23, %s5899_s20  ;;  %v5505_v32 = vpack.c.bf16 %v2279_v1, %v2279_v1  ;;  %v2281_v14 = vld [vmem:[%s6003_s13 + $0x59] sm:$0x7f]  ;;  %v2756_v1 = vshll.u32 %v6504_v61, 16  ;;  %v5558_v63 = vpack.c.bf16 %v5162_v21, %v5162_v21 }
  0xd5   : > { %1317 = vst [vmem:[#allocation2 + $0x1c] sm:$0xf] %v1316_v60  ;;  %1816 = vrot.lane.b32.xlu1 %v6191_v24, %s5894_s16  ;;  %v2801_v15 = vshrl.u32 %v6721_v45, 16  ;;  %v2809_v60 = vshrl.u32 %v5537_v2, 16  ;;  %v1660_v21 = vshll.u32 %v6541_v56, 16 }
  0xd6   : > { %v1374_v8 = vld [vmem:[#allocation2 + $0x10] sm:$0x1]  ;;  %v1226_v30 = vpop.permute.xlu0 %1225 }
  0xd7   : > { %v1228_v38 = vpop.permute.xlu1 %1227  ;;  %v1375_v55 = vsel %vm6480_vm14, 0, %v1374_v8  ;;  %1318 = vst.msk [vmem:[#allocation2 + $0x20] sm:$0xf] %vm8107_vm9, %v1226_v30  ;;  %v1331_v8 = vld [vmem:[#allocation2 + $0x3c] sm:$0xf]  ;;  %v2811_v20 = vrot.slane %v2809_v60, 7 }
  0xd8   : > { %v1320_v24 = vsel %vm6644_vm1, %v1228_v38, %v1319_v25  ;;  %1376 = vst [vmem:[#allocation2 + $0x10] sm:$0x1] %v1375_v55  ;;  %1834 = vrot.lane.b32.xlu0 %v1687_v41, %s5894_s16  ;;  %v5539_v41 = vpack.c.bf16 %v5113_v22, %v5113_v22  ;;  %v5507_v55 = vpack.c.bf16 %v2281_v14, %v2281_v14  ;;  %v5171_v60 = vld [vmem:[%s6003_s13 + $0x58] sm:$0xff] }
  0xd9   : > { %1321 = vst [vmem:[#allocation2 + $0x24] sm:$0xf] %v1320_v24  ;;  %1820 = vrot.lane.b32.xlu1 %v6218_v10, %s5894_s16  ;;  %v6737_v24 = vpack.c.bf16 %v2278_v50, %v2278_v50  ;;  %v2758_v50 = vor.u32 %v2756_v1, %v6525_v47  ;;  %v5567_v47 = vpack.c.bf16 %v5171_v60, %v5171_v60 }
  0xda   : > { %v1377_v39 = vld [vmem:[#allocation2 + $0x18] sm:$0x1]  ;;  %v1230_v33 = vpop.permute.xlu0 %1229 }
  0xdb   : > { %v1232_v5 = vpop.permute.xlu1 %1231  ;;  %v1378_v10 = vsel %vm6480_vm14, 0, %v1377_v39  ;;  %1322 = vst.msk [vmem:[#allocation2 + $0x28] sm:$0xf] %vm8107_vm9, %v1230_v33  ;;  %v2812_v39 = vshll.u32 %v5537_v2, 16 }
  0xdc   : > { %v1324_v19 = vsel %vm6644_vm1, %v1232_v5, %v1323_v43  ;;  %1379 = vst [vmem:[#allocation2 + $0x18] sm:$0x1] %v1378_v10  ;;  %1838 = vrot.lane.b32.xlu0 %v1703_v27, %s5894_s16  ;;  %v6740_v27 = vrot.slane %v2801_v15, 7  ;;  %v2825_v5 = vshrl.u32 %v5539_v41, 16 }
  0xdd   : > { %1325 = vst [vmem:[#allocation2 + $0x2c] sm:$0xf] %v1324_v19  ;;  %2125 = vrot.lane.b32.xlu1 %v6697_v26, %s5896_s17 }
  0xde   : > { %v1380_v17 = vld [vmem:[#allocation2 + $0x20] sm:$0x1]  ;;  %v1234_v23 = vpop.permute.xlu0 %1233  ;;  %v2807_v2 = vrot.slane %v6740_v27, 4 }
  0xdf   : > { %v1236_v58 = vpop.permute.xlu1 %1235  ;;  %v1381_v28 = vsel %vm6480_vm14, 0, %v1380_v17  ;;  %1326 = vst.msk [vmem:[#allocation2 + $0x30] sm:$0xf] %vm8107_vm9, %v1234_v23  ;;  %v2814_v17 = vor.u32 %v2812_v39, %v2811_v20 }
  0xe0   : > { %v1328_v16 = vsel %vm6644_vm1, %v1236_v58, %v1327_v6  ;;  %1382 = vst [vmem:[#allocation2 + $0x20] sm:$0x1] %v1381_v28  ;;  %2107 = vrot.lane.b32.xlu0 %v6603_v49, %s5896_s17  ;;  %v2827_v58 = vrot.slane %v2825_v5, 7  ;;  %v2828_v6 = vshll.u32 %v5539_v41, 16  ;;  %v1339_v28 = vld [vmem:[#allocation2 + $0x4c] sm:$0xf] }
  0xe1   : > { %1329 = vst [vmem:[#allocation2 + $0x34] sm:$0xf] %v1328_v16  ;;  %2129 = vrot.lane.b32.xlu1 %v5483_v18, %s5896_s17  ;;  %v2815_v15 = vsel %vm6119_vm7, %v2807_v2, %v2814_v17  ;;  %v5781_v17 = vld [vmem:[%s8095_s1 + $0x10] ss:$0 sps:$4 sm:$0x33]  }
  0xe2   : > { %v1383_v9 = vld [vmem:[#allocation2 + $0x28] sm:$0x1]  ;;  %v1238_v38 = vpop.permute.xlu0 %1237  ;;  %v2830_v41 = vor.u32 %v2828_v6, %v2827_v58  ;;  %5726 = vmatprep.subr.msk.bf16.mxu0 %vm8106_vm3, %v5781_v17 }
  0xe3   : > { %v1240_v48 = vpop.permute.xlu1 %1239  ;;  %v1384_v25 = vsel %vm6480_vm14, 0, %v1383_v9  ;;  %1330 = vst.msk [vmem:[#allocation2 + $0x38] sm:$0xf] %vm8107_vm9, %v1238_v38 }
  0xe4   : > { %v1332_v30 = vsel %vm6644_vm1, %v1240_v48, %v1331_v8  ;;  %1385 = vst [vmem:[#allocation2 + $0x28] sm:$0x1] %v1384_v25  ;;  %2416 = vrot.lane.b32.xlu0 %v5505_v32, %s5897_s18  ;;  %v1343_v8 = vld [vmem:[#allocation2 + $0x54] sm:$0xf]  ;;  %v1437_v25 = vld [vmem:[%s6003_s13 + $0xa8] sm:$0x7f] }
  0xe5   : > { %1333 = vst [vmem:[#allocation2 + $0x3c] sm:$0xf] %v1332_v30  ;;  %2111 = vrot.lane.b32.xlu1 %v6721_v45, %s5896_s17  ;;  %v5453_v20 = vpack.c.bf16 %v1437_v25, %v1437_v25 }
  0xe6   : > { %v1386_v43 = vld [vmem:[#allocation2 + $0x30] sm:$0x1]  ;;  %v1242_v10 = vpop.permute.xlu0 %1241 }
  0xe7   : > { %v1244_v33 = vpop.permute.xlu1 %1243  ;;  %v1387_v19 = vsel %vm6480_vm14, 0, %v1386_v43  ;;  %1334 = vst.msk [vmem:[#allocation2 + $0x40] sm:$0xf] %vm8107_vm9, %v1242_v10  ;;  %v1347_v43 = vld [vmem:[#allocation2 + $0x5c] sm:$0xf] }
  0xe8   : > { %v1336_v18 = vsel %vm6644_vm1, %v1244_v33, %v1335_v35  ;;  %1388 = vst [vmem:[#allocation2 + $0x30] sm:$0x1] %v1387_v19  ;;  %2414 = vrot.lane.b32.xlu0 %v6737_v24, %s5897_s18  ;;  %v1713_v19 = vshrl.u32 %v5453_v20, 16 }
  0xe9   : > { %1337 = vst [vmem:[#allocation2 + $0x44] sm:$0xf] %v1336_v18  ;;  %2420 = vrot.lane.b32.xlu1 %v5507_v55, %s5897_s18  ;;  %v2831_v55 = vsel %vm6119_vm7, %v1647_v37, %v2830_v41  ;;  %v5223_v37 = vld [vmem:[%s6003_s13 + $0x19] sm:$0x7f] }
  0xea   : > { %v1389_v23 = vld [vmem:[#allocation2 + $0x38] sm:$0x1]  ;;  %v1246_v16 = vpop.permute.xlu0 %1245  ;;  %v5589_v6 = vpack.c.bf16 %v5223_v37, %v5223_v37  ;;  %v1898_v37 = vld [vmem:[#allocation2] sm:$0xf] }
  0xeb   : > { %v1248_v22 = vpop.permute.xlu1 %1247  ;;  %v1390_v32 = vsel %vm6480_vm14, 0, %v1389_v23  ;;  %1338 = vst.msk [vmem:[#allocation2 + $0x48] sm:$0xf] %vm8107_vm9, %v1246_v16  ;;  %v1439_v18 = vld [vmem:[%s6003_s13 + $0xb8] sm:$0x7f]  ;;  %v3879_v23 = vsel %vm8106_vm3, %v5781_v17, 0 }
  0xec   : > { %v1340_v14 = vsel %vm6644_vm1, %v1248_v22, %v1339_v28  ;;  %1391 = vst [vmem:[#allocation2 + $0x38] sm:$0x1] %v1390_v32  ;;  %2418 = vrot.lane.b32.xlu0 %v5506_v59, %s5897_s18  ;;  %v5225_v22 = vld [vmem:[%s6003_s13 + $0x29] sm:$0x7f]  ;;  %v5222_v28 = vld [vmem:[%s6003_s13 + $0x11] sm:$0xff]  ;;  %v1715_v16 = vrot.slane %v1713_v19, 7  ;;  %5655 = vmatpush3.bf16.msra.mxu0 %v3879_v23  ;;  %v1662_v19 = vor.u32 %v1660_v21, %v6561_v36 }
  0xed   : > { %1341 = vst [vmem:[#allocation2 + $0x4c] sm:$0xf] %v1340_v14  ;;  %2976 = vrot.lane.b32.xlu1 %v6412_v13, %s5898_s19  ;;  %v1716_v32 = vshll.u32 %v5453_v20, 16  ;;  %v5455_v14 = vpack.c.bf16 %v1439_v18, %v1439_v18  ;;  %v8133_v20 = vrot.slane %v6304_v29, 4  ;;  %v1984_v18 = vld [vmem:[%s6003_s13 + $0xa8] sm:$0xff]  ;;  %v8136_v23 = vrot.slane %v6325_v52, 4 }
  0xee   : > { %v1392_v9 = vld [vmem:[#allocation2 + $0x40] sm:$0x1]  ;;  %v1250_v38 = vpop.permute.xlu0 %1249  ;;  %v6852_v36 = vpack.c.bf16 %v1984_v18, %v1984_v18  ;;  %v2772_v18 = vshll.u32 %v6587_v11, 16  ;;  %vm2565_vm3 = vcmask 221376  }
  0xef   : > { %v1252_v48 = vpop.permute.xlu1 %1251  ;;  %v1393_v30 = vsel %vm6480_vm14, 0, %v1392_v9  ;;  %1342 = vst.msk [vmem:[#allocation2 + $0x50] sm:$0xf] %vm8107_vm9, %v1250_v38  ;;  %v5591_v9 = vpack.c.bf16 %v5225_v22, %v5225_v22  ;;  %v1729_v38 = vshrl.u32 %v5455_v14, 16 }
  0xf0   : > { %v1344_v13 = vsel %vm6644_vm1, %v1252_v48, %v1343_v8  ;;  %1394 = vst [vmem:[#allocation2 + $0x40] sm:$0x1] %v1393_v30  ;;  %2994 = vrot.lane.b32.xlu0 %v2815_v15, %s5898_s19  ;;  %v5588_v48 = vpack.c.bf16 %v5222_v28, %v5222_v28  ;;  %v1718_v8 = vor.u32 %v1716_v32, %v1715_v16  ;;  %v1986_v28 = vld [vmem:[%s6003_s13 + $0xb8] sm:$0xff]  ;;  %v1975_v16 = vld [vmem:[%s6003_s13 + $0x60] sm:$0xff]  ;;  %v5114_v32 = vld [vmem:[%s6003_s13 + $0x70] sm:$0xff] }
  0xf1   : > { %1345 = vst [vmem:[#allocation2 + $0x54] sm:$0xf] %v1344_v13  ;;  %2980 = vrot.lane.b32.xlu1 %v2758_v50, %s5898_s19  ;;  %v5487_v52 = vpack.c.bf16 %v1986_v28, %v1986_v28 }
  0xf2   : > { %v1395_v39 = vld [vmem:[#allocation2 + $0x48] sm:$0x1]  ;;  %v1254_v33 = vpop.permute.xlu0 %1253 }
  0xf3   : > { %v1256_v5 = vpop.permute.xlu1 %1255  ;;  %v1396_v35 = vsel %vm6480_vm14, 0, %v1395_v39  ;;  %1346 = vst.msk [vmem:[#allocation2 + $0x58] sm:$0xf] %vm8107_vm9, %v1254_v33  ;;  %v1719_v39 = vsel %vm6119_vm7, %v8133_v20, %v1718_v8  ;;  %v6873_v8 = vpack.c.bf16 %v5114_v32, %v5114_v32  ;;  %v2285_v20 = vld [vmem:[%s6003_s13 + $0x79] sm:$0x7f]  ;;  %v2774_v32 = vor.u32 %v2772_v18, %v6614_v31 }
  0xf4   : > { %v1348_v10 = vsel %vm6644_vm1, %v1256_v5, %v1347_v43  ;;  %1397 = vst [vmem:[#allocation2 + $0x48] sm:$0x1] %v1396_v35  ;;  %2998 = vrot.lane.b32.xlu0 %v2831_v55, %s5898_s19  ;;  %v1731_v5 = vrot.slane %v1729_v38, 7  ;;  %v1732_v43 = vshll.u32 %v5455_v14, 16 }
  0xf5   : > { %1349 = vst [vmem:[#allocation2 + $0x5c] sm:$0xf] %v1348_v10  ;;  %3269 = vrot.lane.b32.xlu1 %v5567_v47, %s5899_s20 }
  0xf6   : > { %v1398_v59 = vld [vmem:[#allocation2 + $0x50] sm:$0x1]  ;;  %v1258_v2 = vpop.permute.xlu0 %1257 }
  0xf7   : > { %v1803_v1 = vpop.permute.xlu1 %1802  ;;  %v1399_v58 = vsel %vm6480_vm14, 0, %v1398_v59  ;;  %1350 = vst.msk [vmem:[#allocation2 + $0x60] sm:$0xf] %vm8107_vm9, %v1258_v2  ;;  %v1734_v59 = vor.u32 %v1732_v43, %v1731_v5  ;;  %v2833_v5 = vshrl.u32 %v6873_v8, 16  ;;  %vm6928_vm9 = vmand %vm2565_vm3, %vm290_vm0  ;;  %vm3374_vm0 = vcmask 290051  }
  0xf8   : > { %1902 = vst.msk [vmem:[#allocation2 + $0x4] sm:$0xf] %vm8111_vm2, %v1803_v1  ;;  %1400 = vst [vmem:[#allocation2 + $0x50] sm:$0x1] %v1399_v58  ;;  %3251 = vrot.lane.b32.xlu0 %v5558_v63, %s5899_s20 }
  0xf9   : > { %3273 = vrot.lane.b32.xlu1 %v6585_v44, %s5899_s20  ;;  %v5782_v44 = vld [vmem:[%s8095_s1 + $0x8] sm:$0xff]   ;;  %v1735_v22 = vsel %vm6119_vm7, %v8136_v23, %v1734_v59  ;;  %v2284_v59 = vld [vmem:[%s6003_s13 + $0x71] sm:$0xff]  ;;  %vm6954_vm3 = vmand %vm3374_vm0, %vm1043_vm11  ;;  %vm8145_vm0 = vsmask.f32 3328 }
  0xfa   : > { %v1401_v50 = vld [vmem:[#allocation2 + $0x58] sm:$0x1]  ;;  %v1807_v60 = vpop.permute.xlu0 %1806  ;;  %5656 = vmatprep.subr.bf16.mxu0 %v5782_v44  ;;  %vm7128_vm11 = vmand %vm8109_vm6, %vm734_vm4  ;;  %vm8112_vm4 = vcmask 290048  }
  0xfb   : > { %v2094_v15 = vpop.permute.xlu1 %2093  ;;  %v1402_v41 = vsel %vm6480_vm14, 0, %v1401_v50  ;;  %1906 = vst.msk [vmem:[#allocation2 + $0xc] sm:$0xf] %vm8111_vm2, %v1807_v60  ;;  %5657 = vmatpush3.bf16.msra.mxu0 %v5782_v44  ;;  %v5115_v44 = vld [vmem:[%s6003_s13 + $0x78] sm:$0x7f] }
  0xfc   : > { %2189 = vst.msk [vmem:[#allocation2 + $0x4] sm:$0xf] %vm2187_vm5, %v2094_v15  ;;  %1403 = vst [vmem:[#allocation2 + $0x58] sm:$0x1] %v1402_v41  ;;  %3546 = vrot.lane.b32.xlu0 %v5589_v6, %s5900_s11  ;;  %v1903_v15 = vld [vmem:[#allocation2 + $0x8] sm:$0xf]  ;;  %v5541_v38 = vpack.c.bf16 %v5115_v44, %v5115_v44 }
  0xfd   : > { %3255 = vrot.lane.b32.xlu1 %v6504_v61, %s5899_s20  ;;  %v5784_v61 = vld [vmem:[%s8095_s1] sm:$0xff]  }
  0xfe   : > { %v1404_v25 = vld [vmem:[#allocation2 + $0x60] sm:$0x1]  ;;  %v2098_v13 = vpop.permute.xlu0 %2097  ;;  %5658 = vmatprep.subr.bf16.mxu0 %v5784_v61  ;;  %v2841_v43 = vshrl.u32 %v5541_v38, 16 }
  0xff   : > { %v1811_v30 = vpop.permute.xlu1 %1810  ;;  %v1405_v47 = vsel %vm6480_vm14, 0, %v1404_v25  ;;  %2191 = vst.msk [vmem:[#allocation2 + $0xc] sm:$0xf] %vm2187_vm5, %v2098_v13  ;;  %5659 = vmatpush3.bf16.msra.mxu0 %v5784_v61 }
 0x100   : > { %1910 = vst.msk [vmem:[#allocation2 + $0x14] sm:$0xf] %vm8111_vm2, %v1811_v30  ;;  %1406 = vst [vmem:[#allocation2 + $0x60] sm:$0x1] %v1405_v47  ;;  %3544 = vrot.lane.b32.xlu0 %v5588_v48, %s5900_s11  ;;  %v2283_v48 = vld [vmem:[%s6003_s13 + $0x69] sm:$0x7f] }
 0x101   : > { %3550 = vrot.lane.b32.xlu1 %v5591_v9, %s5900_s11  ;;  %v6870_v9 = vpack.c.bf16 %v1975_v16, %v1975_v16  ;;  %v5117_v47 = vld [vmem:[%s6003_s13 + $0x88] sm:$0x7f]  ;;  %v5509_v21 = vpack.c.bf16 %v2283_v48, %v2283_v48 }
 0x102   : > { %v1815_v10 = vpop.permute.xlu0 %1814 }
 0x103   : > { %v2222_v33 = vld [vmem:[#allocation2 + $0x4] sm:$0x8]  ;;  %v2102_v35 = vpop.permute.xlu1 %2101  ;;  %1914 = vst.msk [vmem:[#allocation2 + $0x1c] sm:$0xf] %vm8111_vm2, %v1815_v10 }
 0x104   : > { %v2223_v63 = vsel %vm6818_vm8, 0, %v2222_v33  ;;  %2193 = vst.msk [vmem:[#allocation2 + $0x14] sm:$0xf] %vm2187_vm5, %v2102_v35  ;;  %1824 = vrot.lane.b32.xlu0 %v6439_v3, %s5894_s16  ;;  %v5543_v33 = vpack.c.bf16 %v5117_v47, %v5117_v47  ;;  %v5175_v47 = vld [vmem:[%s6003_s13 + $0x78] sm:$0xff] }
 0x105   : > { %2224 = vst [vmem:[#allocation2 + $0x4] sm:$0x8] %v2223_v63  ;;  %1842 = vrot.lane.b32.xlu1 %v1719_v39, %s5894_s16  ;;  %v2282_v39 = vld [vmem:[%s6003_s13 + $0x61] sm:$0xff] }
 0x106   : > { %v2225_v1 = vld [vmem:[#allocation2 + $0xc] sm:$0x8]  ;;  %v2106_v17 = vpop.permute.xlu0 %2105 }
 0x107   : > { %v1801_v2 = vpop.permute.xlu1 %1800  ;;  %v2226_v58 = vsel %vm6818_vm8, 0, %v2225_v1  ;;  %2195 = vst.msk [vmem:[#allocation2 + $0x1c] sm:$0xf] %vm2187_vm5, %v2106_v17  ;;  %v6901_v1 = vrot.slane %v2833_v5, 7  ;;  %v2844_v17 = vshll.u32 %v5541_v38, 16 }
 0x108   : > { %v1899_v6 = vsel %vm6838_vm10, %v1801_v2, %v1898_v37  ;;  %2227 = vst [vmem:[#allocation2 + $0xc] sm:$0x8] %v2226_v58  ;;  %3548 = vrot.lane.b32.xlu0 %v6623_v53, %s5900_s11  ;;  %v5511_v37 = vpack.c.bf16 %v2285_v20, %v2285_v20  ;;  %v2843_v2 = vrot.slane %v2841_v43, 7  ;;  %v2857_v58 = vshrl.u32 %v5543_v33, 16  ;;  %v1116_v43 = vld [vmem:[%s6003_s13 + $0xb9] sm:$0x7f] }
 0x109   : > { %1900 = vst [vmem:[#allocation2] sm:$0xf] %v1899_v6  ;;  %1828 = vrot.lane.b32.xlu1 %v1662_v19, %s5894_s16  ;;  %v6897_v19 = vpack.c.bf16 %v2282_v39, %v2282_v39  ;;  %v5425_v18 = vpack.c.bf16 %v1116_v43, %v1116_v43 }
 0x10a   : > { %v1819_v60 = vpop.permute.xlu0 %1818  ;;  %v2859_v44 = vrot.slane %v2857_v58, 7  ;;  %v1907_v58 = vld [vmem:[#allocation2 + $0x10] sm:$0xf] }
 0x10b   : > { %v2228_v14 = vld [vmem:[#allocation2 + $0x14] sm:$0x8]  ;;  %v1805_v50 = vpop.permute.xlu1 %1804  ;;  %1918 = vst.msk [vmem:[#allocation2 + $0x24] sm:$0xf] %vm8111_vm2, %v1819_v60  ;;  %v2846_v60 = vor.u32 %v2844_v17, %v2843_v2 }
 0x10c   : > { %v2229_v53 = vsel %vm6818_vm8, 0, %v2228_v14  ;;  %v1904_v41 = vsel %vm6838_vm10, %v1805_v50, %v1903_v15  ;;  %1846 = vrot.lane.b32.xlu0 %v1735_v22, %s5894_s16  ;;  %v2498_v23 = vld [vmem:[#allocation2 + $0x4] sm:$0xf]  ;;  %v5510_v14 = vpack.c.bf16 %v2284_v59, %v2284_v59  ;;  %v2788_v50 = vshll.u32 %v6603_v49, 16 }
 0x10d   : > { %2230 = vst [vmem:[#allocation2 + $0x14] sm:$0x8] %v2229_v53  ;;  %1905 = vst [vmem:[#allocation2 + $0x8] sm:$0xf] %v1904_v41  ;;  %2133 = vrot.lane.b32.xlu1 %v6852_v36, %s5896_s17  ;;  %v2839_v15 = vrot.slane %v6901_v1, 4  ;;  %v2860_v53 = vshll.u32 %v5543_v33, 16 }
 0x10e   : > { %v2231_v25 = vld [vmem:[#allocation2 + $0x1c] sm:$0x8]  ;;  %v1823_v13 = vpop.permute.xlu0 %1822  ;;  %v2790_v31 = vor.u32 %v2788_v50, %v6630_v54  ;;  %v5571_v54 = vpack.c.bf16 %v5175_v47, %v5175_v47  ;;  %v1440_v59 = vld [vmem:[%s6003_s13 + $0xc0] sm:$0xff] }
 0x10f   : > { %v2110_v30 = vpop.permute.xlu1 %2109  ;;  %v2232_v61 = vsel %vm6818_vm8, 0, %v2231_v25  ;;  %1922 = vst.msk [vmem:[#allocation2 + $0x2c] sm:$0xf] %vm8111_vm2, %v1823_v13  ;;  %v2502_v48 = vld [vmem:[#allocation2 + $0xc] sm:$0xf]  ;;  %v2847_v13 = vsel %vm6119_vm7, %v2839_v15, %v2846_v60  ;;  %v1442_v15 = vld [vmem:[%s6003_s13 + $0xd0] sm:$0xff] }
 0x110   : > { %2197 = vst.msk [vmem:[#allocation2 + $0x24] sm:$0xf] %vm2187_vm5, %v2110_v30  ;;  %2233 = vst [vmem:[#allocation2 + $0x1c] sm:$0x8] %v2232_v61  ;;  %2115 = vrot.lane.b32.xlu0 %v6870_v9, %s5896_s17  ;;  %v2862_v61 = vor.u32 %v2860_v53, %v2859_v44  ;;  %v1911_v53 = vld [vmem:[#allocation2 + $0x18] sm:$0xf] }
 0x111   : > { %2137 = vrot.lane.b32.xlu1 %v5487_v52, %s5896_s17 }
 0x112   : > { %v2092_v10 = vpop.permute.xlu0 %2091  ;;  %v2863_v5 = vsel %vm6119_vm7, %v1679_v7, %v2862_v61  ;;  %v5227_v7 = vld [vmem:[%s6003_s13 + $0x39] sm:$0x7f] }
 0x113   : > { %v2114_v35 = vpop.permute.xlu1 %2113  ;;  %2188 = vst.msk [vmem:[#allocation2] sm:$0xf] %vm2187_vm5, %v2092_v10 }
 0x114   : > { %2199 = vst.msk [vmem:[#allocation2 + $0x2c] sm:$0xf] %vm2187_vm5, %v2114_v35  ;;  %2424 = vrot.lane.b32.xlu0 %v5509_v21, %s5897_s18 }
 0x115   : > { %2119 = vrot.lane.b32.xlu1 %v6541_v56, %s5896_s17 }
 0x116   : > { %v2401_v22 = vpop.permute.xlu0 %2400 }
 0x117   : > { %v2234_v56 = vld [vmem:[#allocation2 + $0x24] sm:$0x8]  ;;  %v2096_v6 = vpop.permute.xlu1 %2095  ;;  %v2499_v16 = vsel %vm6893_vm13, %v2401_v22, %v2498_v23 }
 0x118   : > { %v2235_v28 = vsel %vm6818_vm8, 0, %v2234_v56  ;;  %2190 = vst.msk [vmem:[#allocation2 + $0x8] sm:$0xf] %vm2187_vm5, %v2096_v6  ;;  %2500 = vst [vmem:[#allocation2 + $0x4] sm:$0xf] %v2499_v16  ;;  %2422 = vrot.lane.b32.xlu0 %v6897_v19, %s5897_s18  ;;  %v5593_v16 = vpack.c.bf16 %v5227_v7, %v5227_v7 }
 0x119   : > { %2236 = vst [vmem:[#allocation2 + $0x24] sm:$0x8] %v2235_v28  ;;  %2428 = vrot.lane.b32.xlu1 %v5511_v37, %s5897_s18  ;;  %v1441_v6 = vld [vmem:[%s6003_s13 + $0xc8] sm:$0x7f] }
 0x11a   : > { %v2399_v38 = vpop.permute.xlu0 %2398  ;;  %v5457_v50 = vpack.c.bf16 %v1441_v6, %v1441_v6 }
 0x11b   : > { %v2237_v41 = vld [vmem:[#allocation2 + $0x2c] sm:$0x8]  ;;  %v2405_v52 = vpop.permute.xlu1 %2404  ;;  %2495 = vst.msk [vmem:[#allocation2] sm:$0xf] %vm8110_vm12, %v2399_v38 }
 0x11c   : > { %v2238_v25 = vsel %vm6818_vm8, 0, %v2237_v41  ;;  %v2503_v30 = vsel %vm6893_vm13, %v2405_v52, %v2502_v48  ;;  %2426 = vrot.lane.b32.xlu0 %v5510_v14, %s5897_s18  ;;  %v1118_v14 = vld [vmem:[%s6003_s13 + $0xc9] sm:$0x7f]  ;;  %v1443_v52 = vld [vmem:[%s6003_s13 + $0xd8] sm:$0x7f] }
 0x11d   : > { %2239 = vst [vmem:[#allocation2 + $0x2c] sm:$0x8] %v2238_v25  ;;  %2504 = vst [vmem:[#allocation2 + $0xc] sm:$0xf] %v2503_v30  ;;  %2984 = vrot.lane.b32.xlu1 %v2774_v32, %s5898_s19  ;;  %v6961_v32 = vpack.c.bf16 %v1440_v59, %v1440_v59  ;;  %v5427_v38 = vpack.c.bf16 %v1118_v14, %v1118_v14  ;;  %v5229_v30 = vld [vmem:[%s6003_s13 + $0x49] sm:$0x7f]  ;;  %v5459_v47 = vpack.c.bf16 %v1443_v52, %v1443_v52 }
 0x11e   : > { %v2403_v20 = vpop.permute.xlu0 %2402  ;;  %v2510_v52 = vld [vmem:[#allocation2 + $0x1c] sm:$0xf] }
 0x11f   : > { %v2979_v21 = vpop.permute.xlu1 %2978  ;;  %2501 = vst.msk [vmem:[#allocation2 + $0x8] sm:$0xf] %vm8110_vm12, %v2403_v20  ;;  %v1737_v25 = vshrl.u32 %v6961_v32, 16 }
 0x120   : > { %3071 = vst.msk [vmem:[#allocation2 + $0x4] sm:$0xf] %vm8109_vm6, %v2979_v21  ;;  %3002 = vrot.lane.b32.xlu0 %v2847_v13, %s5898_s19  ;;  %v6976_v13 = vpack.c.bf16 %v1442_v15, %v1442_v15 }
 0x121   : > { %2988 = vrot.lane.b32.xlu1 %v2790_v31, %s5898_s19  ;;  %v1745_v31 = vshrl.u32 %v5457_v50, 16  ;;  %v6986_v43 = vrot.slane %v1737_v25, 7 }
 0x122   : > { %v2567_v33 = vld [vmem:[#allocation2] sm:$0x1]  ;;  %v2983_v10 = vpop.permute.xlu0 %2982 }
 0x123   : > { %v3254_v35 = vpop.permute.xlu1 %3253  ;;  %v2568_v37 = vsel %vm6928_vm9, 0, %v2567_v33  ;;  %3075 = vst.msk [vmem:[#allocation2 + $0xc] sm:$0xf] %vm8109_vm6, %v2983_v10  ;;  %v1117_v33 = vld [vmem:[%s6003_s13 + $0xc1] sm:$0xff]  ;;  %v1748_v10 = vshll.u32 %v5457_v50, 16 }
 0x124   : > { %3342 = vst.msk [vmem:[#allocation2 + $0x4] sm:$0xf] %vm3128_vm15, %v3254_v35  ;;  %2569 = vst [vmem:[#allocation2] sm:$0x1] %v2568_v37  ;;  %3006 = vrot.lane.b32.xlu0 %v2863_v5, %s5898_s19  ;;  %v1676_v5 = vshll.u32 %v6632_v42, 16  ;;  %v1747_v35 = vrot.slane %v1745_v31, 7 }
 0x125   : > { %3277 = vrot.lane.b32.xlu1 %v5571_v54, %s5899_s20  ;;  %v1753_v37 = vshrl.u32 %v6976_v13, 16  ;;  %v2506_v50 = vld [vmem:[#allocation2 + $0x14] sm:$0xf] }
 0x126   : > { %v2570_v2 = vld [vmem:[#allocation2 + $0x8] sm:$0x1]  ;;  %v3258_v56 = vpop.permute.xlu0 %3257  ;;  %v1981_v31 = vld [vmem:[%s6003_s13 + $0x90] sm:$0xff] }
 0x127   : > { %v1809_v17 = vpop.permute.xlu1 %1808  ;;  %v2571_v23 = vsel %vm6928_vm9, 0, %v2570_v2  ;;  %3344 = vst.msk [vmem:[#allocation2 + $0xc] sm:$0xf] %vm3128_vm15, %v3258_v56  ;;  %v6998_v2 = vpack.c.bf16 %v1117_v33, %v1117_v33  ;;  %v7001_v56 = vrot.slane %v1753_v37, 7  ;;  %v5120_v37 = vld [vmem:[%s6003_s13 + $0xa0] sm:$0xff] }
 0x128   : > { %v1908_v22 = vsel %vm6838_vm10, %v1809_v17, %v1907_v58  ;;  %2572 = vst [vmem:[#allocation2 + $0x8] sm:$0x1] %v2571_v23  ;;  %1259 = vrot.lane.b32.xlu0 %v5425_v18, %s5893_s15  ;;  %v1761_v18 = vshrl.u32 %v5459_v47, 16  ;;  %v1743_v17 = vrot.slane %v6986_v43, 4  ;;  %v1750_v58 = vor.u32 %v1748_v10, %v1747_v35 }
 0x129   : > { %1909 = vst [vmem:[#allocation2 + $0x10] sm:$0xf] %v1908_v22  ;;  %3259 = vrot.lane.b32.xlu1 %v6587_v11, %s5899_s20  ;;  %v1764_v23 = vshll.u32 %v5459_v47, 16 }
 0x12a   : > { %v1827_v41 = vpop.permute.xlu0 %1826  ;;  %v1763_v6 = vrot.slane %v1761_v18, 7  ;;  %v5121_v18 = vld [vmem:[%s6003_s13 + $0xa8] sm:$0x7f] }
 0x12b   : > { %v3376_v60 = vld [vmem:[#allocation2 + $0x4] sm:$0x8]  ;;  %v1813_v44 = vpop.permute.xlu1 %1812  ;;  %1926 = vst.msk [vmem:[#allocation2 + $0x34] sm:$0xf] %vm8111_vm2, %v1827_v41 }
 0x12c   : > { %v3377_v48 = vsel %vm6954_vm3, 0, %v3376_v60  ;;  %v1912_v11 = vsel %vm6838_vm10, %v1813_v44, %v1911_v53  ;;  %3281 = vrot.lane.b32.xlu0 %v6697_v26, %s5899_s20  ;;  %v5595_v26 = vpack.c.bf16 %v5229_v30, %v5229_v30  ;;  %v1759_v60 = vrot.slane %v7001_v56, 4  ;;  %v1988_v30 = vld [vmem:[%s6003_s13 + $0xc8] sm:$0xff] }
 0x12d   : > { %3378 = vst [vmem:[#allocation2 + $0x4] sm:$0x8] %v3377_v48  ;;  %1913 = vst [vmem:[#allocation2 + $0x18] sm:$0xf] %v1912_v11  ;;  %3554 = vrot.lane.b32.xlu1 %v5593_v16, %s5900_s11  ;;  %v1766_v44 = vor.u32 %v1764_v23, %v1763_v6  ;;  %v2286_v6 = vld [vmem:[%s6003_s13 + $0x81] sm:$0xff] }
 0x12e   : > { %v3379_v61 = vld [vmem:[#allocation2 + $0xc] sm:$0x8]  ;;  %v1831_v20 = vpop.permute.xlu0 %1830 }
 0x12f   : > { %v2118_v21 = vpop.permute.xlu1 %2117  ;;  %v3380_v54 = vsel %vm6954_vm3, 0, %v3379_v61  ;;  %1930 = vst.msk [vmem:[#allocation2 + $0x3c] sm:$0xf] %vm8111_vm2, %v1831_v20  ;;  %v1767_v25 = vsel %vm6119_vm7, %v1759_v60, %v1766_v44  ;;  %v7039_v20 = vpack.c.bf16 %v1981_v31, %v1981_v31  ;;  %v7067_v44 = vpack.c.bf16 %v2286_v6, %v2286_v6 }
 0x130   : > { %2201 = vst.msk [vmem:[#allocation2 + $0x34] sm:$0xf] %vm2187_vm5, %v2118_v21  ;;  %3381 = vst [vmem:[#allocation2 + $0xc] sm:$0x8] %v3380_v54  ;;  %1263 = vrot.lane.b32.xlu0 %v5427_v38, %s5893_s15  ;;  %v5119_v21 = vld [vmem:[%s6003_s13 + $0x98] sm:$0x7f] }
 0x131   : > { %3263 = vrot.lane.b32.xlu1 %v6603_v49, %s5899_s20  ;;  %v6996_v49 = vor.u32 %v1676_v5, %v6666_v34  ;;  %v1751_v34 = vsel %vm6119_vm7, %v1743_v17, %v1750_v58  ;;  %v2287_v54 = vld [vmem:[%s6003_s13 + $0x89] sm:$0x7f]  ;;  %v5545_v5 = vpack.c.bf16 %v5119_v21, %v5119_v21  ;;  %v2865_v58 = vshrl.u32 %v7039_v20, 16 }
 0x132   : > { %v2100_v59 = vpop.permute.xlu0 %2099 }
 0x133   : > { %v2122_v7 = vpop.permute.xlu1 %2121  ;;  %2192 = vst.msk [vmem:[#allocation2 + $0x10] sm:$0xf] %vm2187_vm5, %v2100_v59  ;;  %v2873_v23 = vshrl.u32 %v5545_v5, 16 }
 0x134   : > { %2203 = vst.msk [vmem:[#allocation2 + $0x3c] sm:$0xf] %vm2187_vm5, %v2122_v7  ;;  %3552 = vrot.lane.b32.xlu0 %v6650_v0, %s5900_s11 }
 0x135   : > { %3558 = vrot.lane.b32.xlu1 %v5595_v26, %s5900_s11  ;;  %v1990_v26 = vld [vmem:[%s6003_s13 + $0xd8] sm:$0xff] }
 0x136   : > { %v2409_v14 = vpop.permute.xlu0 %2408  ;;  %v7053_v59 = vpack.c.bf16 %v1990_v26, %v1990_v26 }
 0x137   : > { %v2240_v22 = vld [vmem:[#allocation2 + $0x34] sm:$0x8]  ;;  %v2104_v16 = vpop.permute.xlu1 %2103  ;;  %v2507_v0 = vsel %vm6893_vm13, %v2409_v14, %v2506_v50 }
 0x138   : > { %v2241_v15 = vsel %vm6818_vm8, 0, %v2240_v22  ;;  %2194 = vst.msk [vmem:[#allocation2 + $0x18] sm:$0xf] %vm2187_vm5, %v2104_v16  ;;  %2508 = vst [vmem:[#allocation2 + $0x14] sm:$0xf] %v2507_v0  ;;  %1261 = vrot.lane.b32.xlu0 %v6998_v2, %s5893_s15  ;;  %v7057_v22 = vpack.c.bf16 %v5120_v37, %v5120_v37  ;;  %v5547_v16 = vpack.c.bf16 %v5121_v18, %v5121_v18 }
 0x139   : > { %2242 = vst [vmem:[#allocation2 + $0x34] sm:$0x8] %v2241_v15  ;;  %1832 = vrot.lane.b32.xlu1 %v6996_v49, %s5894_s16  ;;  %v1915_v15 = vld [vmem:[#allocation2 + $0x20] sm:$0xf] }
 0x13a   : > { %v2407_v48 = vpop.permute.xlu0 %2406 }
 0x13b   : > { %v2243_v53 = vld [vmem:[#allocation2 + $0x3c] sm:$0x8]  ;;  %v2413_v41 = vpop.permute.xlu1 %2412  ;;  %2505 = vst.msk [vmem:[#allocation2 + $0x10] sm:$0xf] %vm8110_vm12, %v2407_v48  ;;  %v2875_v48 = vrot.slane %v2873_v23, 7 }
 0x13c   : > { %v2244_v11 = vsel %vm6818_vm8, 0, %v2243_v53  ;;  %v2511_v38 = vsel %vm6893_vm13, %v2413_v41, %v2510_v52  ;;  %1850 = vrot.lane.b32.xlu0 %v1751_v34, %s5894_s16  ;;  %v2288_v53 = vld [vmem:[%s6003_s13 + $0x91] sm:$0xff]  ;;  %v7070_v41 = vrot.slane %v2865_v58, 7  ;;  %v2289_v52 = vld [vmem:[%s6003_s13 + $0x99] sm:$0x7f] }
 0x13d   : > { %2245 = vst [vmem:[#allocation2 + $0x3c] sm:$0x8] %v2244_v11  ;;  %2512 = vst [vmem:[#allocation2 + $0x1c] sm:$0xf] %v2511_v38  ;;  %3556 = vrot.lane.b32.xlu1 %v6737_v24, %s5900_s11  ;;  %v7037_v24 = vpack.c.bf16 %v1988_v30, %v1988_v30  ;;  %v2876_v11 = vshll.u32 %v5545_v5, 16  ;;  %v2881_v38 = vshrl.u32 %v7057_v22, 16  ;;  %v7083_v26 = vpack.c.bf16 %v2288_v53, %v2288_v53 }
 0x13e   : > { %v2411_v61 = vpop.permute.xlu0 %2410  ;;  %v5515_v5 = vpack.c.bf16 %v2289_v52, %v2289_v52 }
 0x13f   : > { %v2987_v47 = vpop.permute.xlu1 %2986  ;;  %2509 = vst.msk [vmem:[#allocation2 + $0x18] sm:$0xf] %vm8110_vm12, %v2411_v61  ;;  %v7087_v37 = vrot.slane %v2881_v38, 7 }
 0x140   : > { %3079 = vst.msk [vmem:[#allocation2 + $0x14] sm:$0xf] %vm8109_vm6, %v2987_v47  ;;  %1836 = vrot.lane.b32.xlu0 %v6287_v40, %s5894_s16  ;;  %v5513_v40 = vpack.c.bf16 %v2287_v54, %v2287_v54  ;;  %v1919_v47 = vld [vmem:[#allocation2 + $0x28] sm:$0xf] }
 0x141   : > { %1854 = vrot.lane.b32.xlu1 %v1767_v25, %s5894_s16  ;;  %v2889_v25 = vshrl.u32 %v5547_v16, 16 }
 0x142   : > { %v2573_v33 = vld [vmem:[#allocation2 + $0x10] sm:$0x1]  ;;  %v2991_v10 = vpop.permute.xlu0 %2990 }
 0x143   : > { %v3262_v35 = vpop.permute.xlu1 %3261  ;;  %v2574_v7 = vsel %vm6928_vm9, 0, %v2573_v33  ;;  %3083 = vst.msk [vmem:[#allocation2 + $0x1c] sm:$0xf] %vm8109_vm6, %v2991_v10  ;;  %v2871_v33 = vrot.slane %v7070_v41, 4  ;;  %v2878_v10 = vor.u32 %v2876_v11, %v2875_v48  ;;  %v2891_v18 = vrot.slane %v2889_v25, 7 }
 0x144   : > { %3346 = vst.msk [vmem:[#allocation2 + $0x14] sm:$0xf] %vm3128_vm15, %v3262_v35  ;;  %2575 = vst [vmem:[#allocation2 + $0x10] sm:$0x1] %v2574_v7  ;;  %2141 = vrot.lane.b32.xlu0 %v7037_v24, %s5896_s17  ;;  %v2804_v35 = vshll.u32 %v6721_v45, 16  ;;  %v2892_v7 = vshll.u32 %v5547_v16, 16 }
 0x145   : > { %2123 = vrot.lane.b32.xlu1 %v6632_v42, %s5896_s17  ;;  %v2879_v16 = vsel %vm6119_vm7, %v2871_v33, %v2878_v10  ;;  %v2514_v11 = vld [vmem:[#allocation2 + $0x24] sm:$0xf] }
 0x146   : > { %v2576_v14 = vld [vmem:[#allocation2 + $0x18] sm:$0x1]  ;;  %v3266_v0 = vpop.permute.xlu0 %3265  ;;  %v2806_v45 = vor.u32 %v2804_v35, %v6740_v27  ;;  %v1120_v27 = vld [vmem:[%s6003_s13 + $0xd9] sm:$0x7f]  ;;  %v1445_v35 = vld [vmem:[%s6003_s13 + $0xe8] sm:$0x7f] }
 0x147   : > { %v1817_v50 = vpop.permute.xlu1 %1816  ;;  %v2577_v42 = vsel %vm6928_vm9, 0, %v2576_v14  ;;  %3348 = vst.msk [vmem:[#allocation2 + $0x1c] sm:$0xf] %vm3128_vm15, %v3266_v0  ;;  %v2887_v14 = vrot.slane %v7087_v37, 4 }
 0x148   : > { %v1916_v34 = vsel %vm6838_vm10, %v1817_v50, %v1915_v15  ;;  %2578 = vst [vmem:[#allocation2 + $0x18] sm:$0x1] %v2577_v42  ;;  %2145 = vrot.lane.b32.xlu0 %v7053_v59, %s5896_s17  ;;  %v2894_v50 = vor.u32 %v2892_v7, %v2891_v18 }
 0x149   : > { %1917 = vst [vmem:[#allocation2 + $0x20] sm:$0xf] %v1916_v34  ;;  %2432 = vrot.lane.b32.xlu1 %v5513_v40, %s5897_s18  ;;  %v5179_v34 = vld [vmem:[%s6003_s13 + $0x98] sm:$0xff] }
 0x14a   : > { %v1835_v61 = vpop.permute.xlu0 %1834  ;;  %v2895_v42 = vsel %vm6119_vm7, %v2887_v14, %v2894_v50 }
 0x14b   : > { %v3382_v30 = vld [vmem:[#allocation2 + $0x14] sm:$0x8]  ;;  %v1821_v31 = vpop.permute.xlu1 %1820  ;;  %1934 = vst.msk [vmem:[#allocation2 + $0x44] sm:$0xf] %vm8111_vm2, %v1835_v61  ;;  %v1444_v61 = vld [vmem:[%s6003_s13 + $0xe0] sm:$0xff] }
 0x14c   : > { %v3383_v21 = vsel %vm6954_vm3, 0, %v3382_v30  ;;  %v1920_v54 = vsel %vm6838_vm10, %v1821_v31, %v1919_v47  ;;  %2127 = vrot.lane.b32.xlu0 %v7039_v20, %s5896_s17  ;;  %v5429_v30 = vpack.c.bf16 %v1120_v27, %v1120_v27  ;;  %v5575_v31 = vpack.c.bf16 %v5179_v34, %v5179_v34  ;;  %v5170_v47 = vld [vmem:[%s6003_s13 + $0x50] sm:$0xff] }
 0x14d   : > { %3384 = vst [vmem:[#allocation2 + $0x14] sm:$0x8] %v3383_v21  ;;  %1921 = vst [vmem:[#allocation2 + $0x28] sm:$0xf] %v1920_v54  ;;  %2430 = vrot.lane.b32.xlu1 %v7067_v44, %s5897_s18  ;;  %v5566_v7 = vpack.c.bf16 %v5170_v47, %v5170_v47 }
 0x14e   : > { %v3385_v40 = vld [vmem:[#allocation2 + $0x1c] sm:$0x8]  ;;  %v1839_v6 = vpop.permute.xlu0 %1838 }
 0x14f   : > { %v2126_v58 = vpop.permute.xlu1 %2125  ;;  %v3386_v23 = vsel %vm6954_vm3, 0, %v3385_v40  ;;  %1938 = vst.msk [vmem:[#allocation2 + $0x4c] sm:$0xf] %vm8111_vm2, %v1839_v6  ;;  %v1119_v40 = vld [vmem:[%s6003_s13 + $0xd1] sm:$0xff]  ;;  %v7134_v6 = vpack.c.bf16 %v1444_v61, %v1444_v61 }
 0x150   : > { %2205 = vst.msk [vmem:[#allocation2 + $0x44] sm:$0xf] %vm2187_vm5, %v2126_v58  ;;  %3387 = vst [vmem:[#allocation2 + $0x1c] sm:$0x8] %v3386_v23  ;;  %2436 = vrot.lane.b32.xlu0 %v5515_v5, %s5897_s18  ;;  %v2518_v5 = vld [vmem:[#allocation2 + $0x2c] sm:$0xf]  ;;  %v5461_v23 = vpack.c.bf16 %v1445_v35, %v1445_v35 }
 0x151   : > { %2434 = vrot.lane.b32.xlu1 %v7083_v26, %s5897_s18  ;;  %v5231_v58 = vld [vmem:[%s6003_s13 + $0x59] sm:$0x7f]  ;;  %v1769_v27 = vshrl.u32 %v7134_v6, 16 }
 0x152   : > { %v2108_v0 = vpop.permute.xlu0 %2107  ;;  %v1777_v34 = vshrl.u32 %v5461_v23, 16  ;;  %v1780_v61 = vshll.u32 %v5461_v23, 16  ;;  %v1992_v23 = vld [vmem:[%s6003_s13 + $0xe8] sm:$0xff] }
 0x153   : > { %v2130_v15 = vpop.permute.xlu1 %2129  ;;  %2196 = vst.msk [vmem:[#allocation2 + $0x20] sm:$0xf] %vm2187_vm5, %v2108_v0  ;;  %v5597_v0 = vpack.c.bf16 %v5231_v58, %v5231_v58 }
 0x154   : > { %2207 = vst.msk [vmem:[#allocation2 + $0x4c] sm:$0xf] %vm2187_vm5, %v2130_v15  ;;  %2992 = vrot.lane.b32.xlu0 %v2806_v45, %s5898_s19  ;;  %v7142_v15 = vpack.c.bf16 %v1119_v40, %v1119_v40  ;;  %v1779_v47 = vrot.slane %v1777_v34, 7  ;;  %v7191_v34 = vpack.c.bf16 %v1992_v23, %v1992_v23  ;;  %v2293_v23 = vld [vmem:[%s6003_s13 + $0xb9] sm:$0x7f] }
 0x155   : > { %3010 = vrot.lane.b32.xlu1 %v2879_v16, %s5898_s19  ;;  %v3068_v16 = vld [vmem:[#allocation2] sm:$0xf] }
 0x156   : > { %v2417_v48 = vpop.permute.xlu0 %2416 }
 0x157   : > { %v2246_v53 = vld [vmem:[#allocation2 + $0x44] sm:$0x8]  ;;  %v2112_v52 = vpop.permute.xlu1 %2111  ;;  %v2515_v25 = vsel %vm6893_vm13, %v2417_v48, %v2514_v11  ;;  %v3072_v48 = vld [vmem:[#allocation2 + $0x8] sm:$0xf] }
 0x158   : > { %v2247_v38 = vsel %vm6818_vm8, 0, %v2246_v53  ;;  %2198 = vst.msk [vmem:[#allocation2 + $0x28] sm:$0xf] %vm2187_vm5, %v2112_v52  ;;  %2516 = vst [vmem:[#allocation2 + $0x24] sm:$0xf] %v2515_v25  ;;  %2996 = vrot.lane.b32.xlu0 %v6439_v3, %s5898_s19 }
 0x159   : > { %2248 = vst [vmem:[#allocation2 + $0x44] sm:$0x8] %v2247_v38  ;;  %3014 = vrot.lane.b32.xlu1 %v2895_v42, %s5898_s19  ;;  %v5230_v42 = vld [vmem:[%s6003_s13 + $0x51] sm:$0xff] }
 0x15a   : > { %v2415_v33 = vpop.permute.xlu0 %2414  ;;  %v5596_v25 = vpack.c.bf16 %v5230_v42, %v5230_v42 }
 0x15b   : > { %v2249_v21 = vld [vmem:[#allocation2 + $0x4c] sm:$0x8]  ;;  %v2421_v54 = vpop.permute.xlu1 %2420  ;;  %2513 = vst.msk [vmem:[#allocation2 + $0x20] sm:$0xf] %vm8110_vm12, %v2415_v33 }
 0x15c   : > { %v2250_v10 = vsel %vm6818_vm8, 0, %v2249_v21  ;;  %v2519_v18 = vsel %vm6893_vm13, %v2421_v54, %v2518_v5  ;;  %3285 = vrot.lane.b32.xlu0 %v5575_v31, %s5899_s20  ;;  %v7155_v31 = vrot.slane %v1769_v27, 7 }
 0x15d   : > { %2251 = vst [vmem:[#allocation2 + $0x4c] sm:$0x8] %v2250_v10  ;;  %2520 = vst [vmem:[#allocation2 + $0x2c] sm:$0xf] %v2519_v18  ;;  %1267 = vrot.lane.b32.xlu1 %v5429_v30, %s5893_s15  ;;  %v5233_v30 = vld [vmem:[%s6003_s13 + $0x69] sm:$0x7f]  ;;  %v1782_v18 = vor.u32 %v1780_v61, %v1779_v47 }
 0x15e   : > { %v2419_v14 = vpop.permute.xlu0 %2418  ;;  %v5599_v35 = vpack.c.bf16 %v5233_v30, %v5233_v30  ;;  %v1775_v10 = vrot.slane %v7155_v31, 4  ;;  %v5125_v30 = vld [vmem:[%s6003_s13 + $0xc8] sm:$0x7f] }
 0x15f   : > { %v2977_v45 = vpop.permute.xlu1 %2976  ;;  %2517 = vst.msk [vmem:[#allocation2 + $0x28] sm:$0xf] %vm8110_vm12, %v2419_v14 }
 0x160   : > { %v3069_v50 = vsel %vm7128_vm11, %v2977_v45, %v3068_v16  ;;  %3267 = vrot.lane.b32.xlu0 %v5566_v7, %s5899_s20  ;;  %v1783_v58 = vsel %vm6119_vm7, %v1775_v10, %v1782_v18  ;;  %v1985_v45 = vld [vmem:[%s6003_s13 + $0xb0] sm:$0xff] }
 0x161   : > { %3070 = vst [vmem:[#allocation2] sm:$0xf] %v3069_v50  ;;  %3289 = vrot.lane.b32.xlu1 %v6852_v36, %s5899_s20  ;;  %v3637_v50 = vld [vmem:[#allocation2 + $0x4] sm:$0xf] }
 0x162   : > { %v2579_v53 = vld [vmem:[#allocation2 + $0x20] sm:$0x1]  ;;  %v2995_v11 = vpop.permute.xlu0 %2994 }
 0x163   : > { %v2981_v52 = vpop.permute.xlu1 %2980  ;;  %v2580_v38 = vsel %vm6928_vm9, 0, %v2579_v53  ;;  %3087 = vst.msk [vmem:[#allocation2 + $0x24] sm:$0xf] %vm8109_vm6, %v2995_v11  ;;  %v2291_v53 = vld [vmem:[%s6003_s13 + $0xa9] sm:$0x7f] }
 0x164   : > { %v3073_v36 = vsel %vm7128_vm11, %v2981_v52, %v3072_v48  ;;  %2581 = vst [vmem:[#allocation2 + $0x20] sm:$0x1] %v2580_v38  ;;  %3562 = vrot.lane.b32.xlu0 %v5597_v0, %s5900_s11  ;;  %v5123_v0 = vld [vmem:[%s6003_s13 + $0xb8] sm:$0x7f]  ;;  %v7194_v52 = vpack.c.bf16 %v1985_v45, %v1985_v45  ;;  %v5517_v61 = vpack.c.bf16 %v2291_v53, %v2291_v53 }
 0x165   : > { %3074 = vst [vmem:[#allocation2 + $0x8] sm:$0xf] %v3073_v36  ;;  %1265 = vrot.lane.b32.xlu1 %v7142_v15, %s5893_s15  ;;  %v5549_v48 = vpack.c.bf16 %v5123_v0, %v5123_v0  ;;  %v3641_v36 = vld [vmem:[#allocation2 + $0xc] sm:$0xf]  ;;  %v1927_v0 = vld [vmem:[#allocation2 + $0x38] sm:$0xf] }
 0x166   : > { %v2582_v21 = vld [vmem:[#allocation2 + $0x28] sm:$0x1]  ;;  %v2999_v5 = vpop.permute.xlu0 %2998 }
 0x167   : > { %v3270_v54 = vpop.permute.xlu1 %3269  ;;  %v2583_v33 = vsel %vm6928_vm9, 0, %v2582_v21  ;;  %3091 = vst.msk [vmem:[#allocation2 + $0x2c] sm:$0xf] %vm8109_vm6, %v2999_v5  ;;  %vm7172_vm6 = vmand %vm8112_vm4, %vm8145_vm0  ;;  %v2290_v21 = vld [vmem:[%s6003_s13 + $0xa1] sm:$0xff]  ;;  %v2905_v5 = vshrl.u32 %v5549_v48, 16  ;;  %vm3828_vm0 = vcmask 293888  }
 0x168   : > { %3350 = vst.msk [vmem:[#allocation2 + $0x24] sm:$0xf] %vm3128_vm15, %v3270_v54  ;;  %2584 = vst [vmem:[#allocation2 + $0x28] sm:$0x1] %v2583_v33  ;;  %3271 = vrot.lane.b32.xlu0 %v6870_v9, %s5899_s20  ;;  %v2897_v54 = vshrl.u32 %v7194_v52, 16  ;;  %v5551_v33 = vpack.c.bf16 %v5125_v30, %v5125_v30 }
 0x169   : > { %3560 = vrot.lane.b32.xlu1 %v5596_v25, %s5900_s11 }
 0x16a   : > { %v3252_v40 = vpop.permute.xlu0 %3251  ;;  %v7218_v45 = vrot.slane %v2897_v54, 7 }
 0x16b   : > { %v3274_v7 = vpop.permute.xlu1 %3273  ;;  %3341 = vst.msk [vmem:[#allocation2] sm:$0xf] %vm3128_vm15, %v3252_v40 }
 0x16c   : > { %3352 = vst.msk [vmem:[#allocation2 + $0x2c] sm:$0xf] %vm3128_vm15, %v3274_v7  ;;  %3566 = vrot.lane.b32.xlu0 %v5599_v35, %s5900_s11  ;;  %v1923_v7 = vld [vmem:[#allocation2 + $0x30] sm:$0xf] }
 0x16d   : > { %1840 = vrot.lane.b32.xlu1 %v6311_v57, %s5894_s16 }
 0x16e   : > { %v3547_v57 = vpop.permute.xlu0 %3546 }
 0x16f   : > { %v3388_v16 = vld [vmem:[#allocation2 + $0x24] sm:$0x8]  ;;  %v3256_v14 = vpop.permute.xlu1 %3255  ;;  %v3638_v27 = vsel %vm7172_vm6, %v3547_v57, %v3637_v50  ;;  %v2921_v50 = vshrl.u32 %v5551_v33, 16 }
 0x170   : > { %v3389_v42 = vsel %vm6954_vm3, 0, %v3388_v16  ;;  %3343 = vst.msk [vmem:[#allocation2 + $0x8] sm:$0xf] %vm3128_vm15, %v3256_v14  ;;  %3639 = vst [vmem:[#allocation2 + $0x4] sm:$0xf] %v3638_v27  ;;  %1858 = vrot.lane.b32.xlu0 %v1783_v58, %s5894_s16  ;;  %v2292_v58 = vld [vmem:[%s6003_s13 + $0xb1] sm:$0xff] }
 0x171   : > { %3390 = vst [vmem:[#allocation2 + $0x24] sm:$0x8] %v3389_v42  ;;  %3564 = vrot.lane.b32.xlu1 %v6897_v19, %s5900_s11  ;;  %v2907_v16 = vrot.slane %v2905_v5, 7  ;;  %v2908_v14 = vshll.u32 %v5549_v48, 16  ;;  %v5519_v48 = vpack.c.bf16 %v2293_v23, %v2293_v23  ;;  %v2923_v30 = vrot.slane %v2921_v50, 7 }
 0x172   : > { %v3545_v25 = vpop.permute.xlu0 %3544 }
 0x173   : > { %v3391_v11 = vld [vmem:[#allocation2 + $0x2c] sm:$0x8]  ;;  %v3551_v38 = vpop.permute.xlu1 %3550  ;;  %3634 = vst.msk [vmem:[#allocation2] sm:$0xf] %vm8112_vm4, %v3545_v25  ;;  %v2910_v25 = vor.u32 %v2908_v14, %v2907_v16  ;;  %v2522_v16 = vld [vmem:[#allocation2 + $0x34] sm:$0xf] }
 0x174   : > { %v3392_v47 = vsel %vm6954_vm3, 0, %v3391_v11  ;;  %v3642_v19 = vsel %vm7172_vm6, %v3551_v38, %v3641_v36  ;;  %1844 = vrot.lane.b32.xlu0 %v6333_v62, %s5894_s16  ;;  %v7214_v62 = vpack.c.bf16 %v2290_v21, %v2290_v21  ;;  %v7227_v11 = vpack.c.bf16 %v2292_v58, %v2292_v58 }
 0x175   : > { %3393 = vst [vmem:[#allocation2 + $0x2c] sm:$0x8] %v3392_v47  ;;  %3643 = vst [vmem:[#allocation2 + $0xc] sm:$0xf] %v3642_v19  ;;  %2149 = vrot.lane.b32.xlu1 %v7191_v34, %s5896_s17  ;;  %v2836_v38 = vshll.u32 %v6873_v8, 16  ;;  %v2903_v36 = vrot.slane %v7218_v45, 4 }
 0x176   : > { %v1825_v18 = vpop.permute.xlu0 %1824  ;;  %v2924_v47 = vshll.u32 %v5551_v33, 16 }
 0x177   : > { %v1843_v35 = vpop.permute.xlu1 %1842  ;;  %v1924_v40 = vsel %vm6838_vm10, %v1825_v18, %v1923_v7  ;;  %v2838_v21 = vor.u32 %v2836_v38, %v6901_v1  ;;  %v2911_v54 = vsel %vm6119_vm7, %v2903_v36, %v2910_v25  ;;  %v5183_v7 = vld [vmem:[%s6003_s13 + $0xb8] sm:$0xff]  ;;  %v5176_v36 = vld [vmem:[%s6003_s13 + $0x80] sm:$0xff]  ;;  %v1122_v25 = vld [vmem:[%s6003_s13 + $0xe9] sm:$0x7f] }
 0x178   : > { %1942 = vst.msk [vmem:[#allocation2 + $0x54] sm:$0xf] %vm8111_vm2, %v1843_v35  ;;  %1925 = vst [vmem:[#allocation2 + $0x30] sm:$0xf] %v1924_v40  ;;  %2131 = vrot.lane.b32.xlu0 %v7057_v22, %s5896_s17  ;;  %v2926_v5 = vor.u32 %v2924_v47, %v2923_v30  ;;  %v3076_v47 = vld [vmem:[#allocation2 + $0x10] sm:$0xf] }
 0x179   : > { %2440 = vrot.lane.b32.xlu1 %v5517_v61, %s5897_s18 }
 0x17a   : > { %v3549_v42 = vpop.permute.xlu0 %3548  ;;  %v5783_v27 = vld [vmem:[#allocation2] sm:$0xff]   ;;  %v2927_v1 = vsel %vm6119_vm7, %v1743_v17, %v2926_v5  ;;  %v5579_v17 = vpack.c.bf16 %v5183_v7, %v5183_v7  ;;  %v5431_v5 = vpack.c.bf16 %v1122_v25, %v1122_v25  ;;  %v1756_v25 = vshll.u32 %v6976_v13, 16 }
 0x17b   : > { %v1829_v57 = vpop.permute.xlu1 %1828  ;;  %3640 = vst.msk [vmem:[#allocation2 + $0x8] sm:$0xf] %vm8112_vm4, %v3549_v42  ;;  %5660 = vmatprep.mubr.msk.bf16.mxu0 %vm3828_vm0, %v5783_v27  ;;  %v2526_v27 = vld [vmem:[#allocation2 + $0x3c] sm:$0xf] }
 0x17c   : > { %v1928_v53 = vsel %vm6838_vm10, %v1829_v57, %v1927_v0  ;;  %2135 = vrot.lane.b32.xlu0 %v7194_v52, %s5896_s17  ;;  %v5235_v57 = vld [vmem:[%s6003_s13 + $0x79] sm:$0x7f] }
 0x17d   : > { %1929 = vst [vmem:[#allocation2 + $0x38] sm:$0xf] %v1928_v53  ;;  %2438 = vrot.lane.b32.xlu1 %v7214_v62, %s5897_s18 }
 0x17e   : > { %v1847_v61 = vpop.permute.xlu0 %1846 }
 0x17f   : > { %v2134_v19 = vpop.permute.xlu1 %2133  ;;  %1946 = vst.msk [vmem:[#allocation2 + $0x5c] sm:$0xf] %vm8111_vm2, %v1847_v61  ;;  %v1446_v61 = vld [vmem:[%s6003_s13 + $0xf0] sm:$0xff] }
 0x180   : > { %2209 = vst.msk [vmem:[#allocation2 + $0x54] sm:$0xf] %vm2187_vm5, %v2134_v19  ;;  %2444 = vrot.lane.b32.xlu0 %v5519_v48, %s5897_s18 }
 0x181   : > { %2442 = vrot.lane.b32.xlu1 %v7227_v11, %s5897_s18 }
 0x182   : > { %v2116_v33 = vpop.permute.xlu0 %2115  ;;  %v5785_v18 = vld [vmem:[#allocation2 + $0x8] sm:$0xff]  }
 0x183   : > { %v2138_v35 = vpop.permute.xlu1 %2137  ;;  %2200 = vst.msk [vmem:[#allocation2 + $0x30] sm:$0xf] %vm2187_vm5, %v2116_v33  ;;  %5661 = vmatmul.mubr.msk.bf16.vlgmr.msra.gmra.mxu0 %vm3828_vm0, %v5785_v18  ;;  %v5234_v33 = vld [vmem:[%s6003_s13 + $0x71] sm:$0xff]  ;;  %v7279_v18 = vpack.c.bf16 %v1446_v61, %v1446_v61 }
 0x184   : > { %2211 = vst.msk [vmem:[#allocation2 + $0x5c] sm:$0xf] %vm2187_vm5, %v2138_v35  ;;  %3000 = vrot.lane.b32.xlu0 %v2838_v21, %s5898_s19  ;;  %v1447_v21 = vld [vmem:[%s6003_s13 + $0xf8] sm:$0x7f]  ;;  %v5237_v35 = vld [vmem:[%s6003_s13 + $0x89] sm:$0x7f] }
 0x185   : > { %3018 = vrot.lane.b32.xlu1 %v2911_v54, %s5898_s19 }
 0x186   : > { %v2425_v23 = vpop.permute.xlu0 %2424 }
 0x187   : > { %v2252_v40 = vld [vmem:[#allocation2 + $0x54] sm:$0x8]  ;;  %v2120_v58 = vpop.permute.xlu1 %2119  ;;  %v2523_v50 = vsel %vm6893_vm13, %v2425_v23, %v2522_v16 }
 0x188   : > { %v2253_v14 = vsel %vm6818_vm8, 0, %v2252_v40  ;;  %2202 = vst.msk [vmem:[#allocation2 + $0x38] sm:$0xf] %vm2187_vm5, %v2120_v58  ;;  %2524 = vst [vmem:[#allocation2 + $0x34] sm:$0xf] %v2523_v50  ;;  %3004 = vrot.lane.b32.xlu0 %v6996_v49, %s5898_s19  ;;  %v5601_v49 = vpack.c.bf16 %v5235_v57, %v5235_v57  ;;  %v5600_v50 = vpack.c.bf16 %v5234_v33, %v5234_v33  ;;  %v1121_v57 = vld [vmem:[%s6003_s13 + $0xe1] sm:$0xff] }
 0x189   : > { %2254 = vst [vmem:[#allocation2 + $0x54] sm:$0x8] %v2253_v14  ;;  %3022 = vrot.lane.b32.xlu1 %v2927_v1, %s5898_s19  ;;  %v5463_v1 = vpack.c.bf16 %v1447_v21, %v1447_v21  ;;  %v3080_v58 = vld [vmem:[#allocation2 + $0x18] sm:$0xf] }
 0x18a   : > { %v2423_v53 = vpop.permute.xlu0 %2422 }
 0x18b   : > { %v2255_v0 = vld [vmem:[#allocation2 + $0x5c] sm:$0x8]  ;;  %v2429_v42 = vpop.permute.xlu1 %2428  ;;  %2521 = vst.msk [vmem:[#allocation2 + $0x30] sm:$0xf] %vm8110_vm12, %v2423_v53 }
 0x18c   : > { %v2256_v48 = vsel %vm6818_vm8, 0, %v2255_v0  ;;  %v2527_v38 = vsel %vm6893_vm13, %v2429_v42, %v2526_v27  ;;  %3293 = vrot.lane.b32.xlu0 %v5579_v17, %s5899_s20  ;;  %v1740_v17 = vshll.u32 %v6961_v32, 16  ;;  %v1785_v0 = vshrl.u32 %v7279_v18, 16 }
 0x18d   : > { %2257 = vst [vmem:[#allocation2 + $0x5c] sm:$0x8] %v2256_v48  ;;  %2528 = vst [vmem:[#allocation2 + $0x3c] sm:$0xf] %v2527_v38  ;;  %3275 = vrot.lane.b32.xlu1 %v6873_v8, %s5899_s20  ;;  %v5572_v8 = vpack.c.bf16 %v5176_v36, %v5176_v36  ;;  %v1793_v42 = vshrl.u32 %v5463_v1, 16  ;;  %v7300_v36 = vpack.c.bf16 %v1121_v57, %v1121_v57 }
 0x18e   : > { %v2427_v19 = vpop.permute.xlu0 %2426 }
 0x18f   : > { %v2985_v30 = vpop.permute.xlu1 %2984  ;;  %2525 = vst.msk [vmem:[#allocation2 + $0x38] sm:$0xf] %vm8110_vm12, %v2427_v19  ;;  %vm8148_vm12 = vcmask 224448   ;;  %v1796_v19 = vshll.u32 %v5463_v1, 16 }
 0x190   : > { %v3077_v54 = vsel %vm7128_vm11, %v2985_v30, %v3076_v47  ;;  %3297 = vrot.lane.b32.xlu0 %v7037_v24, %s5899_s20  ;;  %v5603_v24 = vpack.c.bf16 %v5237_v35, %v5237_v35  ;;  %v7303_v30 = vrot.slane %v1785_v0, 7  ;;  %v1795_v47 = vrot.slane %v1793_v42, 7  ;;  %v1355_v42 = vld [vmem:[#allocation2 + $0x6c] sm:$0xf] }
 0x191   : > { %3078 = vst [vmem:[#allocation2 + $0x10] sm:$0xf] %v3077_v54  ;;  %3570 = vrot.lane.b32.xlu1 %v5601_v49, %s5900_s11  ;;  %v7298_v49 = vor.u32 %v1740_v17, %v6986_v43  ;;  %v1351_v54 = vld [vmem:[#allocation2 + $0x64] sm:$0xf]  ;;  %v7313_v43 = vor.u32 %v1756_v25, %v7001_v56 }
 0x192   : > { %v2585_v7 = vld [vmem:[#allocation2 + $0x30] sm:$0x1]  ;;  %v3003_v23 = vpop.permute.xlu0 %3002  ;;  %v1798_v35 = vor.u32 %v1796_v19, %v1795_v47 }
 0x193   : > { %v2989_v40 = vpop.permute.xlu1 %2988  ;;  %v2586_v16 = vsel %vm6928_vm9, 0, %v2585_v7  ;;  %3095 = vst.msk [vmem:[#allocation2 + $0x34] sm:$0xf] %vm8148_vm12, %v3003_v23  ;;  %v3645_v7 = vld [vmem:[#allocation2 + $0x14] sm:$0xf] }
 0x194   : > { %v3081_v14 = vsel %vm7128_vm11, %v2989_v40, %v3080_v58  ;;  %2587 = vst [vmem:[#allocation2 + $0x30] sm:$0x1] %v2586_v16  ;;  %1271 = vrot.lane.b32.xlu0 %v5431_v5, %s5893_s15  ;;  %v1791_v5 = vrot.slane %v7303_v30, 4  ;;  %v5127_v58 = vld [vmem:[%s6003_s13 + $0xd8] sm:$0x7f] }
 0x195   : > { %3082 = vst [vmem:[#allocation2 + $0x18] sm:$0xf] %v3081_v14  ;;  %3279 = vrot.lane.b32.xlu1 %v5572_v8, %s5899_s20  ;;  %v5553_v17 = vpack.c.bf16 %v5127_v58, %v5127_v58 }
 0x196   : > { %v2588_v27 = vld [vmem:[#allocation2 + $0x38] sm:$0x1]  ;;  %v3007_v48 = vpop.permute.xlu0 %3006  ;;  %v1799_v14 = vsel %vm6119_vm7, %v1791_v5, %v1798_v35 }
 0x197   : > { %v3278_v53 = vpop.permute.xlu1 %3277  ;;  %v2589_v38 = vsel %vm6928_vm9, 0, %v2588_v27  ;;  %3099 = vst.msk [vmem:[#allocation2 + $0x3c] sm:$0xf] %vm8148_vm12, %v3007_v48  ;;  %v5129_v27 = vld [vmem:[%s6003_s13 + $0xe8] sm:$0x7f]  ;;  %vm8149_vm12 = vcmask 93248  }
 0x198   : > { %3354 = vst.msk [vmem:[#allocation2 + $0x34] sm:$0xf] %vm3128_vm15, %v3278_v53  ;;  %2590 = vst [vmem:[#allocation2 + $0x38] sm:$0x1] %v2589_v38  ;;  %3568 = vrot.lane.b32.xlu0 %v5600_v50, %s5900_s11  ;;  %v1994_v50 = vld [vmem:[%s6003_s13 + $0xf8] sm:$0xff]  ;;  %v2937_v38 = vshrl.u32 %v5553_v17, 16  ;;  %v5555_v25 = vpack.c.bf16 %v5129_v27, %v5129_v27 }
 0x199   : > { %3574 = vrot.lane.b32.xlu1 %v5603_v24, %s5900_s11  ;;  %v2295_v24 = vld [vmem:[%s6003_s13 + $0xc9] sm:$0x7f]  ;;  %v7339_v48 = vpack.c.bf16 %v1994_v50, %v1994_v50 }
 0x19a   : > { %v1260_v21 = vpop.permute.xlu0 %1259  ;;  %v2939_v35 = vrot.slane %v2937_v38, 7 }
 0x19b   : > { %v3260_v61 = vpop.permute.xlu1 %3259  ;;  %v1352_v8 = vsel %vm6644_vm1, %v1260_v21, %v1351_v54 }
 0x19c   : > { %3345 = vst.msk [vmem:[#allocation2 + $0x10] sm:$0xf] %vm3128_vm15, %v3260_v61  ;;  %1353 = vst [vmem:[#allocation2 + $0x64] sm:$0xf] %v1352_v8  ;;  %1269 = vrot.lane.b32.xlu0 %v7300_v36, %s5893_s15  ;;  %v3649_v61 = vld [vmem:[#allocation2 + $0x1c] sm:$0xf] }
 0x19d   : > { %1848 = vrot.lane.b32.xlu1 %v7298_v49, %s5894_s16 }
 0x19e   : > { %v3282_v40 = vpop.permute.xlu0 %3281 }
 0x19f   : > { %v3394_v33 = vld [vmem:[#allocation2 + $0x34] sm:$0x8]  ;;  %v3555_v1 = vpop.permute.xlu1 %3554  ;;  %3356 = vst.msk [vmem:[#allocation2 + $0x3c] sm:$0xf] %vm3128_vm15, %v3282_v40  ;;  %v1931_v40 = vld [vmem:[#allocation2 + $0x40] sm:$0xf] }
 0x1a0   : > { %v3395_v23 = vsel %vm6954_vm3, 0, %v3394_v33  ;;  %v3646_v16 = vsel %vm7172_vm6, %v3555_v1, %v3645_v7  ;;  %3572 = vrot.lane.b32.xlu0 %v7067_v44, %s5900_s11  ;;  %v5521_v44 = vpack.c.bf16 %v2295_v24, %v2295_v24  ;;  %v2940_v33 = vshll.u32 %v5553_v17, 16 }
 0x1a1   : > { %3396 = vst [vmem:[#allocation2 + $0x34] sm:$0x8] %v3395_v23  ;;  %3647 = vst [vmem:[#allocation2 + $0x14] sm:$0xf] %v3646_v16  ;;  %1852 = vrot.lane.b32.xlu1 %v7313_v43, %s5894_s16  ;;  %v2953_v1 = vshrl.u32 %v5555_v25, 16  ;;  %v2956_v17 = vshll.u32 %v5555_v25, 16 }
 0x1a2   : > { %v1264_v0 = vpop.permute.xlu0 %1263  ;;  %v2942_v24 = vor.u32 %v2940_v33, %v2939_v35  ;;  %v4251_v33 = vld [vmem:[%s6003_s13 + $0x10] sm:$0xff] }
 0x1a3   : > { %v3264_v57 = vpop.permute.xlu1 %3263  ;;  %v1356_v53 = vsel %vm6644_vm1, %v1264_v0, %v1355_v42  ;;  %v2955_v50 = vrot.slane %v2953_v1, 7  ;;  %v4252_v1 = vld [vmem:[%s6003_s13 + $0x18] sm:$0xff] }
 0x1a4   : > { %3347 = vst.msk [vmem:[#allocation2 + $0x18] sm:$0xf] %vm3128_vm15, %v3264_v57  ;;  %1357 = vst [vmem:[#allocation2 + $0x6c] sm:$0xf] %v1356_v53  ;;  %1862 = vrot.lane.b32.xlu0 %v1799_v14, %s5894_s16  ;;  %v2868_v14 = vshll.u32 %v7039_v20, 16  ;;  %v2943_v27 = vsel %vm6119_vm7, %v1759_v60, %v2942_v24 }
 0x1a5   : > { %2139 = vrot.lane.b32.xlu1 %v6961_v32, %s5896_s17  ;;  %v2297_v32 = vld [vmem:[%s6003_s13 + $0xd9] sm:$0x7f]  ;;  %v2958_v53 = vor.u32 %v2956_v17, %v2955_v50  ;;  %v4297_v60 = vld [vmem:[%s8096_s2] sm:$0x3]  ;;  %v4254_v17 = vld [vmem:[%s6003_s13 + $0x28] sm:$0xff] }
 0x1a6   : > { %v3397_v47 = vld [vmem:[#allocation2 + $0x3c] sm:$0x8]  ;;  %v3553_v21 = vpop.permute.xlu0 %3552  ;;  %v5523_v16 = vpack.c.bf16 %v2297_v32, %v2297_v32  ;;  %v5131_v24 = vld [vmem:[%s6003_s13 + $0xf8] sm:$0x7f]  ;;  %v4253_v50 = vld [vmem:[%s6003_s13 + $0x20] sm:$0xff] }
 0x1a7   : > { %v3559_v19 = vpop.permute.xlu1 %3558  ;;  %v3398_v54 = vsel %vm6954_vm3, 0, %v3397_v47  ;;  %3644 = vst.msk [vmem:[#allocation2 + $0x10] sm:$0xf] %vm8112_vm4, %v3553_v21  ;;  %v4249_v21 = vld [vmem:[%s6003_s13] sm:$0xff] }
 0x1a8   : > { %v3650_v8 = vsel %vm7172_vm6, %v3559_v19, %v3649_v61  ;;  %3399 = vst [vmem:[#allocation2 + $0x3c] sm:$0x8] %v3398_v54  ;;  %2153 = vrot.lane.b32.xlu0 %v7339_v48, %s5896_s17  ;;  %v2959_v19 = vsel %vm6119_vm7, %v1775_v10, %v2958_v53  ;;  %v4250_v54 = vld [vmem:[%s6003_s13 + $0x8] sm:$0xff]  ;;  %v4282_v10 = vpack.c.bf16 %v4252_v1, %v4251_v33  ;;  %v4259_v1 = vld [vmem:[%s6003_s13 + $0x50] sm:$0xff] }
 0x1a9   : > { %3651 = vst [vmem:[#allocation2 + $0x1c] sm:$0xf] %v3650_v8  ;;  %2448 = vrot.lane.b32.xlu1 %v5521_v44, %s5897_s18  ;;  %v4281_v35 = vpack.c.bf16 %v4250_v54, %v4249_v21  ;;  %v4257_v54 = vld [vmem:[%s6003_s13 + $0x40] sm:$0xff] }
 0x1aa   : > { %v1262_v58 = vpop.permute.xlu0 %1261 }
 0x1ab   : > { %v1833_v7 = vpop.permute.xlu1 %1832  ;;  %1354 = vst.msk [vmem:[#allocation2 + $0x68] sm:$0xf] %vm8149_vm12, %v1262_v58  ;;  %vm8150_vm12 = vcmask 1041408   ;;  %v2530_v58 = vld [vmem:[#allocation2 + $0x44] sm:$0xf] }
 0x1ac   : > { %v1932_v23 = vsel %vm6838_vm10, %v1833_v7, %v1931_v40  ;;  %2143 = vrot.lane.b32.xlu0 %v6976_v13, %s5896_s17  ;;  %v2870_v13 = vor.u32 %v2868_v14, %v7070_v41  ;;  %5727 = vmatprep.subr.msk.bf16.mxu1 %vm8150_vm12, %v4297_v60  ;;  %v5239_v7 = vld [vmem:[%s6003_s13 + $0x99] sm:$0x7f] }
 0x1ad   : > { %1933 = vst [vmem:[#allocation2 + $0x40] sm:$0xf] %v1932_v23  ;;  %2446 = vrot.lane.b32.xlu1 %v6998_v2, %s5897_s18  ;;  %v2884_v2 = vshll.u32 %v7057_v22, 16  ;;  %v5605_v14 = vpack.c.bf16 %v5239_v7, %v5239_v7  ;;  %v2299_v7 = vld [vmem:[%s6003_s13 + $0xe9] sm:$0x7f] }
 0x1ae   : > { %v1851_v0 = vpop.permute.xlu0 %1850  ;;  %v5786_v42 = vld [vmem:[#allocation2 + $0x10] sm:$0xff]  }
 0x1af   : > { %v3557_v57 = vpop.permute.xlu1 %3556  ;;  %1950 = vst.msk [vmem:[#allocation2 + $0x64] sm:$0xf] %vm8111_vm2, %v1851_v0  ;;  %5664 = vmatprep.mubr.msk.bf16.mxu0 %vm3828_vm0, %v5786_v42  ;;  %v2886_v56 = vor.u32 %v2884_v2, %v7087_v37  ;;  %v4255_v2 = vld [vmem:[%s6003_s13 + $0x30] sm:$0xff] }
 0x1b0   : > { %3648 = vst.msk [vmem:[#allocation2 + $0x18] sm:$0xf] %vm8112_vm4, %v3557_v57  ;;  %2452 = vrot.lane.b32.xlu0 %v5523_v16, %s5897_s18  ;;  %vm4298_vm4 = vcmask 31744  }
 0x1b1   : > { %2450 = vrot.lane.b32.xlu1 %v7142_v15, %s5897_s18  ;;  %v1935_v15 = vld [vmem:[#allocation2 + $0x48] sm:$0xf]  ;;  %5694 = vmatprep.mubr.msk.bf16.mxu1 %vm4298_vm4, %v4281_v35 }
 0x1b2   : > { %v1407_v44 = vld [vmem:[#allocation2 + $0x68] sm:$0x1]  ;;  %v1837_v25 = vpop.permute.xlu0 %1836 }
 0x1b3   : > { %v1855_v38 = vpop.permute.xlu1 %1854  ;;  %v1408_v47 = vsel %vm6480_vm14, 0, %v1407_v44  ;;  %v1936_v41 = vsel %vm6838_vm10, %v1837_v25, %v1935_v15  ;;  %v5241_v44 = vld [vmem:[%s6003_s13 + $0xa9] sm:$0x7f] }
 0x1b4   : > { %1954 = vst.msk [vmem:[#allocation2 + $0x6c] sm:$0xf] %vm8111_vm2, %v1855_v38  ;;  %1409 = vst [vmem:[#allocation2 + $0x68] sm:$0x1] %v1408_v47  ;;  %3008 = vrot.lane.b32.xlu0 %v2870_v13, %s5898_s19  ;;  %v4283_v13 = vpack.c.bf16 %v4254_v17, %v4253_v50  ;;  %v5557_v38 = vpack.c.bf16 %v5131_v24, %v5131_v24  ;;  %v3088_v24 = vld [vmem:[#allocation2 + $0x28] sm:$0xf] }
 0x1b5   : > { %1937 = vst [vmem:[#allocation2 + $0x48] sm:$0xf] %v1936_v41  ;;  %3026 = vrot.lane.b32.xlu1 %v2943_v27, %s5898_s19  ;;  %vm8151_vm2 = vmmov %vm8150_vm12  ;;  %v4256_v27 = vld [vmem:[%s6003_s13 + $0x38] sm:$0xff]  ;;  %v2534_v41 = vld [vmem:[#allocation2 + $0x4c] sm:$0xf] }
 0x1b6   : > { %v4348_v61 = vsel %vm8151_vm2, %v4297_v60, 0  ;;  %v2142_v32 = vpop.permute.xlu0 %2141  ;;  %vm8152_vm2 = vcmask 191648   ;;  %v2969_v21 = vshrl.u32 %v5557_v38, 16 }
 0x1b7   : > { %v2124_v8 = vpop.permute.xlu1 %2123  ;;  %v5787_v37 = vld [vmem:[#allocation2 + $0x18] sm:$0xff]   ;;  %5693 = vmatpush3.bf16.msra.mxu1 %v4348_v61  ;;  %2213 = vst.msk [vmem:[#allocation2 + $0x64] sm:$0xf] %vm2187_vm5, %v2142_v32  ;;  %vm8153_vm12 = vmmov %vm8152_vm2  ;;  %v3084_v61 = vld [vmem:[#allocation2 + $0x20] sm:$0xf] }
 0x1b8   : > { %2204 = vst.msk [vmem:[#allocation2 + $0x40] sm:$0xf] %vm2187_vm5, %v2124_v8  ;;  %3012 = vrot.lane.b32.xlu0 %v2886_v56, %s5898_s19  ;;  %5665 = vmatmul.mubr.msk.bf16.gmra.mxu0 %vm3828_vm0, %v5787_v37  ;;  %v4258_v8 = vld [vmem:[%s6003_s13 + $0x48] sm:$0xff] }
 0x1b9   : > { %3030 = vrot.lane.b32.xlu1 %v2959_v19, %s5898_s19  ;;  %v5607_v19 = vpack.c.bf16 %v5241_v44, %v5241_v44  ;;  %v4285_v33 = vpack.c.bf16 %v4258_v8, %v4257_v54  ;;  %v4263_v44 = vld [vmem:[%s6003_s13 + $0x70] sm:$0xff]  ;;  %v4268_v8 = vld [vmem:[%s6003_s13 + $0x98] sm:$0xff] }
 0x1ba   : > { %v2146_v23 = vpop.permute.xlu0 %2145  ;;  %5695 = vmatmul.mubr.msk.bf16.vlgmr.msra.gmra.mxu1 %vm4298_vm4, %v4282_v10  ;;  %v4260_v10 = vld [vmem:[%s6003_s13 + $0x58] sm:$0xff]  ;;  %v4267_v54 = vld [vmem:[%s6003_s13 + $0x90] sm:$0xff] }
 0x1bb   : > { %v2433_v40 = vpop.permute.xlu1 %2432  ;;  %2215 = vst.msk [vmem:[#allocation2 + $0x6c] sm:$0xf] %vm2187_vm5, %v2146_v23  ;;  %5698 = vmatprep.mubr.msk.bf16.mxu1 %vm4298_vm4, %v4283_v13  ;;  %v4261_v13 = vld [vmem:[%s6003_s13 + $0x60] sm:$0xff] }
 0x1bc   : > { %v2531_v16 = vsel %vm6893_vm13, %v2433_v40, %v2530_v58  ;;  %3301 = vrot.lane.b32.xlu0 %v7053_v59, %s5899_s20  ;;  %v1772_v59 = vshll.u32 %v7134_v6, 16  ;;  %v2971_v40 = vrot.slane %v2969_v21, 7  ;;  %v2972_v58 = vshll.u32 %v5557_v38, 16  ;;  %v4264_v38 = vld [vmem:[%s6003_s13 + $0x78] sm:$0xff] }
 0x1bd   : > { %2532 = vst [vmem:[#allocation2 + $0x44] sm:$0xf] %v2531_v16  ;;  %3283 = vrot.lane.b32.xlu1 %v7039_v20, %s5899_s20  ;;  %v4284_v20 = vpack.c.bf16 %v4256_v27, %v4255_v2  ;;  %v4262_v2 = vld [vmem:[%s6003_s13 + $0x68] sm:$0xff] }
 0x1be   : > { %v2258_v57 = vld [vmem:[#allocation2 + $0x64] sm:$0x8]  ;;  %v2128_v42 = vpop.permute.xlu0 %2127  ;;  %v7432_v60 = vor.u32 %v1772_v59, %v7155_v31  ;;  %v4286_v31 = vpack.c.bf16 %v4260_v10, %v4259_v1  ;;  %v4287_v59 = vpack.c.bf16 %v4262_v2, %v4261_v13 }
 0x1bf   : > { %v2431_v0 = vpop.permute.xlu1 %2430  ;;  %v2259_v53 = vsel %vm6818_vm8, 0, %v2258_v57  ;;  %2206 = vst.msk [vmem:[#allocation2 + $0x48] sm:$0xf] %vm2187_vm5, %v2128_v42  ;;  %v5525_v57 = vpack.c.bf16 %v2299_v7, %v2299_v7  ;;  %v2974_v42 = vor.u32 %v2972_v58, %v2971_v40  ;;  %v7495_v1 = vld [vmem:[%s6003_s13 + $0xc0] sm:$0xff]  ;;  %v5245_v40 = vld [vmem:[%s6003_s13 + $0xc9] sm:$0x7f] }
 0x1c0   : > { %2529 = vst.msk [vmem:[#allocation2 + $0x40] sm:$0xf] %vm8152_vm2, %v2431_v0  ;;  %2260 = vst [vmem:[#allocation2 + $0x64] sm:$0x8] %v2259_v53  ;;  %3305 = vrot.lane.b32.xlu0 %v7191_v34, %s5899_s20  ;;  %vm8154_vm2 = vcmask 224448   ;;  %v2900_v0 = vshll.u32 %v7194_v52, 16 }
 0x1c1   : > { %3578 = vrot.lane.b32.xlu1 %v5605_v14, %s5900_s11  ;;  %v1359_v53 = vld [vmem:[#allocation2 + $0x74] sm:$0xf]  ;;  %v5244_v7 = vld [vmem:[%s6003_s13 + $0xc1] sm:$0xff]  ;;  %v3657_v58 = vld [vmem:[#allocation2 + $0x2c] sm:$0xf] }
 0x1c2   : > { %v2261_v25 = vld [vmem:[#allocation2 + $0x6c] sm:$0x8]  ;;  %v2437_v47 = vpop.permute.xlu0 %2436  ;;  %5699 = vmatmul.mubr.msk.bf16.gmra.mxu1 %vm4298_vm4, %v4284_v20 }
 0x1c3   : > { %v2435_v15 = vpop.permute.xlu1 %2434  ;;  %v2262_v56 = vsel %vm6818_vm8, 0, %v2261_v25  ;;  %v2535_v34 = vsel %vm6893_vm13, %v2437_v47, %v2534_v41  ;;  %5702 = vmatprep.mubr.msk.bf16.mxu1 %vm4298_vm4, %v4285_v33 }
 0x1c4   : > { %2533 = vst.msk [vmem:[#allocation2 + $0x48] sm:$0xf] %vm8153_vm12, %v2435_v15  ;;  %2263 = vst [vmem:[#allocation2 + $0x6c] sm:$0x8] %v2262_v56  ;;  %3287 = vrot.lane.b32.xlu0 %v7057_v22, %s5899_s20  ;;  %v2975_v15 = vsel %vm6119_vm7, %v1791_v5, %v2974_v42  ;;  %v3653_v56 = vld [vmem:[#allocation2 + $0x24] sm:$0xf] }
 0x1c5   : > { %2536 = vst [vmem:[#allocation2 + $0x4c] sm:$0xf] %v2535_v34  ;;  %3576 = vrot.lane.b32.xlu1 %v7083_v26, %s5900_s11  ;;  %vm8155_vm12 = vmmov %vm8154_vm2  ;;  %v4266_v5 = vld [vmem:[%s6003_s13 + $0x88] sm:$0xff]  ;;  %vm8156_vm7 = vcmask 93248  }
 0x1c6   : > { %v2993_v35 = vpop.permute.xlu0 %2992  ;;  %v4289_v21 = vpack.c.bf16 %v4266_v5, %v4265_v12  ;;  %v4276_v12 = vld [vmem:[%s6003_s13 + $0xd8] sm:$0xff] }
 0x1c7   : > { %v2591_v32 = vld [vmem:[#allocation2 + $0x40] sm:$0x1]  ;;  %v3011_v37 = vpop.permute.xlu1 %3010  ;;  %v3085_v22 = vsel %vm7128_vm11, %v2993_v35, %v3084_v61  ;;  %v4290_v35 = vpack.c.bf16 %v4268_v8, %v4267_v54 }
 0x1c8   : > { %v2592_v26 = vsel %vm6928_vm9, 0, %v2591_v32  ;;  %3103 = vst.msk [vmem:[#allocation2 + $0x44] sm:$0xf] %vm8154_vm2, %v3011_v37  ;;  %3086 = vst [vmem:[#allocation2 + $0x20] sm:$0xf] %v3085_v22  ;;  %3582 = vrot.lane.b32.xlu0 %v5607_v19, %s5900_s11  ;;  %vm8157_vm2 = vcmask 290048  }
 0x1c9   : > { %2593 = vst [vmem:[#allocation2 + $0x40] sm:$0x1] %v2592_v26  ;;  %1856 = vrot.lane.b32.xlu1 %v7432_v60, %s5894_s16 }
 0x1ca   : > { %v2997_v14 = vpop.permute.xlu0 %2996  ;;  %5703 = vmatmul.mubr.msk.bf16.gmra.mxu1 %vm4298_vm4, %v4286_v31  ;;  %v5580_v31 = vpack.c.bf16 %v7495_v1, %v7495_v1 }
 0x1cb   : > { %v2594_v23 = vld [vmem:[#allocation2 + $0x48] sm:$0x1]  ;;  %v3015_v16 = vpop.permute.xlu1 %3014  ;;  %v3089_v17 = vsel %vm7128_vm11, %v2997_v14, %v3088_v24  ;;  %5706 = vmatprep.mubr.msk.bf16.mxu1 %vm4298_vm4, %v4287_v59 }
 0x1cc   : > { %v2595_v50 = vsel %vm6928_vm9, 0, %v2594_v23  ;;  %3107 = vst.msk [vmem:[#allocation2 + $0x4c] sm:$0xf] %vm8155_vm12, %v3015_v16  ;;  %3090 = vst [vmem:[#allocation2 + $0x28] sm:$0xf] %v3089_v17  ;;  %3580 = vrot.lane.b32.xlu0 %v7214_v62, %s5900_s11  ;;  %v2902_v62 = vor.u32 %v2900_v0, %v7218_v45  ;;  %v4269_v23 = vld [vmem:[%s6003_s13 + $0xa0] sm:$0xff] }
 0x1cd   : > { %2596 = vst [vmem:[#allocation2 + $0x48] sm:$0x1] %v2595_v50  ;;  %2147 = vrot.lane.b32.xlu1 %v7134_v6, %s5896_s17  ;;  %v4288_v6 = vpack.c.bf16 %v4264_v38, %v4263_v44  ;;  %v5243_v45 = vld [vmem:[%s6003_s13 + $0xb9] sm:$0x7f]  ;;  %v4270_v16 = vld [vmem:[%s6003_s13 + $0xa8] sm:$0xff]  ;;  %vm8158_vm12 = vmmov %vm8157_vm2 }
 0x1ce   : > { %v3286_v20 = vpop.permute.xlu0 %3285  ;;  %v5609_v33 = vpack.c.bf16 %v5243_v45, %v5243_v45  ;;  %v4291_v17 = vpack.c.bf16 %v4270_v16, %v4269_v23  ;;  %v4272_v0 = vld [vmem:[%s6003_s13 + $0xb8] sm:$0xff]  ;;  %v5186_v45 = vld [vmem:[%s6003_s13 + $0xd0] sm:$0xff] }
 0x1cf   : > { %v1268_v27 = vpop.permute.xlu1 %1267  ;;  %3358 = vst.msk [vmem:[#allocation2 + $0x44] sm:$0xf] %vm3128_vm15, %v3286_v20  ;;  %v1788_v20 = vshll.u32 %v7279_v18, 16  ;;  %v5246_v23 = vld [vmem:[%s6003_s13 + $0xd1] sm:$0xff] }
 0x1d0   : > { %v1360_v25 = vsel %vm6644_vm1, %v1268_v27, %v1359_v53  ;;  %2456 = vrot.lane.b32.xlu0 %v5525_v57, %s5897_s18  ;;  %v4271_v57 = vld [vmem:[%s6003_s13 + $0xb0] sm:$0xff]  ;;  %v5610_v27 = vpack.c.bf16 %v5244_v7, %v5244_v7  ;;  %v5611_v53 = vpack.c.bf16 %v5245_v40, %v5245_v40 }
 0x1d1   : > { %1361 = vst [vmem:[#allocation2 + $0x74] sm:$0xf] %v1360_v25  ;;  %2454 = vrot.lane.b32.xlu1 %v7300_v36, %s5897_s18  ;;  %v4292_v2 = vpack.c.bf16 %v4272_v0, %v4271_v57  ;;  %v2300_v25 = vld [vmem:[%s6003_s13 + $0xf1] sm:$0xff] }
 0x1d2   : > { %v3268_v41 = vpop.permute.xlu0 %3267  ;;  %5707 = vmatmul.mubr.msk.bf16.gmra.mxu1 %vm4298_vm4, %v4288_v6  ;;  %v2301_v6 = vld [vmem:[%s6003_s13 + $0xf9] sm:$0x7f] }
 0x1d3   : > { %v3290_v47 = vpop.permute.xlu1 %3289  ;;  %3349 = vst.msk [vmem:[#allocation2 + $0x20] sm:$0xf] %vm3128_vm15, %v3268_v41  ;;  %5710 = vmatprep.mubr.msk.bf16.mxu1 %vm4298_vm4, %v4289_v21  ;;  %v1943_v41 = vld [vmem:[#allocation2 + $0x58] sm:$0xf]  ;;  %v2538_v21 = vld [vmem:[#allocation2 + $0x54] sm:$0xf] }
 0x1d4   : > { %3360 = vst.msk [vmem:[#allocation2 + $0x4c] sm:$0xf] %vm3128_vm15, %v3290_v47  ;;  %3016 = vrot.lane.b32.xlu0 %v2902_v62, %s5898_s19  ;;  %v4274_v62 = vld [vmem:[%s6003_s13 + $0xc8] sm:$0xff] }
 0x1d5   : > { %3034 = vrot.lane.b32.xlu1 %v2975_v15, %s5898_s19 }
 0x1d6   : > { %v3400_v34 = vld [vmem:[#allocation2 + $0x44] sm:$0x8]  ;;  %v3563_v61 = vpop.permute.xlu0 %3562 }
 0x1d7   : > { %v1266_v19 = vpop.permute.xlu1 %1265  ;;  %v3401_v32 = vsel %vm6954_vm3, 0, %v3400_v34  ;;  %v3654_v37 = vsel %vm7172_vm6, %v3563_v61, %v3653_v56  ;;  %v4293_v56 = vpack.c.bf16 %v4274_v62, %v7495_v1  ;;  %v4294_v34 = vpack.c.bf16 %v4276_v12, %v5186_v45 }
 0x1d8   : > { %1358 = vst.msk [vmem:[#allocation2 + $0x70] sm:$0xf] %vm8156_vm7, %v1266_v19  ;;  %3402 = vst [vmem:[#allocation2 + $0x44] sm:$0x8] %v3401_v32  ;;  %3020 = vrot.lane.b32.xlu0 %v7298_v49, %s5898_s19  ;;  %v1939_v49 = vld [vmem:[#allocation2 + $0x50] sm:$0xf]  ;;  %v5527_v19 = vpack.c.bf16 %v2301_v6, %v2301_v6 }
 0x1d9   : > { %3655 = vst [vmem:[#allocation2 + $0x24] sm:$0xf] %v3654_v37  ;;  %3309 = vrot.lane.b32.xlu1 %v7339_v48, %s5899_s20  ;;  %vm8159_vm7 = vcmask 126048   ;;  %v5247_v37 = vld [vmem:[%s6003_s13 + $0xd9] sm:$0x7f] }
 0x1da   : > { %v3272_v22 = vpop.permute.xlu0 %3271  ;;  %5711 = vmatmul.mubr.msk.bf16.gmra.mxu1 %vm4298_vm4, %v4290_v35  ;;  %v5188_v35 = vld [vmem:[%s6003_s13 + $0xe0] sm:$0xff]  ;;  %v5613_v40 = vpack.c.bf16 %v5247_v37, %v5247_v37  ;;  %v5251_v6 = vld [vmem:[%s6003_s13 + $0xf9] sm:$0x7f] }
 0x1db   : > { %v3403_v10 = vld [vmem:[#allocation2 + $0x4c] sm:$0x8]  ;;  %v3561_v26 = vpop.permute.xlu1 %3560  ;;  %3351 = vst.msk [vmem:[#allocation2 + $0x28] sm:$0xf] %vm3128_vm15, %v3272_v22  ;;  %5714 = vmatprep.mubr.msk.bf16.mxu1 %vm4298_vm4, %v4291_v17 }
 0x1dc   : > { %v3404_v48 = vsel %vm6954_vm3, 0, %v3403_v10  ;;  %3652 = vst.msk [vmem:[#allocation2 + $0x20] sm:$0xf] %vm8157_vm2, %v3561_v26  ;;  %3291 = vrot.lane.b32.xlu0 %v7194_v52, %s5899_s20  ;;  %vm8160_vm2 = vcmask 191648   ;;  %v5249_v17 = vld [vmem:[%s6003_s13 + $0xe9] sm:$0x7f] }
 0x1dd   : > { %3405 = vst [vmem:[#allocation2 + $0x4c] sm:$0x8] %v3404_v48  ;;  %3586 = vrot.lane.b32.xlu1 %v5609_v33, %s5900_s11  ;;  %v4278_v33 = vld [vmem:[%s6003_s13 + $0xe8] sm:$0xff]  ;;  %v4279_v48 = vld [vmem:[%s6003_s13 + $0xf0] sm:$0xff] }
 0x1de   : > { %v3567_v50 = vpop.permute.xlu0 %3566  ;;  %v4295_v22 = vpack.c.bf16 %v4278_v33, %v5188_v35 }
 0x1df   : > { %v1410_v14 = vld [vmem:[#allocation2 + $0x70] sm:$0x1]  ;;  %v1841_v24 = vpop.permute.xlu1 %1840  ;;  %v3658_v13 = vsel %vm7172_vm6, %v3567_v50, %v3657_v58  ;;  %v5582_v58 = vpack.c.bf16 %v5186_v45, %v5186_v45  ;;  %v3661_v45 = vld [vmem:[#allocation2 + $0x34] sm:$0xf] }
 0x1e0   : > { %v1411_v42 = vsel %vm6480_vm14, 0, %v1410_v14  ;;  %v1940_v52 = vsel %vm6838_vm10, %v1841_v24, %v1939_v49  ;;  %3659 = vst [vmem:[#allocation2 + $0x2c] sm:$0xf] %v3658_v13  ;;  %3295 = vrot.lane.b32.xlu0 %v5580_v31, %s5899_s20  ;;  %v4280_v49 = vld [vmem:[%s6003_s13 + $0xf8] sm:$0xff] }
 0x1e1   : > { %1412 = vst [vmem:[#allocation2 + $0x70] sm:$0x1] %v1411_v42  ;;  %1941 = vst [vmem:[#allocation2 + $0x50] sm:$0xf] %v1940_v52  ;;  %3584 = vrot.lane.b32.xlu1 %v7227_v11, %s5900_s11  ;;  %v7531_v11 = vor.u32 %v1788_v20, %v7303_v30  ;;  %v7547_v30 = vpack.c.bf16 %v2300_v25, %v2300_v25  ;;  %v4296_v7 = vpack.c.bf16 %v4280_v49, %v4279_v48  ;;  %v2542_v24 = vld [vmem:[#allocation2 + $0x5c] sm:$0xf] }
 0x1e2   : > { %v1859_v44 = vpop.permute.xlu0 %1858  ;;  %5715 = vmatmul.mubr.msk.bf16.gmra.mxu1 %vm4298_vm4, %v4292_v2  ;;  %v3092_v52 = vld [vmem:[#allocation2 + $0x30] sm:$0xf] }
 0x1e3   : > { %v3565_v59 = vpop.permute.xlu1 %3564  ;;  %v5788_v38 = vld [vmem:[#allocation2 + $0x20] sm:$0xff]   ;;  %1958 = vst.msk [vmem:[#allocation2 + $0x74] sm:$0xf] %vm8159_vm7, %v1859_v44  ;;  %5718 = vmatprep.mubr.msk.bf16.mxu1 %vm4298_vm4, %v4293_v56  ;;  %v3096_v44 = vld [vmem:[#allocation2 + $0x38] sm:$0xf] }
 0x1e4   : > { %3656 = vst.msk [vmem:[#allocation2 + $0x28] sm:$0xf] %vm8158_vm12, %v3565_v59  ;;  %3590 = vrot.lane.b32.xlu0 %v5611_v53, %s5900_s11  ;;  %5668 = vmatprep.mubr.msk.bf16.mxu0 %vm3828_vm0, %v5788_v38  ;;  %vm8161_vm12 = vmmov %vm8160_vm2 }
 0x1e5   : > { %3588 = vrot.lane.b32.xlu1 %v5610_v27, %s5900_s11  ;;  %v5615_v27 = vpack.c.bf16 %v5249_v17, %v5249_v17 }
 0x1e6   : > { %v1845_v47 = vpop.permute.xlu0 %1844 }
 0x1e7   : > { %v2150_v15 = vpop.permute.xlu1 %2149  ;;  %v1944_v5 = vsel %vm6838_vm10, %v1845_v47, %v1943_v41  ;;  %v5617_v47 = vpack.c.bf16 %v5251_v6, %v5251_v6 }
 0x1e8   : > { %2217 = vst.msk [vmem:[#allocation2 + $0x74] sm:$0xf] %vm2187_vm5, %v2150_v15  ;;  %1945 = vst [vmem:[#allocation2 + $0x58] sm:$0xf] %v1944_v5  ;;  %1860 = vrot.lane.b32.xlu0 %v7531_v11, %s5894_s16  ;;  %s5901_s16 = smov [#allocation5]  }
 0x1e9   : > { %2151 = vrot.lane.b32.xlu1 %v7279_v18, %s5896_s17  ;;  %s7675_s17 = scalar_lea.vmem %s8097_s3, %s5997_s10 }
 0x1ea   : > { %v2132_v54 = vpop.permute.xlu0 %2131  ;;  %5719 = vmatmul.mubr.msk.bf16.gmra.mxu1 %vm4298_vm4, %v4294_v34  ;;  %v1363_v34 = vld [vmem:[#allocation2 + $0x7c] sm:$0xf] }
 0x1eb   : > { %v2441_v61 = vpop.permute.xlu1 %2440  ;;  %v5789_v8 = vld [vmem:[#allocation2 + $0x28] sm:$0xff]   ;;  %2208 = vst.msk [vmem:[#allocation2 + $0x50] sm:$0xf] %vm2187_vm5, %v2132_v54  ;;  %5722 = vmatprep.mubr.msk.bf16.mxu1 %vm4298_vm4, %v4295_v22  ;;  %v3665_v54 = vld [vmem:[#allocation2 + $0x3c] sm:$0xf] }
 0x1ec   : > { %v2539_v32 = vsel %vm6893_vm13, %v2441_v61, %v2538_v21  ;;  %2460 = vrot.lane.b32.xlu0 %v5527_v19, %s5897_s18  ;;  %5669 = vmatmul.mubr.msk.bf16.gmra.mxu0 %vm3828_vm0, %v5789_v8 }
 0x1ed   : > { %2540 = vst [vmem:[#allocation2 + $0x54] sm:$0xf] %v2539_v32  ;;  %2458 = vrot.lane.b32.xlu1 %v7547_v30, %s5897_s18  ;;  %s5804_s18 = sshll.u32 %s5901_s16, 4  ;;  %s5805_s18 = int_to_ptr.vmem [resolvable:$false] %s5804_s18 }
 0x1ee   : > { %v2136_v26 = vpop.permute.xlu0 %2135 }
 0x1ef   : > { %v2264_v1 = vld [vmem:[#allocation2 + $0x74] sm:$0x8]  ;;  %v2439_v10 = vpop.permute.xlu1 %2438  ;;  %2210 = vst.msk [vmem:[#allocation2 + $0x58] sm:$0xf] %vm2187_vm5, %v2136_v26 }
 0x1f0   : > { %v2265_v31 = vsel %vm6818_vm8, 0, %v2264_v1  ;;  %2537 = vst.msk [vmem:[#allocation2 + $0x50] sm:$0xf] %vm8160_vm2, %v2439_v10  ;;  %3024 = vrot.lane.b32.xlu0 %v7313_v43, %s5898_s19  ;;  %v5612_v43 = vpack.c.bf16 %v5246_v23, %v5246_v23  ;;  %vm8164_vm2 = vcmask 290048   ;;  %v1951_v10 = vld [vmem:[#allocation2 + $0x68] sm:$0xf] }
 0x1f1   : > { %2266 = vst [vmem:[#allocation2 + $0x74] sm:$0x8] %v2265_v31  ;;  %3028 = vrot.lane.b32.xlu1 %v7432_v60, %s5898_s19  ;;  %v5584_v60 = vpack.c.bf16 %v5188_v35, %v5188_v35  ;;  %v1947_v35 = vld [vmem:[#allocation2 + $0x60] sm:$0xf]  ;;  %v2546_v23 = vld [vmem:[#allocation2 + $0x64] sm:$0xf] }
 0x1f2   : > { %v2445_v14 = vpop.permute.xlu0 %2444  ;;  %5723 = vmatmul.mubr.msk.bf16.gmra.mxu1 %vm4298_vm4, %v4296_v7  ;;  %vm8162_vm4 = vcmask 224448  }
 0x1f3   : > { %v2443_v16 = vpop.permute.xlu1 %2442  ;;  %v2543_v50 = vsel %vm6893_vm13, %v2445_v14, %v2542_v24  ;;  %vm8163_vm7 = vmmov %vm8162_vm4 }
 0x1f4   : > { %2541 = vst.msk [vmem:[#allocation2 + $0x58] sm:$0xf] %vm8161_vm12, %v2443_v16  ;;  %2544 = vst [vmem:[#allocation2 + $0x5c] sm:$0xf] %v2543_v50  ;;  %3299 = vrot.lane.b32.xlu0 %v5582_v58, %s5899_s20 }
 0x1f5   : > { %3594 = vrot.lane.b32.xlu1 %v5613_v40, %s5900_s11  ;;  %vm8166_vm12 = vmmov %vm8164_vm2 }
 0x1f6   : > { %v3001_v42 = vpop.permute.xlu0 %3000 }
 0x1f7   : > { %v2597_v57 = vld [vmem:[#allocation2 + $0x50] sm:$0x1]  ;;  %v3019_v0 = vpop.permute.xlu1 %3018  ;;  %v3093_v2 = vsel %vm7128_vm11, %v3001_v42, %v3092_v52 }
 0x1f8   : > { %v2598_v13 = vsel %vm6928_vm9, 0, %v2597_v57  ;;  %3111 = vst.msk [vmem:[#allocation2 + $0x54] sm:$0xf] %vm8162_vm4, %v3019_v0  ;;  %3094 = vst [vmem:[#allocation2 + $0x30] sm:$0xf] %v3093_v2  ;;  %3303 = vrot.lane.b32.xlu0 %v5584_v60, %s5899_s20  ;;  %vm8167_vm4 = vcmask 126048  }
 0x1f9   : > { %2599 = vst [vmem:[#allocation2 + $0x50] sm:$0x1] %v2598_v13  ;;  %3592 = vrot.lane.b32.xlu1 %v5612_v43, %s5900_s11  ;;  %v2550_v57 = vld [vmem:[#allocation2 + $0x6c] sm:$0xf] }
 0x1fa   : > { %v3005_v59 = vpop.permute.xlu0 %3004 }
 0x1fb   : > { %v2600_v53 = vld [vmem:[#allocation2 + $0x58] sm:$0x1]  ;;  %v3023_v20 = vpop.permute.xlu1 %3022  ;;  %v3097_v25 = vsel %vm7128_vm11, %v3005_v59, %v3096_v44 }
 0x1fc   : > { %v2601_v38 = vsel %vm6928_vm9, 0, %v2600_v53  ;;  %3115 = vst.msk [vmem:[#allocation2 + $0x5c] sm:$0xf] %vm8163_vm7, %v3023_v20  ;;  %3098 = vst [vmem:[#allocation2 + $0x38] sm:$0xf] %v3097_v25  ;;  %3598 = vrot.lane.b32.xlu0 %v5615_v27, %s5900_s11 }
 0x1fd   : > { %2602 = vst [vmem:[#allocation2 + $0x58] sm:$0x1] %v2601_v38  ;;  %3596 = vrot.lane.b32.xlu1 %v7300_v36, %s5900_s11  ;;  %v3100_v27 = vld [vmem:[#allocation2 + $0x40] sm:$0xf]  ;;  %v3104_v38 = vld [vmem:[#allocation2 + $0x48] sm:$0xf] }
 0x1fe   : > { %v3294_v15 = vpop.permute.xlu0 %3293 }
 0x1ff   : > { %v3276_v62 = vpop.permute.xlu1 %3275  ;;  %3362 = vst.msk [vmem:[#allocation2 + $0x54] sm:$0xf] %vm3128_vm15, %v3294_v15 }
 0x200   : > { %3353 = vst.msk [vmem:[#allocation2 + $0x30] sm:$0xf] %vm3128_vm15, %v3276_v62  ;;  %3032 = vrot.lane.b32.xlu0 %v7531_v11, %s5898_s19  ;;  %s5806_s19 = scalar_lea.vmem %s5805_s18, 64 }
 0x201   : > { %3307 = vrot.lane.b32.xlu1 %v7279_v18, %s5899_s20  ;;  %s7763_s20 = scalar_lea.vmem %s8099_s5, %s5997_s10  ;;  %s7937_s10 = sand.u32 1, %s5882_s22  }
 0x202   : > { %v3298_v56 = vpop.permute.xlu0 %3297  ;;  %s4908_s28 = sshll.u32 %s7937_s10, 1  ;;  %s4731_s26 = scalar_lea.sflag [#allocation6], %s7937_s10 }
 0x203   : > { %v3571_v41 = vpop.permute.xlu1 %3570  ;;  %3364 = vst.msk [vmem:[#allocation2 + $0x5c] sm:$0xf] %vm3128_vm15, %v3298_v56  ;;  %s269_s29 = scalar_lea.vmem [#allocation5], %s4908_s28 }
 0x204   : > { %v3662_v36 = vsel %vm7172_vm6, %v3571_v41, %v3661_v45  ;;  %3602 = vrot.lane.b32.xlu0 %v5617_v47, %s5900_s11  ;;  %v3669_v41 = vld [vmem:[#allocation2 + $0x44] sm:$0xf]  ;;  %s4763_s15 = sshll.u32 %s269_s29, 4  ;;  %s4764_s15 = int_to_ptr.vmem [resolvable:$true] %s4763_s15 }
 0x205   : > { %3663 = vst [vmem:[#allocation2 + $0x34] sm:$0xf] %v3662_v36  ;;  %3600 = vrot.lane.b32.xlu1 %v7547_v30, %s5900_s11  ;;  %s5800_s13 = scalar_lea.vmem %s4764_s15, 32  ;;  %p5807_p0 = scmp.lt.s32.totalorder %s4764_s15, %s5805_s18 }
 0x206   : > { %v3406_v12 = vld [vmem:[#allocation2 + $0x54] sm:$0x8]  ;;  %v1272_v5 = vpop.permute.xlu0 %1271  ;;  %p5801_p11 = scmp.ne.s32.totalorder %s4764_s15, %s5800_s13  ;;  %p5808_p1 = scmp.lt.s32.totalorder %s5806_s19, %s5800_s13 }
 0x207   : > { %v3280_v11 = vpop.permute.xlu1 %3279  ;;  %v3407_v18 = vsel %vm6954_vm3, 0, %v3406_v12  ;;  %v1364_v19 = vsel %vm6644_vm1, %v1272_v5, %v1363_v34  ;;  %vm8165_vm1 = vcmask 93248  }
 0x208   : > { %3355 = vst.msk [vmem:[#allocation2 + $0x38] sm:$0xf] %vm3128_vm15, %v3280_v11  ;;  %3408 = vst [vmem:[#allocation2 + $0x54] sm:$0x8] %v3407_v18  ;;  %p5802_p12 = pnand %p5801_p11, %p5976_p5  ;;  %p5809_p2 = por %p5808_p1, %p5807_p0 }
 0x209   : > { %1365 = vst [vmem:[#allocation2 + $0x7c] sm:$0xf] %v1364_v19  ;;  %v1955_v19 = vld [vmem:[#allocation2 + $0x70] sm:$0xf] }
 0x20a   : > { %v3409_v61 = vld [vmem:[#allocation2 + $0x5c] sm:$0x8]  ;;  %v3569_v8 = vpop.permute.xlu0 %3568  ;;  %p5803_p13 = pneg %p5802_p12 }
 0x20b   : > { %v3575_v21 = vpop.permute.xlu1 %3574  ;;  %v3410_v30 = vsel %vm6954_vm3, 0, %v3409_v61  ;;  %3660 = vst.msk [vmem:[#allocation2 + $0x30] sm:$0xf] %vm8164_vm2, %v3569_v8  ;;  %vm8170_vm2 = vcmask 224448  }
 0x20c   : > { %v3666_v32 = vsel %vm7172_vm6, %v3575_v21, %v3665_v54  ;;  %3411 = vst [vmem:[#allocation2 + $0x5c] sm:$0x8] %v3410_v30  ;;  %v3673_v21 = vld [vmem:[#allocation2 + $0x4c] sm:$0xf]  ;;  %p5810_p3 = pnand %p5809_p2, %p5803_p13 }
 0x20d   : > { %3667 = vst [vmem:[#allocation2 + $0x3c] sm:$0xf] %v3666_v32 }
 0x20e   : > { %v1270_v51 = vpop.permute.xlu0 %1269 }
 0x20f   : > { %v1849_v37 = vpop.permute.xlu1 %1848  ;;  %1362 = vst.msk [vmem:[#allocation2 + $0x78] sm:$0xf] %vm8165_vm1, %v1270_v51  ;;  %vm8172_vm1 = vmmov %vm8166_vm12 }
 0x210   : > { %v1948_v33 = vsel %vm6838_vm10, %v1849_v37, %v1947_v35 }
 0x211   : > { %1949 = vst [vmem:[#allocation2 + $0x60] sm:$0xf] %v1948_v33 }
 0x212   : > { %v3573_v26 = vpop.permute.xlu0 %3572  ;;  %v5790_v22 = vld [vmem:[#allocation2 + $0x30] sm:$0xff]  }
 0x213   : > { %v1853_v1 = vpop.permute.xlu1 %1852  ;;  %3664 = vst.msk [vmem:[#allocation2 + $0x38] sm:$0xf] %vm8166_vm12, %v3573_v26  ;;  %5672 = vmatprep.mubr.msk.bf16.mxu0 %vm3828_vm0, %v5790_v22  ;;  %vm8173_vm12 = vmmov %vm8172_vm1 }
 0x214   : > { %v1952_v48 = vsel %vm6838_vm10, %v1853_v1, %v1951_v10  ;;  %v2554_v1 = vld [vmem:[#allocation2 + $0x74] sm:$0xf] }
 0x215   : > { %1953 = vst [vmem:[#allocation2 + $0x68] sm:$0xf] %v1952_v48 }
 0x216   : > { %v1413_v49 = vld [vmem:[#allocation2 + $0x78] sm:$0x1]  ;;  %v1863_v7 = vpop.permute.xlu0 %1862 }
 0x217   : > { %v2140_v31 = vpop.permute.xlu1 %2139  ;;  %v1414_v40 = vsel %vm6480_vm14, 0, %v1413_v49  ;;  %1962 = vst.msk [vmem:[#allocation2 + $0x7c] sm:$0xf] %vm8167_vm4, %v1863_v7  ;;  %vm8168_vm14 = vcmask 191648   ;;  %v3108_v49 = vld [vmem:[#allocation2 + $0x50] sm:$0xf] }
 0x218   : > { %2212 = vst.msk [vmem:[#allocation2 + $0x60] sm:$0xf] %vm2187_vm5, %v2140_v31  ;;  %1415 = vst [vmem:[#allocation2 + $0x78] sm:$0x1] %v1414_v40 }
 0x219   : > { %vm8169_vm7 = vmmov %vm8168_vm14 }
 0x21a   : > { %v2154_v16 = vpop.permute.xlu0 %2153  ;;  %v5791_v14 = vld [vmem:[#allocation2 + $0x38] sm:$0xff]   ;;  %vm8174_vm4 = vmmov %vm8169_vm7 }
 0x21b   : > { %v2449_v58 = vpop.permute.xlu1 %2448  ;;  %2219 = vst.msk [vmem:[#allocation2 + $0x7c] sm:$0xf] %vm2187_vm5, %v2154_v16  ;;  %5673 = vmatmul.mubr.msk.bf16.gmra.mxu0 %vm3828_vm0, %v5791_v14 }
 0x21c   : > { %v2547_v24 = vsel %vm6893_vm13, %v2449_v58, %v2546_v23 }
 0x21d   : > { %2548 = vst [vmem:[#allocation2 + $0x64] sm:$0xf] %v2547_v24 }
 0x21e   : > { %v2144_v46 = vpop.permute.xlu0 %2143 }
 0x21f   : > { %v2447_v50 = vpop.permute.xlu1 %2446  ;;  %2214 = vst.msk [vmem:[#allocation2 + $0x68] sm:$0xf] %vm2187_vm5, %v2144_v46 }
 0x220   : > { %2545 = vst.msk [vmem:[#allocation2 + $0x60] sm:$0xf] %vm8168_vm14, %v2447_v50  ;;  %vm4042_vm14 = vcmask 64512   ;;  %v3112_v50 = vld [vmem:[#allocation2 + $0x58] sm:$0xf] }
 0x222   : > { %v2267_v43 = vld [vmem:[#allocation2 + $0x7c] sm:$0x8]  ;;  %v2453_v17 = vpop.permute.xlu0 %2452 }
 0x223   : > { %v2451_v60 = vpop.permute.xlu1 %2450  ;;  %v2268_v0 = vsel %vm6818_vm8, 0, %v2267_v43  ;;  %v2551_v42 = vsel %vm6893_vm13, %v2453_v17, %v2550_v57  ;;  %vm8171_vm8 = vmmov %vm8170_vm2 }
 0x224   : > { %2549 = vst.msk [vmem:[#allocation2 + $0x68] sm:$0xf] %vm8169_vm7, %v2451_v60  ;;  %2269 = vst [vmem:[#allocation2 + $0x7c] sm:$0x8] %v2268_v0 }
 0x225   : > { %2552 = vst [vmem:[#allocation2 + $0x6c] sm:$0xf] %v2551_v42  ;;  %vm8175_vm7 = vmmov %vm8170_vm2 }
 0x226   : > { %v3009_v2 = vpop.permute.xlu0 %3008 }
 0x227   : > { %v2603_v52 = vld [vmem:[#allocation2 + $0x60] sm:$0x1]  ;;  %v3027_v13 = vpop.permute.xlu1 %3026  ;;  %v3101_v55 = vsel %vm7128_vm11, %v3009_v2, %v3100_v27 }
 0x228   : > { %v2604_v53 = vsel %vm6928_vm9, 0, %v2603_v52  ;;  %3119 = vst.msk [vmem:[#allocation2 + $0x64] sm:$0xf] %vm8170_vm2, %v3027_v13  ;;  %3102 = vst [vmem:[#allocation2 + $0x40] sm:$0xf] %v3101_v55 }
 0x229   : > { %2605 = vst [vmem:[#allocation2 + $0x60] sm:$0x1] %v2604_v53  ;;  %vm8176_vm2 = vmmov %vm8172_vm1 }
 0x22a   : > { %v3013_v44 = vpop.permute.xlu0 %3012 }
 0x22b   : > { %v2606_v20 = vld [vmem:[#allocation2 + $0x68] sm:$0x1]  ;;  %v3031_v59 = vpop.permute.xlu1 %3030  ;;  %v3105_v6 = vsel %vm7128_vm11, %v3013_v44, %v3104_v38 }
 0x22c   : > { %v2607_v25 = vsel %vm6928_vm9, 0, %v2606_v20  ;;  %3123 = vst.msk [vmem:[#allocation2 + $0x6c] sm:$0xf] %vm8171_vm8, %v3031_v59  ;;  %3106 = vst [vmem:[#allocation2 + $0x48] sm:$0xf] %v3105_v6 }
 0x22d   : > { %2608 = vst [vmem:[#allocation2 + $0x68] sm:$0x1] %v2607_v25  ;;  %v3677_v20 = vld [vmem:[#allocation2 + $0x54] sm:$0xf]  ;;  %vm8177_vm8 = vmmov %vm8172_vm1 }
 0x22e   : > { %v3302_v15 = vpop.permute.xlu0 %3301 }
 0x22f   : > { %v3284_v62 = vpop.permute.xlu1 %3283  ;;  %3366 = vst.msk [vmem:[#allocation2 + $0x64] sm:$0xf] %vm3128_vm15, %v3302_v15 }
 0x230   : > { %3357 = vst.msk [vmem:[#allocation2 + $0x40] sm:$0xf] %vm3128_vm15, %v3284_v62 }
 0x232   : > { %v3306_v45 = vpop.permute.xlu0 %3305 }
 0x233   : > { %v3579_v47 = vpop.permute.xlu1 %3578  ;;  %3368 = vst.msk [vmem:[#allocation2 + $0x6c] sm:$0xf] %vm3128_vm15, %v3306_v45 }
 0x234   : > { %v3670_v56 = vsel %vm7172_vm6, %v3579_v47, %v3669_v41 }
 0x235   : > { %3671 = vst [vmem:[#allocation2 + $0x44] sm:$0xf] %v3670_v56 }
 0x236   : > { %v3412_v36 = vld [vmem:[#allocation2 + $0x64] sm:$0x8]  ;;  %v3288_v11 = vpop.permute.xlu0 %3287 }
 0x237   : > { %v3577_v12 = vpop.permute.xlu1 %3576  ;;  %v3413_v5 = vsel %vm6954_vm3, 0, %v3412_v36  ;;  %3359 = vst.msk [vmem:[#allocation2 + $0x48] sm:$0xf] %vm3128_vm15, %v3288_v11 }
 0x238   : > { %3668 = vst.msk [vmem:[#allocation2 + $0x40] sm:$0xf] %vm8172_vm1, %v3577_v12  ;;  %3414 = vst [vmem:[#allocation2 + $0x64] sm:$0x8] %v3413_v5 }
 0x239   : > { %vm8178_vm1 = vmmov %vm8174_vm4 }
 0x23a   : > { %v3415_v34 = vld [vmem:[#allocation2 + $0x6c] sm:$0x8]  ;;  %v3583_v61 = vpop.permute.xlu0 %3582 }
 0x23b   : > { %v1857_v18 = vpop.permute.xlu1 %1856  ;;  %v3416_v54 = vsel %vm6954_vm3, 0, %v3415_v34  ;;  %v3674_v30 = vsel %vm7172_vm6, %v3583_v61, %v3673_v21 }
 0x23c   : > { %v1956_v8 = vsel %vm6838_vm10, %v1857_v18, %v1955_v19  ;;  %3417 = vst [vmem:[#allocation2 + $0x6c] sm:$0x8] %v3416_v54  ;;  %3675 = vst [vmem:[#allocation2 + $0x4c] sm:$0xf] %v3674_v30  ;;  %v3681_v18 = vld [vmem:[#allocation2 + $0x5c] sm:$0xf] }
 0x23d   : > { %1957 = vst [vmem:[#allocation2 + $0x70] sm:$0xf] %v1956_v8  ;;  %v1959_v54 = vld [vmem:[#allocation2 + $0x78] sm:$0xf] }
 0x23e   : > { %v3581_v37 = vpop.permute.xlu0 %3580 }
 0x23f   : > { %v2148_v32 = vpop.permute.xlu1 %2147  ;;  %v5792_v35 = vld [vmem:[#allocation2 + $0x40] sm:$0xff]   ;;  %3672 = vst.msk [vmem:[#allocation2 + $0x48] sm:$0xf] %vm8173_vm12, %v3581_v37  ;;  %vm8179_vm12 = vmmov %vm8175_vm7 }
 0x240   : > { %2216 = vst.msk [vmem:[#allocation2 + $0x70] sm:$0xf] %vm2187_vm5, %v2148_v32  ;;  %5676 = vmatprep.mubr.msk.bf16.mxu0 %vm3828_vm0, %v5792_v35  ;;  %v2558_v35 = vld [vmem:[#allocation2 + $0x7c] sm:$0xf] }
 0x242   : > { %v2457_v33 = vpop.permute.xlu0 %2456 }
 0x243   : > { %v2455_v51 = vpop.permute.xlu1 %2454  ;;  %v2555_v10 = vsel %vm6893_vm13, %v2457_v33, %v2554_v1  ;;  %v5662_v26 = vpop.f32.mrf.mxu0  ;;  %v3120_v1 = vld [vmem:[#allocation2 + $0x68] sm:$0xf] }
 0x244   : > { %2553 = vst.msk [vmem:[#allocation2 + $0x70] sm:$0xf] %vm8174_vm4, %v2455_v51  ;;  %2556 = vst [vmem:[#allocation2 + $0x74] sm:$0xf] %v2555_v10  ;;  %v4146_v17 = vmul.f32 %v5662_v26, %v5662_v26  ;;  %v4078_v13 = vsel %vm4042_vm14, %v5662_v26, 0.0 }
 0x245   : > { %4045 = vst.msk [vmem:[%s7675_s17 + $0x10] sm:$0xff] %vm4042_vm14, %v5662_v26  ;;  %v3915_v40 = vpop.f32.mrf.mxu0  ;;  %v3116_v26 = vld [vmem:[#allocation2 + $0x60] sm:$0xf]  ;;  %vm8183_vm4 = vmmov %vm8176_vm2 }
 0x246   : > { %v3017_v48 = vpop.permute.xlu0 %3016  ;;  %v5793_v31 = vld [vmem:[#allocation2 + $0x48] sm:$0xff]   ;;  %4043 = vst.msk [vmem:[%s7675_s17] sm:$0xff] %vm4042_vm14, %v3915_v40  ;;  %v4144_v16 = vmul.f32 %v3915_v40, %v3915_v40  ;;  %v4075_v57 = vsel %vm4042_vm14, %v3915_v40, 0.0  ;;  %v4179_v6 = vsel %vm4042_vm14, %v4146_v17, 0.0 }
 0x247   : > { %v3035_v22 = vpop.permute.xlu1 %3034  ;;  %v3109_v7 = vsel %vm7128_vm11, %v3017_v48, %v3108_v49  ;;  %5677 = vmatmul.mubr.msk.bf16.gmra.mxu0 %vm3828_vm0, %v5793_v31  ;;  %v5663_v58 = vpop.f32.mrf.mxu0  ;;  %v3685_v49 = vld [vmem:[#allocation2 + $0x64] sm:$0xf] }
 0x248   : > { %3127 = vst.msk [vmem:[#allocation2 + $0x74] sm:$0xf] %vm8175_vm7, %v3035_v22  ;;  %3110 = vst [vmem:[#allocation2 + $0x50] sm:$0xf] %v3109_v7  ;;  %v4176_v2 = vsel %vm4042_vm14, %v4144_v16, 0.0  ;;  %v4147_v27 = vmul.f32 %v5663_v58, %v5663_v58  ;;  %v4080_v62 = vsel %vm4042_vm14, %v5663_v58, 0.0 }
 0x249   : > { %4046 = vst.msk [vmem:[%s7675_s17 + $0x18] sm:$0xff] %vm4042_vm14, %v5663_v58  ;;  %v3918_v60 = vpop.f32.mrf.mxu0 }
 0x24a   : > { %v3021_v24 = vpop.permute.xlu0 %3020  ;;  %4044 = vst.msk [vmem:[%s7675_s17 + $0x8] sm:$0xff] %vm4042_vm14, %v3918_v60  ;;  %v4076_v0 = vsel %vm4042_vm14, %v3918_v60, 0.0  ;;  %v4145_v42 = vmul.f32 %v3918_v60, %v3918_v60  ;;  %v4181_v41 = vsel %vm4042_vm14, %v4147_v27, 0.0 }
 0x24b   : > { %v2609_v23 = vld [vmem:[#allocation2 + $0x70] sm:$0x1]  ;;  %v3310_v14 = vpop.permute.xlu1 %3309  ;;  %v3113_v43 = vsel %vm7128_vm11, %v3021_v24, %v3112_v50  ;;  %v4077_v52 = vadd.f32 %v4076_v0, %v4075_v57  ;;  %v3689_v50 = vld [vmem:[#allocation2 + $0x6c] sm:$0xf] }
 0x24c   : > { %v2610_v46 = vsel %vm6928_vm9, 0, %v2609_v23  ;;  %3370 = vst.msk [vmem:[#allocation2 + $0x74] sm:$0xf] %vm3128_vm15, %v3310_v14  ;;  %3114 = vst [vmem:[#allocation2 + $0x58] sm:$0xf] %v3113_v43  ;;  %v4177_v53 = vsel %vm4042_vm14, %v4145_v42, 0.0 }
 0x24d   : > { %2611 = vst [vmem:[#allocation2 + $0x70] sm:$0x1] %v2610_v46  ;;  %v4079_v44 = vadd.f32 %v4078_v13, %v4077_v52  ;;  %v4178_v38 = vadd.f32 %v4177_v53, %v4176_v2 }
 0x24e   : > { %v3292_v59 = vpop.permute.xlu0 %3291 }
 0x24f   : > { %v3587_v55 = vpop.permute.xlu1 %3586  ;;  %3361 = vst.msk [vmem:[#allocation2 + $0x50] sm:$0xf] %vm3128_vm15, %v3292_v59  ;;  %v4180_v15 = vadd.f32 %v4179_v6, %v4178_v38  ;;  %v7704_v47 = vadd.f32 %v4080_v62, %v4079_v44 }
 0x250   : > { %v3678_v25 = vsel %vm7172_vm6, %v3587_v55, %v3677_v20 }
 0x251   : > { %3679 = vst [vmem:[#allocation2 + $0x54] sm:$0xf] %v3678_v25  ;;  %v7711_v11 = vadd.f32 %v4181_v41, %v4180_v15 }
 0x252   : > { %v3296_v36 = vpop.permute.xlu0 %3295 }
 0x253   : > { %v3418_v45 = vld [vmem:[#allocation2 + $0x74] sm:$0x8]  ;;  %v3585_v56 = vpop.permute.xlu1 %3584  ;;  %3363 = vst.msk [vmem:[#allocation2 + $0x58] sm:$0xf] %vm3128_vm15, %v3296_v36 }
 0x254   : > { %v3419_v12 = vsel %vm6954_vm3, 0, %v3418_v45  ;;  %3676 = vst.msk [vmem:[#allocation2 + $0x50] sm:$0xf] %vm8176_vm2, %v3585_v56  ;;  %v3124_v60 = vld [vmem:[#allocation2 + $0x70] sm:$0xf] }
 0x255   : > { %3420 = vst [vmem:[#allocation2 + $0x74] sm:$0x8] %v3419_v12 }
 0x256   : > { %v3591_v34 = vpop.permute.xlu0 %3590 }
 0x257   : > { %v3589_v5 = vpop.permute.xlu1 %3588  ;;  %v3682_v19 = vsel %vm7172_vm6, %v3591_v34, %v3681_v18 }
 0x258   : > { %3680 = vst.msk [vmem:[#allocation2 + $0x58] sm:$0xf] %vm8177_vm8, %v3589_v5  ;;  %3683 = vst [vmem:[#allocation2 + $0x5c] sm:$0xf] %v3682_v19 }
 0x25a   : > { %v1861_v21 = vpop.permute.xlu0 %1860 }
 0x25b   : > { %v2152_v61 = vpop.permute.xlu1 %2151  ;;  %v5794_v8 = vld [vmem:[#allocation2 + $0x50] sm:$0xff]   ;;  %v1960_v30 = vsel %vm6838_vm10, %v1861_v21, %v1959_v54  ;;  %vm8180_vm10 = vmmov %vm8175_vm7 }
 0x25c   : > { %1961 = vst [vmem:[#allocation2 + $0x78] sm:$0xf] %v1960_v30  ;;  %5680 = vmatprep.mubr.msk.bf16.mxu0 %vm3828_vm0, %v5794_v8  ;;  %v3693_v42 = vld [vmem:[#allocation2 + $0x74] sm:$0xf] }
 0x25d   : > { %2218 = vst.msk [vmem:[#allocation2 + $0x78] sm:$0xf] %vm2187_vm5, %v2152_v61  ;;  %vm8181_vm5 = vmmov %vm8176_vm2 }
 0x25e   : > { %v2461_v37 = vpop.permute.xlu0 %2460 }
 0x25f   : > { %v2459_v32 = vpop.permute.xlu1 %2458  ;;  %v2559_v51 = vsel %vm6893_vm13, %v2461_v37, %v2558_v35  ;;  %v5795_v33 = vld [vmem:[#allocation2 + $0x58] sm:$0xff]   ;;  %vm8182_vm13 = vmmov %vm8176_vm2 }
 0x260   : > { %2557 = vst.msk [vmem:[#allocation2 + $0x78] sm:$0xf] %vm8178_vm1, %v2459_v32  ;;  %2560 = vst [vmem:[#allocation2 + $0x7c] sm:$0xf] %v2559_v51  ;;  %5681 = vmatmul.mubr.msk.bf16.gmra.mxu0 %vm3828_vm0, %v5795_v33 }
 0x261   : > { %2563 = vst.msk [vmem:[#allocation2 + $0x78] sm:$0xf] %vm8179_vm12, %v5895_v4 }
 0x262   : > { %2564 = vst.msk [vmem:[#allocation2 + $0x7c] sm:$0xf] %vm8180_vm10, %v5895_v4  ;;  %v3025_v10 = vpop.permute.xlu0 %3024 }
 0x263   : > { %3130 = vst.msk [vmem:[#allocation2 + $0x7c] sm:$0xf] %vm3128_vm15, %v5895_v4  ;;  %v3029_v29 = vpop.permute.xlu1 %3028  ;;  %v3117_v22 = vsel %vm7128_vm11, %v3025_v10, %v3116_v26 }
 0x264   : > { %3373 = vst.msk [vmem:[#allocation2 + $0x7c] sm:$0xf] %vm8181_vm5, %v5895_v4  ;;  %v3121_v63 = vsel %vm7128_vm11, %v3029_v29, %v3120_v1  ;;  %3118 = vst [vmem:[#allocation2 + $0x60] sm:$0xf] %v3117_v22 }
 0x265   : > { %3122 = vst [vmem:[#allocation2 + $0x68] sm:$0xf] %v3121_v63 }
 0x266   : > { %v3300_v31 = vpop.permute.xlu0 %3299 }
 0x267   : > { %v3595_v48 = vpop.permute.xlu1 %3594  ;;  %3365 = vst.msk [vmem:[#allocation2 + $0x60] sm:$0xf] %vm3128_vm15, %v3300_v31 }
 0x268   : > { %v2612_v7 = vld [vmem:[#allocation2 + $0x78] sm:$0x1]  ;;  %v3686_v40 = vsel %vm7172_vm6, %v3595_v48, %v3685_v49 }
 0x269   : > { %v2613_v58 = vsel %vm6928_vm9, 0, %v2612_v7  ;;  %3687 = vst [vmem:[#allocation2 + $0x64] sm:$0xf] %v3686_v40  ;;  %vm8184_vm9 = vmmov %vm8176_vm2 }
 0x26a   : > { %2614 = vst [vmem:[#allocation2 + $0x78] sm:$0x1] %v2613_v58  ;;  %v3304_v14 = vpop.permute.xlu0 %3303 }
 0x26b   : > { %3129 = vst.msk [vmem:[#allocation2 + $0x78] sm:$0xf] %vm3128_vm15, %v5895_v4  ;;  %v3421_v23 = vld [vmem:[#allocation2 + $0x7c] sm:$0x8]  ;;  %v3593_v16 = vpop.permute.xlu1 %3592  ;;  %3367 = vst.msk [vmem:[#allocation2 + $0x68] sm:$0xf] %vm3128_vm15, %v3304_v14 }
 0x26c   : > { %3372 = vst.msk [vmem:[#allocation2 + $0x78] sm:$0xf] %vm8182_vm13, %v5895_v4  ;;  %v3422_v24 = vsel %vm6954_vm3, 0, %v3421_v23  ;;  %vm8185_vm3 = vmmov %vm8176_vm2 }
 0x26d   : > { %3684 = vst.msk [vmem:[#allocation2 + $0x60] sm:$0xf] %vm8183_vm4, %v3593_v16  ;;  %3423 = vst [vmem:[#allocation2 + $0x7c] sm:$0x8] %v3422_v24 }
 0x26e   : > { %v3599_v39 = vpop.permute.xlu0 %3598 }
 0x26f   : > { %v3597_v46 = vpop.permute.xlu1 %3596  ;;  %v3690_v43 = vsel %vm7172_vm6, %v3599_v39, %v3689_v50 }
 0x270   : > { %3688 = vst.msk [vmem:[#allocation2 + $0x68] sm:$0xf] %vm8184_vm9, %v3597_v46  ;;  %3691 = vst [vmem:[#allocation2 + $0x6c] sm:$0xf] %v3690_v43 }
 0x272   : > { %v3033_v4 = vpop.permute.xlu0 %3032 }
 0x273   : > { %v3308_v17 = vpop.permute.xlu1 %3307  ;;  %v3125_v57 = vsel %vm7128_vm11, %v3033_v4, %v3124_v60 }
 0x274   : > { %v5796_v28 = vld [vmem:[#allocation2 + $0x60] sm:$0xff]   ;;  %3126 = vst [vmem:[#allocation2 + $0x70] sm:$0xf] %v3125_v57  ;;  %v5799_v62 = vld [vmem:[#allocation2 + $0x78] sm:$0xff]  }
 0x275   : > { %5684 = vmatprep.mubr.msk.bf16.mxu0 %vm3828_vm0, %v5796_v28  ;;  %3369 = vst.msk [vmem:[#allocation2 + $0x70] sm:$0xf] %vm3128_vm15, %v3308_v17  ;;  %vm4245_vm15 = vcmask 1040384  }
 0x276   : > { %v3603_v0 = vpop.permute.xlu0 %3602 }
 0x277   : > { %v3601_v52 = vpop.permute.xlu1 %3600  ;;  %v3694_v13 = vsel %vm7172_vm6, %v3603_v0, %v3693_v42  ;;  %v5797_v2 = vld [vmem:[#allocation2 + $0x68] sm:$0xff]   ;;  %vm4247_vm6 = vcmask 58368  }
 0x278   : > { %3692 = vst.msk [vmem:[#allocation2 + $0x70] sm:$0xf] %vm8185_vm3, %v3601_v52  ;;  %3695 = vst [vmem:[#allocation2 + $0x74] sm:$0xf] %v3694_v13  ;;  %v5666_v3 = vpop.f32.mrf.mxu0  ;;  %5685 = vmatmul.mubr.msk.bf16.gmra.mxu0 %vm3828_vm0, %v5797_v2 }
 0x279   : > { %4049 = vst.msk [vmem:[%s7675_s17 + $0x30] sm:$0xff] %vm4042_vm14, %v5666_v3  ;;  %v4150_v53 = vmul.f32 %v5666_v3, %v5666_v3  ;;  %v4086_v45 = vsel %vm4042_vm14, %v5666_v3, 0.0 }
 0x27a   : > { %v5696_v27 = vpop.f32.mrf.mxu1  ;;  %v3931_v9 = vpop.f32.mrf.mxu0 }
 0x27b   : > { %4513 = vst.msk [vmem:[%s7763_s20 + $0x10] sm:$0xff] %vm4042_vm14, %v5696_v27  ;;  %4047 = vst.msk [vmem:[%s7675_s17 + $0x20] sm:$0xff] %vm4042_vm14, %v3931_v9  ;;  %v4082_v55 = vsel %vm4042_vm14, %v3931_v9, 0.0  ;;  %v4148_v20 = vmul.f32 %v3931_v9, %v3931_v9  ;;  %v4614_v15 = vmul.f32 %v5696_v27, %v5696_v27  ;;  %v4187_v34 = vsel %vm4042_vm14, %v4150_v53, 0.0 }
 0x27c   : > { %v4384_v59 = vpop.f32.mrf.mxu1  ;;  %v4083_v44 = vadd.f32 %v4082_v55, %v7704_v47  ;;  %v5667_v38 = vpop.f32.mrf.mxu0  ;;  %v4546_v47 = vsel %vm4042_vm14, %v5696_v27, 0.0 }
 0x27d   : > { %4511 = vst.msk [vmem:[%s7763_s20] sm:$0xff] %vm4042_vm14, %v4384_v59  ;;  %v4612_v25 = vmul.f32 %v4384_v59, %v4384_v59  ;;  %v4183_v6 = vsel %vm4042_vm14, %v4148_v20, 0.0  ;;  %4050 = vst.msk [vmem:[%s7675_s17 + $0x38] sm:$0xff] %vm4042_vm14, %v5667_v38  ;;  %v4543_v5 = vsel %vm4042_vm14, %v4384_v59, 0.0  ;;  %v4151_v32 = vmul.f32 %v5667_v38, %v5667_v38 }
 0x27e   : > { %v5697_v41 = vpop.f32.mrf.mxu1  ;;  %v4184_v56 = vadd.f32 %v4183_v6, %v7711_v11  ;;  %v3934_v36 = vpop.f32.mrf.mxu0  ;;  %v4647_v35 = vsel %vm4042_vm14, %v4614_v15, 0.0  ;;  %v4088_v63 = vsel %vm4042_vm14, %v5667_v38, 0.0 }
 0x27f   : > { %v5798_v12 = vld [vmem:[#allocation2 + $0x70] sm:$0xff]   ;;  %4514 = vst.msk [vmem:[%s7763_s20 + $0x18] sm:$0xff] %vm4042_vm14, %v5697_v41  ;;  %4048 = vst.msk [vmem:[%s7675_s17 + $0x28] sm:$0xff] %vm4042_vm14, %v3934_v36  ;;  %v4084_v18 = vsel %vm4042_vm14, %v3934_v36, 0.0  ;;  %v4149_v19 = vmul.f32 %v3934_v36, %v3934_v36  ;;  %v4615_v61 = vmul.f32 %v5697_v41, %v5697_v41  ;;  %v4644_v11 = vsel %vm4042_vm14, %v4612_v25, 0.0 }
 0x280   : > { %v4387_v21 = vpop.f32.mrf.mxu1  ;;  %v4085_v54 = vadd.f32 %v4084_v18, %v4083_v44  ;;  %5688 = vmatprep.mubr.msk.bf16.mxu0 %vm3828_vm0, %v5798_v12  ;;  %v4548_v10 = vsel %vm4042_vm14, %v5697_v41, 0.0  ;;  %v4189_v16 = vsel %vm4042_vm14, %v4151_v32, 0.0 }
 0x281   : > { %4512 = vst.msk [vmem:[%s7763_s20 + $0x8] sm:$0xff] %vm4042_vm14, %v4387_v21  ;;  %v4544_v8 = vsel %vm4042_vm14, %v4387_v21, 0.0  ;;  %v4613_v30 = vmul.f32 %v4387_v21, %v4387_v21  ;;  %v4185_v37 = vsel %vm4042_vm14, %v4149_v19, 0.0  ;;  %5689 = vmatmul.mubr.msk.bf16.gmra.mxu0 %vm3828_vm0, %v5799_v62  ;;  %v4649_v22 = vsel %vm4042_vm14, %v4615_v61, 0.0 }
 0x282   : > { %v4545_v51 = vadd.f32 %v4544_v8, %v4543_v5  ;;  %v5700_v33 = vpop.f32.mrf.mxu1  ;;  %v4087_v29 = vadd.f32 %v4086_v45, %v4085_v54  ;;  %v4186_v1 = vadd.f32 %v4185_v37, %v4184_v56 }
 0x283   : > { %v4645_v26 = vsel %vm4042_vm14, %v4613_v30, 0.0  ;;  %4517 = vst.msk [vmem:[%s7763_s20 + $0x30] sm:$0xff] %vm4042_vm14, %v5700_v33  ;;  %v4618_v46 = vmul.f32 %v5700_v33, %v5700_v33  ;;  %v4554_v28 = vsel %vm4042_vm14, %v5700_v33, 0.0 }
 0x284   : > { %v4547_v48 = vadd.f32 %v4546_v47, %v4545_v51  ;;  %v4646_v49 = vadd.f32 %v4645_v26, %v4644_v11  ;;  %v4400_v31 = vpop.f32.mrf.mxu1  ;;  %v4188_v7 = vadd.f32 %v4187_v34, %v4186_v1  ;;  %v7803_v40 = vadd.f32 %v4088_v63, %v4087_v29 }
 0x285   : > { %4515 = vst.msk [vmem:[%s7763_s20 + $0x20] sm:$0xff] %vm4042_vm14, %v4400_v31  ;;  %v4550_v58 = vsel %vm4042_vm14, %v4400_v31, 0.0  ;;  %v4616_v23 = vmul.f32 %v4400_v31, %v4400_v31  ;;  %v4655_v3 = vsel %vm4042_vm14, %v4618_v46, 0.0 }
 0x286   : > { %v4648_v14 = vadd.f32 %v4647_v35, %v4646_v49  ;;  %v4549_v24 = vadd.f32 %v4548_v10, %v4547_v48  ;;  %v5701_v39 = vpop.f32.mrf.mxu1  ;;  %v7809_v50 = vadd.f32 %v4189_v16, %v4188_v7 }
 0x287   : > { %v4651_v43 = vsel %vm4042_vm14, %v4616_v23, 0.0  ;;  %4518 = vst.msk [vmem:[%s7763_s20 + $0x38] sm:$0xff] %vm4042_vm14, %v5701_v39  ;;  %v4619_v57 = vmul.f32 %v5701_v39, %v5701_v39  ;;  %v4556_v27 = vsel %vm4042_vm14, %v5701_v39, 0.0 }
 0x288   : > { %v4551_v60 = vadd.f32 %v4550_v58, %v4549_v24  ;;  %v4650_v4 = vadd.f32 %v4649_v22, %v4648_v14  ;;  %v4403_v17 = vpop.f32.mrf.mxu1 }
 0x289   : > { %4516 = vst.msk [vmem:[%s7763_s20 + $0x28] sm:$0xff] %vm4042_vm14, %v4403_v17  ;;  %v4552_v0 = vsel %vm4042_vm14, %v4403_v17, 0.0  ;;  %v4617_v42 = vmul.f32 %v4403_v17, %v4403_v17  ;;  %v4657_v59 = vsel %vm4042_vm14, %v4619_v57, 0.0 }
 0x28a   : > { %v4652_v52 = vadd.f32 %v4651_v43, %v4650_v4  ;;  %v4553_v13 = vadd.f32 %v4552_v0, %v4551_v60  ;;  %v5704_v2 = vpop.f32.mrf.mxu1 }
 0x28b   : > { %v4653_v9 = vsel %vm4042_vm14, %v4617_v42, 0.0  ;;  %4521 = vst.msk [vmem:[%s7763_s20 + $0x50] sm:$0xff] %vm4042_vm14, %v5704_v2  ;;  %v4622_v15 = vmul.f32 %v5704_v2, %v5704_v2  ;;  %v4562_v5 = vsel %vm4042_vm14, %v5704_v2, 0.0 }
 0x28c   : > { %v4555_v53 = vadd.f32 %v4554_v28, %v4553_v13  ;;  %v4654_v55 = vadd.f32 %v4653_v9, %v4652_v52  ;;  %v4416_v20 = vpop.f32.mrf.mxu1 }
 0x28d   : > { %4519 = vst.msk [vmem:[%s7763_s20 + $0x40] sm:$0xff] %vm4042_vm14, %v4416_v20  ;;  %v4558_v25 = vsel %vm4042_vm14, %v4416_v20, 0.0  ;;  %v4620_v6 = vmul.f32 %v4416_v20, %v4416_v20  ;;  %v4663_v61 = vsel %vm4042_vm14, %v4622_v15, 0.0 }
 0x28e   : > { %v4656_v44 = vadd.f32 %v4655_v3, %v4654_v55  ;;  %v4557_v38 = vadd.f32 %v4556_v27, %v4555_v53  ;;  %v5705_v62 = vpop.f32.mrf.mxu1 }
 0x28f   : > { %4522 = vst.msk [vmem:[%s7763_s20 + $0x58] sm:$0xff] %vm4042_vm14, %v5705_v62  ;;  %v4659_v56 = vsel %vm4042_vm14, %v4620_v6, 0.0  ;;  %v4623_v12 = vmul.f32 %v5705_v62, %v5705_v62  ;;  %v4564_v11 = vsel %vm4042_vm14, %v5705_v62, 0.0 }
 0x290   : > { %v4559_v41 = vadd.f32 %v4558_v25, %v4557_v38  ;;  %v4658_v45 = vadd.f32 %v4657_v59, %v4656_v44  ;;  %v4419_v36 = vpop.f32.mrf.mxu1 }
 0x291   : > { %4520 = vst.msk [vmem:[%s7763_s20 + $0x48] sm:$0xff] %vm4042_vm14, %v4419_v36  ;;  %v4621_v47 = vmul.f32 %v4419_v36, %v4419_v36  ;;  %v4560_v18 = vsel %vm4042_vm14, %v4419_v36, 0.0  ;;  %v4665_v32 = vsel %vm4042_vm14, %v4623_v12, 0.0 }
 0x292   : > { %v4660_v34 = vadd.f32 %v4659_v56, %v4658_v45  ;;  %v5708_v19 = vpop.f32.mrf.mxu1  ;;  %v4561_v21 = vadd.f32 %v4560_v18, %v4559_v41 }
 0x293   : > { %v4661_v54 = vsel %vm4042_vm14, %v4621_v47, 0.0  ;;  %4525 = vst.msk [vmem:[%s7763_s20 + $0x70] sm:$0xff] %vm4042_vm14, %v5708_v19  ;;  %v4626_v1 = vmul.f32 %v5708_v19, %v5708_v19  ;;  %v4570_v58 = vsel %vm4042_vm14, %v5708_v19, 0.0 }
 0x294   : > { %v4662_v8 = vadd.f32 %v4661_v54, %v4660_v34  ;;  %v4432_v30 = vpop.f32.mrf.mxu1  ;;  %v4563_v37 = vadd.f32 %v4562_v5, %v4561_v21 }
 0x295   : > { %4523 = vst.msk [vmem:[%s7763_s20 + $0x60] sm:$0xff] %vm4042_vm14, %v4432_v30  ;;  %v4624_v35 = vmul.f32 %v4432_v30, %v4432_v30  ;;  %v4566_v33 = vsel %vm4042_vm14, %v4432_v30, 0.0  ;;  %v4671_v14 = vsel %vm4042_vm14, %v4626_v1, 0.0 }
 0x296   : > { %v4664_v51 = vadd.f32 %v4663_v61, %v4662_v8  ;;  %v5709_v29 = vpop.f32.mrf.mxu1  ;;  %v4565_v10 = vadd.f32 %v4564_v11, %v4563_v37 }
 0x297   : > { %v4667_v26 = vsel %vm4042_vm14, %v4624_v35, 0.0  ;;  %4526 = vst.msk [vmem:[%s7763_s20 + $0x78] sm:$0xff] %vm4042_vm14, %v5709_v29  ;;  %v4627_v49 = vmul.f32 %v5709_v29, %v5709_v29  ;;  %v4572_v46 = vsel %vm4042_vm14, %v5709_v29, 0.0 }
 0x298   : > { %v4666_v63 = vadd.f32 %v4665_v32, %v4664_v51  ;;  %v4435_v22 = vpop.f32.mrf.mxu1  ;;  %v4567_v48 = vadd.f32 %v4566_v33, %v4565_v10 }
 0x299   : > { %4524 = vst.msk [vmem:[%s7763_s20 + $0x68] sm:$0xff] %vm4042_vm14, %v4435_v22  ;;  %v4568_v31 = vsel %vm4042_vm14, %v4435_v22, 0.0  ;;  %v4625_v7 = vmul.f32 %v4435_v22, %v4435_v22  ;;  %v4673_v4 = vsel %vm4042_vm14, %v4627_v49, 0.0 }
 0x29a   : > { %v4668_v23 = vadd.f32 %v4667_v26, %v4666_v63  ;;  %v5712_v16 = vpop.f32.mrf.mxu1  ;;  %v4569_v24 = vadd.f32 %v4568_v31, %v4567_v48 }
 0x29b   : > { %v4669_v39 = vsel %vm4042_vm14, %v4625_v7, 0.0  ;;  %4529 = vst.msk [vmem:[%s7763_s20 + $0x90] sm:$0xff] %vm4042_vm14, %v5712_v16  ;;  %v4630_v52 = vmul.f32 %v5712_v16, %v5712_v16  ;;  %v4578_v59 = vsel %vm4042_vm14, %v5712_v16, 0.0 }
 0x29c   : > { %v4670_v43 = vadd.f32 %v4669_v39, %v4668_v23  ;;  %v4448_v60 = vpop.f32.mrf.mxu1  ;;  %v4571_v17 = vadd.f32 %v4570_v58, %v4569_v24 }
 0x29d   : > { %4527 = vst.msk [vmem:[%s7763_s20 + $0x80] sm:$0xff] %vm4042_vm14, %v4448_v60  ;;  %v4628_v28 = vmul.f32 %v4448_v60, %v4448_v60  ;;  %v4574_v0 = vsel %vm4042_vm14, %v4448_v60, 0.0  ;;  %v4679_v25 = vsel %vm4042_vm14, %v4630_v52, 0.0 }
 0x29e   : > { %v4672_v57 = vadd.f32 %v4671_v14, %v4670_v43  ;;  %v5713_v42 = vpop.f32.mrf.mxu1  ;;  %v4573_v13 = vadd.f32 %v4572_v46, %v4571_v17 }
 0x29f   : > { %v4675_v2 = vsel %vm4042_vm14, %v4628_v28, 0.0  ;;  %4530 = vst.msk [vmem:[%s7763_s20 + $0x98] sm:$0xff] %vm4042_vm14, %v5713_v42  ;;  %v4631_v53 = vmul.f32 %v5713_v42, %v5713_v42  ;;  %v4580_v15 = vsel %vm4042_vm14, %v5713_v42, 0.0 }
 0x2a0   : > { %v4674_v3 = vadd.f32 %v4673_v4, %v4672_v57  ;;  %v4451_v27 = vpop.f32.mrf.mxu1  ;;  %v4575_v9 = vadd.f32 %v4574_v0, %v4573_v13 }
 0x2a1   : > { %4528 = vst.msk [vmem:[%s7763_s20 + $0x88] sm:$0xff] %vm4042_vm14, %v4451_v27  ;;  %v4576_v55 = vsel %vm4042_vm14, %v4451_v27, 0.0  ;;  %v4629_v20 = vmul.f32 %v4451_v27, %v4451_v27  ;;  %v4681_v56 = vsel %vm4042_vm14, %v4631_v53, 0.0 }
 0x2a2   : > { %v4676_v44 = vadd.f32 %v4675_v2, %v4674_v3  ;;  %v5716_v38 = vpop.f32.mrf.mxu1  ;;  %v4577_v6 = vadd.f32 %v4576_v55, %v4575_v9 }
 0x2a3   : > { %v4677_v62 = vsel %vm4042_vm14, %v4629_v20, 0.0  ;;  %4533 = vst.msk [vmem:[%s7763_s20 + $0xb0] sm:$0xff] %vm4042_vm14, %v5716_v38  ;;  %v4634_v18 = vmul.f32 %v5716_v38, %v5716_v38  ;;  %v4586_v37 = vsel %vm4042_vm14, %v5716_v38, 0.0 }
 0x2a4   : > { %v4678_v41 = vadd.f32 %v4677_v62, %v4676_v44  ;;  %v4464_v45 = vpop.f32.mrf.mxu1  ;;  %v4579_v36 = vadd.f32 %v4578_v59, %v4577_v6 }
 0x2a5   : > { %4531 = vst.msk [vmem:[%s7763_s20 + $0xa0] sm:$0xff] %vm4042_vm14, %v4464_v45  ;;  %v4632_v12 = vmul.f32 %v4464_v45, %v4464_v45  ;;  %v4582_v5 = vsel %vm4042_vm14, %v4464_v45, 0.0  ;;  %v4687_v33 = vsel %vm4042_vm14, %v4634_v18, 0.0 }
 0x2a6   : > { %v4680_v47 = vadd.f32 %v4679_v25, %v4678_v41  ;;  %v5717_v34 = vpop.f32.mrf.mxu1  ;;  %v4581_v19 = vadd.f32 %v4580_v15, %v4579_v36 }
 0x2a7   : > { %v4683_v61 = vsel %vm4042_vm14, %v4632_v12, 0.0  ;;  %4534 = vst.msk [vmem:[%s7763_s20 + $0xb8] sm:$0xff] %vm4042_vm14, %v5717_v34  ;;  %v4635_v8 = vmul.f32 %v5717_v34, %v5717_v34  ;;  %v4588_v10 = vsel %vm4042_vm14, %v5717_v34, 0.0 }
 0x2a8   : > { %v4682_v21 = vadd.f32 %v4681_v56, %v4680_v47  ;;  %v4467_v54 = vpop.f32.mrf.mxu1  ;;  %v4583_v11 = vadd.f32 %v4582_v5, %v4581_v19 }
 0x2a9   : > { %4532 = vst.msk [vmem:[%s7763_s20 + $0xa8] sm:$0xff] %vm4042_vm14, %v4467_v54  ;;  %v4584_v30 = vsel %vm4042_vm14, %v4467_v54, 0.0  ;;  %v4633_v32 = vmul.f32 %v4467_v54, %v4467_v54  ;;  %v4689_v48 = vsel %vm4042_vm14, %v4635_v8, 0.0 }
 0x2aa   : > { %v4684_v35 = vadd.f32 %v4683_v61, %v4682_v21  ;;  %v5720_v51 = vpop.f32.mrf.mxu1  ;;  %v4585_v29 = vadd.f32 %v4584_v30, %v4583_v11 }
 0x2ab   : > { %v4685_v1 = vsel %vm4042_vm14, %v4633_v32, 0.0  ;;  %4537 = vst.msk [vmem:[%s7763_s20 + $0xd0] sm:$0xff] %vm4042_vm14, %v5720_v51  ;;  %v4638_v7 = vmul.f32 %v5720_v51, %v5720_v51  ;;  %v4594_v24 = vsel %vm4042_vm14, %v5720_v51, 0.0 }
 0x2ac   : > { %v4686_v26 = vadd.f32 %v4685_v1, %v4684_v35  ;;  %v4480_v63 = vpop.f32.mrf.mxu1  ;;  %v5670_v22 = vpop.f32.mrf.mxu0  ;;  %v4587_v49 = vadd.f32 %v4586_v37, %v4585_v29 }
 0x2ad   : > { %4535 = vst.msk [vmem:[%s7763_s20 + $0xc0] sm:$0xff] %vm4042_vm14, %v4480_v63  ;;  %4053 = vst.msk [vmem:[%s7675_s17 + $0x50] sm:$0xff] %vm4042_vm14, %v5670_v22  ;;  %v4590_v58 = vsel %vm4042_vm14, %v4480_v63, 0.0  ;;  %v4636_v23 = vmul.f32 %v4480_v63, %v4480_v63  ;;  %v4154_v46 = vmul.f32 %v5670_v22, %v5670_v22  ;;  %v4094_v13 = vsel %vm4042_vm14, %v5670_v22, 0.0 }
 0x2ae   : > { %v4688_v31 = vadd.f32 %v4687_v33, %v4686_v26  ;;  %v5721_v16 = vpop.f32.mrf.mxu1  ;;  %v3947_v14 = vpop.f32.mrf.mxu0  ;;  %v4589_v39 = vadd.f32 %v4588_v10, %v4587_v49  ;;  %v4695_v3 = vsel %vm4042_vm14, %v4638_v7, 0.0 }
 0x2af   : > { %4538 = vst.msk [vmem:[%s7763_s20 + $0xd8] sm:$0xff] %vm4042_vm14, %v5721_v16  ;;  %4051 = vst.msk [vmem:[%s7675_s17 + $0x40] sm:$0xff] %vm4042_vm14, %v3947_v14  ;;  %v4090_v43 = vsel %vm4042_vm14, %v3947_v14, 0.0  ;;  %v4152_v60 = vmul.f32 %v3947_v14, %v3947_v14  ;;  %v4691_v42 = vsel %vm4042_vm14, %v4636_v23, 0.0  ;;  %v4639_v52 = vmul.f32 %v5721_v16, %v5721_v16 }
 0x2b0   : > { %v4690_v4 = vadd.f32 %v4689_v48, %v4688_v31  ;;  %v4483_v17 = vpop.f32.mrf.mxu1  ;;  %v4091_v28 = vadd.f32 %v4090_v43, %v7803_v40  ;;  %v5671_v57 = vpop.f32.mrf.mxu0  ;;  %v4591_v0 = vadd.f32 %v4590_v58, %v4589_v39  ;;  %v4596_v55 = vsel %vm4042_vm14, %v5721_v16, 0.0 }
 0x2b1   : > { %4536 = vst.msk [vmem:[%s7763_s20 + $0xc8] sm:$0xff] %vm4042_vm14, %v4483_v17  ;;  %v4191_v2 = vsel %vm4042_vm14, %v4152_v60, 0.0  ;;  %4054 = vst.msk [vmem:[%s7675_s17 + $0x58] sm:$0xff] %vm4042_vm14, %v5671_v57  ;;  %v4592_v20 = vsel %vm4042_vm14, %v4483_v17, 0.0  ;;  %v4637_v59 = vmul.f32 %v4483_v17, %v4483_v17  ;;  %v4195_v44 = vsel %vm4042_vm14, %v4154_v46, 0.0 }
 0x2b2   : > { %v4692_v27 = vadd.f32 %v4691_v42, %v4690_v4  ;;  %v5724_v9 = vpop.f32.mrf.mxu1  ;;  %v4192_v40 = vadd.f32 %v4191_v2, %v7809_v50  ;;  %v3950_v53 = vpop.f32.mrf.mxu0  ;;  %v4593_v6 = vadd.f32 %v4592_v20, %v4591_v0  ;;  %v4155_v50 = vmul.f32 %v5671_v57, %v5671_v57 }
 0x2b3   : > { %4541 = vst.msk [vmem:[%s7763_s20 + $0xf0] sm:$0xff] %vm4042_vm14, %v5724_v9  ;;  %4052 = vst.msk [vmem:[%s7675_s17 + $0x48] sm:$0xff] %vm4042_vm14, %v3950_v53  ;;  %v4092_v38 = vsel %vm4042_vm14, %v3950_v53, 0.0  ;;  %v4153_v25 = vmul.f32 %v3950_v53, %v3950_v53  ;;  %v4697_v41 = vsel %vm4042_vm14, %v4639_v52, 0.0  ;;  %v4693_v45 = vsel %vm4042_vm14, %v4637_v59, 0.0 }
 0x2b4   : > { %v4496_v62 = vpop.f32.mrf.mxu1  ;;  %v4093_v15 = vadd.f32 %v4092_v38, %v4091_v28  ;;  %v4595_v36 = vadd.f32 %v4594_v24, %v4593_v6  ;;  %v4694_v12 = vadd.f32 %v4693_v45, %v4692_v27  ;;  %v4096_v34 = vsel %vm4042_vm14, %v5671_v57, 0.0 }
 0x2b5   : > { %4539 = vst.msk [vmem:[%s7763_s20 + $0xe0] sm:$0xff] %vm4042_vm14, %v4496_v62  ;;  %v4193_v56 = vsel %vm4042_vm14, %v4153_v25, 0.0  ;;  %v4640_v47 = vmul.f32 %v4496_v62, %v4496_v62  ;;  %v4598_v61 = vsel %vm4042_vm14, %v4496_v62, 0.0  ;;  %v4642_v54 = vmul.f32 %v5724_v9, %v5724_v9 }
 0x2b6   : > { %v5725_v5 = vpop.f32.mrf.mxu1  ;;  %v4095_v18 = vadd.f32 %v4094_v13, %v4093_v15  ;;  %v4194_v19 = vadd.f32 %v4193_v56, %v4192_v40  ;;  %v4696_v21 = vadd.f32 %v4695_v3, %v4694_v12  ;;  %v4597_v11 = vadd.f32 %v4596_v55, %v4595_v36 }
 0x2b7   : > { %4542 = vst.msk [vmem:[%s7763_s20 + $0xf8] sm:$0xff] %vm4042_vm14, %v5725_v5  ;;  %v4699_v8 = vsel %vm4042_vm14, %v4640_v47, 0.0  ;;  %v4197_v33 = vsel %vm4042_vm14, %v4155_v50, 0.0  ;;  %v4602_v26 = vsel %vm4042_vm14, %v5724_v9, 0.0  ;;  %v4643_v63 = vmul.f32 %v5725_v5, %v5725_v5 }
 0x2b8   : > { %v4499_v30 = vpop.f32.mrf.mxu1  ;;  %v4196_v32 = vadd.f32 %v4195_v44, %v4194_v19  ;;  %v4097_v37 = vadd.f32 %v4096_v34, %v4095_v18  ;;  %v4599_v29 = vadd.f32 %v4598_v61, %v4597_v11  ;;  %v4698_v1 = vadd.f32 %v4697_v41, %v4696_v21 }
 0x2b9   : > { %4540 = vst.msk [vmem:[%s7763_s20 + $0xe8] sm:$0xff] %vm4042_vm14, %v4499_v30  ;;  %v4600_v35 = vsel %vm4042_vm14, %v4499_v30, 0.0  ;;  %v4641_v51 = vmul.f32 %v4499_v30, %v4499_v30  ;;  %v4703_v31 = vsel %vm4042_vm14, %v4642_v54, 0.0  ;;  %v4604_v7 = vsel %vm4042_vm14, %v5725_v5, 0.0 }
 0x2ba   : > { %v4198_v10 = vadd.f32 %v4197_v33, %v4196_v32  ;;  %v4700_v48 = vadd.f32 %v4699_v8, %v4698_v1  ;;  %v4601_v49 = vadd.f32 %v4600_v35, %v4599_v29  ;;  %v4705_v16 = vsel %vm4042_vm14, %v4643_v63, 0.0 }
 0x2bb   : > { %v4701_v22 = vsel %vm4042_vm14, %v4641_v51, 0.0 }
 0x2bc   : > { %v4603_v58 = vadd.f32 %v4602_v26, %v4601_v49  ;;  %v4702_v23 = vadd.f32 %v4701_v22, %v4700_v48 }
 0x2be   : > { %v4605_v14 = vadd.f32 %v4604_v7, %v4603_v58  ;;  %v4704_v24 = vadd.f32 %v4703_v31, %v4702_v23 }
 0x2c0   : > { %v4606_v39 = vrot.slane %v4605_v14, 4  ;;  %v4706_v46 = vadd.f32 %v4705_v16, %v4704_v24 }
 0x2c2   : > { %v4607_v43 = vadd.f32 %v4606_v39, %v4605_v14  ;;  %v4707_v60 = vrot.slane %v4706_v46, 4 }
 0x2c4   : > { %v4608_v4 = vrot.slane %v4607_v43, 2  ;;  %v4708_v17 = vadd.f32 %v4707_v60, %v4706_v46 }
 0x2c6   : > { %v4609_v28 = vadd.f32 %v4608_v4, %v4607_v43  ;;  %v4709_v57 = vrot.slane %v4708_v17, 2 }
 0x2c8   : > { %v4610_v0 = vrot.slane %v4609_v28, 1  ;;  %v4710_v42 = vadd.f32 %v4709_v57, %v4708_v17 }
 0x2ca   : > { %v4611_v52 = vadd.f32 %v4610_v0, %v4609_v28  ;;  %v4711_v13 = vrot.slane %v4710_v42, 1 }
 0x2cc   : > { %v4712_v2 = vadd.f32 %v4711_v13, %v4710_v42 }
 0x2ce   : > { %v4713_v3 = vsel %vm4245_vm15, %v4611_v52, %v4712_v2 }
 0x2cf   : > { %4714 = vst.msk [vmem:[%s269_s29] sm:$0x3] %vm4247_vm6, %v4713_v3 }
 0x2db   : > { %v5674_v27 = vpop.f32.mrf.mxu0 }
 0x2dc   : > { %4057 = vst.msk [vmem:[%s7675_s17 + $0x70] sm:$0xff] %vm4042_vm14, %v5674_v27  ;;  %v4158_v25 = vmul.f32 %v5674_v27, %v5674_v27 }
 0x2dd   : > { %v3963_v9 = vpop.f32.mrf.mxu0 }
 0x2de   : > { %4055 = vst.msk [vmem:[%s7675_s17 + $0x60] sm:$0xff] %vm4042_vm14, %v3963_v9  ;;  %v4098_v40 = vsel %vm4042_vm14, %v3963_v9, 0.0  ;;  %v4156_v53 = vmul.f32 %v3963_v9, %v3963_v9 }
 0x2df   : > { %v4099_v55 = vadd.f32 %v4098_v40, %v4097_v37  ;;  %v5675_v20 = vpop.f32.mrf.mxu0 }
 0x2e0   : > { %v4199_v59 = vsel %vm4042_vm14, %v4156_v53, 0.0  ;;  %4058 = vst.msk [vmem:[%s7675_s17 + $0x78] sm:$0xff] %vm4042_vm14, %v5675_v20 }
 0x2e1   : > { %v4200_v44 = vadd.f32 %v4199_v59, %v4198_v10  ;;  %v3966_v38 = vpop.f32.mrf.mxu0 }
 0x2e2   : > { %4056 = vst.msk [vmem:[%s7675_s17 + $0x68] sm:$0xff] %vm4042_vm14, %v3966_v38  ;;  %v4100_v6 = vsel %vm4042_vm14, %v3966_v38, 0.0  ;;  %v4157_v62 = vmul.f32 %v3966_v38, %v3966_v38 }
 0x2e3   : > { %v4101_v50 = vadd.f32 %v4100_v6, %v4099_v55 }
 0x2e4   : > { %5813 = shalt.err (!%p5810_p3)
}
 0x2e5   : > { %s5814_s20 = scalar_lea.hbm %s7958_s14, 32  ;;  %s5818_s12 = scalar_lea.hbm %s8100_s6, 64 }
 0x2e6   : > { %p5815_p4 = scmp.ne.s32.totalorder %s7958_s14, %s5814_s20  ;;  %p5819_p9 = scmp.lt.s32.totalorder %s7958_s14, %s8100_s6 }
 0x2e7   : > { %p5820_p10 = scmp.lt.s32.totalorder %s5818_s12, %s5814_s20 }
 0x2e8   : > { %p5816_p7 = pnand %p5815_p4, %p5976_p5 }
 0x2e9   : > { %p5821_p11 = por %p5820_p10, %p5819_p9 }
 0x2ea   : > { %p5817_p8 = pneg %p5816_p7 }
 0x2ec   : > { %p5822_p12 = pnand %p5821_p11, %p5817_p8 }
 0x2ee   : > { %5825 = shalt.err (!%p5822_p12)
}
 0x2ef   : > { %5729 = dma.vmem_to_hbm [thread:$0]  (%p5976_p5), %s4764_s15, 32, %s7958_s14, %s4731_s26   ;;  %v4102_v15 = vsel %vm4042_vm14, %v5674_v27, 0.0  ;;  %v4159_v41 = vmul.f32 %v5675_v20, %v5675_v20  ;;  %v4201_v45 = vsel %vm4042_vm14, %v4157_v62, 0.0  ;;  %v4203_v12 = vsel %vm4042_vm14, %v4158_v25, 0.0 }
 0x2f0   : > { %v4103_v56 = vadd.f32 %v4102_v15, %v4101_v50  ;;  %v4202_v36 = vadd.f32 %v4201_v45, %v4200_v44  ;;  %v4104_v47 = vsel %vm4042_vm14, %v5675_v20, 0.0  ;;  %s8186_s14 = sshll.u32 %s5959_s25, 5  ;;  %s4721_s18 = scalar_lea.sflag [#allocation4], %s7937_s10 }
 0x2f1   : > { %v4205_v18 = vsel %vm4042_vm14, %v4159_v41, 0.0  ;;  %s8056_s13 = scalar_lea.hbm %s8098_s4, %s8186_s14 }
 0x2f2   : > { %v4204_v5 = vadd.f32 %v4203_v12, %v4202_v36  ;;  %v4105_v34 = vadd.f32 %v4104_v47, %v4103_v56 }
 0x2f4   : > { %v4206_v19 = vadd.f32 %v4205_v18, %v4204_v5 }
 0x307   : > { %v5678_v61 = vpop.f32.mrf.mxu0 }
 0x308   : > { %4061 = vst.msk [vmem:[%s7675_s17 + $0x90] sm:$0xff] %vm4042_vm14, %v5678_v61  ;;  %v4162_v48 = vmul.f32 %v5678_v61, %v5678_v61  ;;  %v4110_v31 = vsel %vm4042_vm14, %v5678_v61, 0.0 }
 0x309   : > { %v3979_v21 = vpop.f32.mrf.mxu0 }
 0x30a   : > { %4059 = vst.msk [vmem:[%s7675_s17 + $0x80] sm:$0xff] %vm4042_vm14, %v3979_v21  ;;  %v4160_v30 = vmul.f32 %v3979_v21, %v3979_v21  ;;  %v4106_v37 = vsel %vm4042_vm14, %v3979_v21, 0.0  ;;  %v4211_v58 = vsel %vm4042_vm14, %v4162_v48, 0.0 }
 0x30b   : > { %v5679_v54 = vpop.f32.mrf.mxu0  ;;  %v4107_v1 = vadd.f32 %v4106_v37, %v4105_v34 }
 0x30c   : > { %4062 = vst.msk [vmem:[%s7675_s17 + $0x98] sm:$0xff] %vm4042_vm14, %v5679_v54  ;;  %v4207_v33 = vsel %vm4042_vm14, %v4160_v30, 0.0  ;;  %v4163_v23 = vmul.f32 %v5679_v54, %v5679_v54  ;;  %v4112_v24 = vsel %vm4042_vm14, %v5679_v54, 0.0 }
 0x30d   : > { %v3982_v11 = vpop.f32.mrf.mxu0  ;;  %v4208_v63 = vadd.f32 %v4207_v33, %v4206_v19 }
 0x30e   : > { %4060 = vst.msk [vmem:[%s7675_s17 + $0x88] sm:$0xff] %vm4042_vm14, %v3982_v11  ;;  %v4161_v35 = vmul.f32 %v3982_v11, %v3982_v11  ;;  %v4108_v29 = vsel %vm4042_vm14, %v3982_v11, 0.0  ;;  %v4213_v60 = vsel %vm4042_vm14, %v4163_v23, 0.0 }
 0x30f   : > { %v4109_v22 = vadd.f32 %v4108_v29, %v4107_v1 }
 0x310   : > { %v4209_v26 = vsel %vm4042_vm14, %v4161_v35, 0.0 }
 0x311   : > { %v4210_v49 = vadd.f32 %v4209_v26, %v4208_v63  ;;  %v4111_v7 = vadd.f32 %v4110_v31, %v4109_v22 }
 0x313   : > { %v4212_v14 = vadd.f32 %v4211_v58, %v4210_v49  ;;  %v4113_v43 = vadd.f32 %v4112_v24, %v4111_v7 }
 0x315   : > { %v4214_v57 = vadd.f32 %v4213_v60, %v4212_v14 }
 0x320   : > { %v5682_v8 = vpop.f32.mrf.mxu0 }
 0x321   : > { %4065 = vst.msk [vmem:[%s7675_s17 + $0xb0] sm:$0xff] %vm4042_vm14, %v5682_v8  ;;  %v4166_v13 = vmul.f32 %v5682_v8, %v5682_v8  ;;  %v4118_v3 = vsel %vm4042_vm14, %v5682_v8, 0.0 }
 0x322   : > { %v3995_v32 = vpop.f32.mrf.mxu0 }
 0x323   : > { %4063 = vst.msk [vmem:[%s7675_s17 + $0xa0] sm:$0xff] %vm4042_vm14, %v3995_v32  ;;  %v4164_v16 = vmul.f32 %v3995_v32, %v3995_v32  ;;  %v4114_v39 = vsel %vm4042_vm14, %v3995_v32, 0.0  ;;  %v4219_v40 = vsel %vm4042_vm14, %v4166_v13, 0.0 }
 0x324   : > { %v5683_v51 = vpop.f32.mrf.mxu0  ;;  %v4115_v28 = vadd.f32 %v4114_v39, %v4113_v43 }
 0x325   : > { %4066 = vst.msk [vmem:[%s7675_s17 + $0xb8] sm:$0xff] %vm4042_vm14, %v5683_v51  ;;  %v4215_v4 = vsel %vm4042_vm14, %v4164_v16, 0.0  ;;  %v4167_v53 = vmul.f32 %v5683_v51, %v5683_v51  ;;  %v4120_v59 = vsel %vm4042_vm14, %v5683_v51, 0.0 }
 0x326   : > { %v3998_v10 = vpop.f32.mrf.mxu0  ;;  %v4216_v42 = vadd.f32 %v4215_v4, %v4214_v57 }
 0x327   : > { %4064 = vst.msk [vmem:[%s7675_s17 + $0xa8] sm:$0xff] %vm4042_vm14, %v3998_v10  ;;  %v4165_v46 = vmul.f32 %v3998_v10, %v3998_v10  ;;  %v4116_v17 = vsel %vm4042_vm14, %v3998_v10, 0.0  ;;  %v4221_v62 = vsel %vm4042_vm14, %v4167_v53, 0.0 }
 0x328   : > { %v4117_v52 = vadd.f32 %v4116_v17, %v4115_v28 }
 0x329   : > { %v4217_v0 = vsel %vm4042_vm14, %v4165_v46, 0.0 }
 0x32a   : > { %v4218_v2 = vadd.f32 %v4217_v0, %v4216_v42  ;;  %v4119_v27 = vadd.f32 %v4118_v3, %v4117_v52 }
 0x32c   : > { %v4220_v55 = vadd.f32 %v4219_v40, %v4218_v2  ;;  %v4121_v25 = vadd.f32 %v4120_v59, %v4119_v27 }
 0x32e   : > { %v4222_v41 = vadd.f32 %v4221_v62, %v4220_v55 }
 0x338   : > { %v5686_v9 = vpop.f32.mrf.mxu0 }
 0x339   : > { %4069 = vst.msk [vmem:[%s7675_s17 + $0xd0] sm:$0xff] %vm4042_vm14, %v5686_v9  ;;  %v4170_v56 = vmul.f32 %v5686_v9, %v5686_v9  ;;  %v4126_v34 = vsel %vm4042_vm14, %v5686_v9, 0.0 }
 0x33a   : > { %v4011_v20 = vpop.f32.mrf.mxu0 }
 0x33b   : > { %4067 = vst.msk [vmem:[%s7675_s17 + $0xc0] sm:$0xff] %vm4042_vm14, %v4011_v20  ;;  %v4122_v44 = vsel %vm4042_vm14, %v4011_v20, 0.0  ;;  %v4168_v38 = vmul.f32 %v4011_v20, %v4011_v20  ;;  %v4227_v11 = vsel %vm4042_vm14, %v4170_v56, 0.0 }
 0x33c   : > { %v5687_v6 = vpop.f32.mrf.mxu0  ;;  %v4123_v15 = vadd.f32 %v4122_v44, %v4121_v25 }
 0x33d   : > { %v4223_v50 = vsel %vm4042_vm14, %v4168_v38, 0.0  ;;  %4070 = vst.msk [vmem:[%s7675_s17 + $0xd8] sm:$0xff] %vm4042_vm14, %v5687_v6  ;;  %v4171_v18 = vmul.f32 %v5687_v6, %v5687_v6  ;;  %v4128_v8 = vsel %vm4042_vm14, %v5687_v6, 0.0 }
 0x33e   : > { %v4014_v45 = vpop.f32.mrf.mxu0  ;;  %v4224_v47 = vadd.f32 %v4223_v50, %v4222_v41 }
 0x33f   : > { %4068 = vst.msk [vmem:[%s7675_s17 + $0xc8] sm:$0xff] %vm4042_vm14, %v4014_v45  ;;  %v4124_v36 = vsel %vm4042_vm14, %v4014_v45, 0.0  ;;  %v4169_v12 = vmul.f32 %v4014_v45, %v4014_v45  ;;  %v4229_v51 = vsel %vm4042_vm14, %v4171_v18, 0.0 }
 0x340   : > { %v4125_v5 = vadd.f32 %v4124_v36, %v4123_v15 }
 0x341   : > { %v4225_v19 = vsel %vm4042_vm14, %v4169_v12, 0.0  ;;  %v5690_v61 = vpop.f32.mrf.mxu0 }
 0x342   : > { %v4127_v21 = vadd.f32 %v4126_v34, %v4125_v5  ;;  %v4226_v54 = vadd.f32 %v4225_v19, %v4224_v47  ;;  %4073 = vst.msk [vmem:[%s7675_s17 + $0xf0] sm:$0xff] %vm4042_vm14, %v5690_v61  ;;  %v4174_v22 = vmul.f32 %v5690_v61, %v5690_v61  ;;  %v4134_v58 = vsel %vm4042_vm14, %v5690_v61, 0.0 }
 0x343   : > { %v4027_v30 = vpop.f32.mrf.mxu0 }
 0x344   : > { %v4228_v32 = vadd.f32 %v4227_v11, %v4226_v54  ;;  %4071 = vst.msk [vmem:[%s7675_s17 + $0xe0] sm:$0xff] %vm4042_vm14, %v4027_v30  ;;  %v4129_v37 = vadd.f32 %v4128_v8, %v4127_v21  ;;  %v4130_v35 = vsel %vm4042_vm14, %v4027_v30, 0.0  ;;  %v4172_v33 = vmul.f32 %v4027_v30, %v4027_v30 }
 0x345   : > { %v5691_v29 = vpop.f32.mrf.mxu0  ;;  %v4235_v39 = vsel %vm4042_vm14, %v4174_v22, 0.0 }
 0x346   : > { %v4131_v1 = vadd.f32 %v4130_v35, %v4129_v37  ;;  %v4230_v10 = vadd.f32 %v4229_v51, %v4228_v32  ;;  %4074 = vst.msk [vmem:[%s7675_s17 + $0xf8] sm:$0xff] %vm4042_vm14, %v5691_v29  ;;  %v4231_v26 = vsel %vm4042_vm14, %v4172_v33, 0.0  ;;  %v4175_v23 = vmul.f32 %v5691_v29, %v5691_v29 }
 0x347   : > { %v4030_v63 = vpop.f32.mrf.mxu0  ;;  %v4136_v46 = vsel %vm4042_vm14, %v5691_v29, 0.0 }
 0x348   : > { %v4232_v48 = vadd.f32 %v4231_v26, %v4230_v10  ;;  %4072 = vst.msk [vmem:[%s7675_s17 + $0xe8] sm:$0xff] %vm4042_vm14, %v4030_v63  ;;  %v4132_v49 = vsel %vm4042_vm14, %v4030_v63, 0.0  ;;  %v4173_v31 = vmul.f32 %v4030_v63, %v4030_v63  ;;  %v4237_v4 = vsel %vm4042_vm14, %v4175_v23, 0.0  ;;  %s255_s17 = scalar_lea.vmem [#allocation3], %s4908_s28  ;;  %s5902_s28 = smov [#allocation3]  }
 0x349   : > { %v4133_v7 = vadd.f32 %v4132_v49, %v4131_v1  ;;  %s4747_s9 = sshll.u32 %s255_s17, 4  ;;  %s5830_s20 = sshll.u32 %s5902_s28, 4  ;;  %s4748_s9 = int_to_ptr.vmem [resolvable:$true] %s4747_s9  ;;  %s5831_s20 = int_to_ptr.vmem [resolvable:$false] %s5830_s20 }
 0x34a   : > { %v4233_v16 = vsel %vm4042_vm14, %v4173_v31, 0.0  ;;  %s5826_s19 = scalar_lea.vmem %s4748_s9, 32  ;;  %s5832_s25 = scalar_lea.vmem %s5831_s20, 64 }
 0x34b   : > { %v4135_v14 = vadd.f32 %v4134_v58, %v4133_v7  ;;  %v4234_v24 = vadd.f32 %v4233_v16, %v4232_v48  ;;  %p5827_p13 = scmp.ne.s32.totalorder %s4748_s9, %s5826_s19  ;;  %p5833_p2 = scmp.lt.s32.totalorder %s4748_s9, %s5831_s20 }
 0x34c   : > { %p5834_p3 = scmp.lt.s32.totalorder %s5832_s25, %s5826_s19 }
 0x34d   : > { %v4137_v43 = vadd.f32 %v4136_v46, %v4135_v14  ;;  %v4236_v60 = vadd.f32 %v4235_v39, %v4234_v24  ;;  %p5828_p0 = pnand %p5827_p13, %p5976_p5 }
 0x34e   : > { %p5835_p4 = por %p5834_p3, %p5833_p2 }
 0x34f   : > { %v4138_v17 = vrot.slane %v4137_v43, 4  ;;  %v4238_v28 = vadd.f32 %v4237_v4, %v4236_v60  ;;  %p5829_p1 = pneg %p5828_p0 }
 0x351   : > { %v4139_v57 = vadd.f32 %v4138_v17, %v4137_v43  ;;  %v4239_v0 = vrot.slane %v4238_v28, 4  ;;  %p5836_p7 = pnand %p5835_p4, %p5829_p1 }
 0x353   : > { %v4140_v42 = vrot.slane %v4139_v57, 2  ;;  %v4240_v52 = vadd.f32 %v4239_v0, %v4238_v28 }
 0x355   : > { %v4141_v13 = vadd.f32 %v4140_v42, %v4139_v57  ;;  %v4241_v2 = vrot.slane %v4240_v52, 2 }
 0x357   : > { %v4142_v3 = vrot.slane %v4141_v13, 1  ;;  %v4242_v27 = vadd.f32 %v4241_v2, %v4240_v52 }
 0x359   : > { %v4243_v9 = vrot.slane %v4242_v27, 1  ;;  %v4143_v40 = vadd.f32 %v4142_v3, %v4141_v13 }
 0x35b   : > { %v4244_v53 = vadd.f32 %v4243_v9, %v4242_v27 }
 0x35d   : > { %v4246_v55 = vsel %vm4245_vm15, %v4143_v40, %v4244_v53 }
 0x35e   : > { %4248 = vst.msk [vmem:[%s255_s17] sm:$0x3] %vm4247_vm6, %v4246_v55 }
 0x35f   : > { %5839 = shalt.err (!%p5836_p7)
}
 0x360   : > { %s5840_s29 = scalar_lea.hbm %s8056_s13, 32  ;;  %s5844_s12 = scalar_lea.hbm %s8098_s4, 64 }
 0x361   : > { %p5841_p8 = scmp.ne.s32.totalorder %s8056_s13, %s5840_s29  ;;  %p5845_p11 = scmp.lt.s32.totalorder %s8056_s13, %s8098_s4 }
 0x362   : > { %p5846_p12 = scmp.lt.s32.totalorder %s5844_s12, %s5840_s29 }
 0x363   : > { %p5842_p9 = pnand %p5841_p8, %p5976_p5 }
 0x364   : > { %p5847_p13 = por %p5846_p12, %p5845_p11 }
 0x365   : > { %p5843_p10 = pneg %p5842_p9 }
 0x367   : > { %p5848_p0 = pnand %p5847_p13, %p5843_p10 }
 0x369   : > { %5851 = shalt.err (!%p5848_p0)
}
 0x36a   : > { %5728 = dma.vmem_to_hbm [thread:$0]  (%p5976_p5), %s4748_s9, 32, %s8056_s13, %s4721_s18  }
 0x36b PF: > { %p5739_p1 = scmp.ge.s32.totalorder %s5890_s24, 2  ;;  %s4783_s14 = sand.u32 1, %s5878_s21  }
 0x36c   : > { %s4784_s15 = scalar_lea.sflag [#allocation4], %s4783_s14 }
 0x36d   : > { %p5733_p2 = pnand %p5739_p1, %p5980_p6 }
 0x36f   : > { %p5734_p3 = pneg %p5733_p2 }
 0x371   : > { %5869 = dma.done.wait (%p5734_p3), %s4784_s15, 32  }
 0x372   : > { %5871 = vsyncadd (%p5734_p3), %s4784_s15, 4294967264  ;;  %s4801_s26 = scalar_lea.sflag [#allocation6], %s4783_s14 }
 0x373   : > { %5873 = dma.done.wait (%p5734_p3), %s4801_s26, 32  }
 0x374   : > { %5875 = vsyncadd (%p5734_p3), %s4801_s26, 4294967264  ;;  %p20_p5 = scmp.ge.s32.totalorder %s5963_s27, 4   ;;  %s8187_s21 = smov %s5882_s22 }
 0x375   : > { %s8188_s22 = smov %s5886_s23  ;;  %s8189_s23 = smov %s5974_s30 }
 0x376   : > { %s8190_s24 = smov %s5963_s27  ;;  %22 = sbr.rel (!%p20_p5) target bundleno = 5 (0x5), region = 111 }
 0x37b   :  { %4806 = vsyncpa [#allocation4], 1 }
 0x37c   :  { %4808 = vsyncpa [#allocation4 + $0x1], 1 }
 0x37d   :  { %4809 = vsyncpa [#allocation6], 1 }
 0x37e   :  { %4811 = vsyncpa [#allocation6 + $0x1], 1 }

</bundles_post_ra>
